<compile_context>
chip_gen: v6e
topology: v6e:2x2x1
jax: 0.10.0
libtpu: 0.0.40
codegen_flags: <defaults>
</compile_context>

<pallas_src>
import functools

import jax
import jax.numpy as jnp
from jax.experimental import pallas as pl
from jax.experimental.pallas import tpu as pltpu

_VMEM_LIMIT_BYTES = 48 * 1024 * 1024


# ----------------------------------------------------------------------------
# helpers
# ----------------------------------------------------------------------------

def _round_up(x, m):
    return ((x + m - 1) // m) * m


def _tile(dim, max_tile, align):
    """Return (tile, padded_dim).

    Prefer the full dim (always legal, no pad).  Otherwise the largest
    `align`-multiple divisor of dim <= max_tile (no pad).  Only if none exists
    fall back to padding (never happens for CLIP ViT-B/L shapes).
    """
    if dim <= max_tile:
        return dim, dim
    t = (max_tile // align) * align
    while t >= align:
        if dim % t == 0:
            return t, dim
        t -= align
    t = (max_tile // align) * align
    return t, _round_up(dim, t)


def _heads_per_step(nh, dh, target=4):
    """Largest head group near `target` with lane-aligned width (hps*Dh%128==0)."""
    cands = [g for g in range(1, nh + 1) if nh % g == 0 and (g * dh) % 128 == 0]
    if not cands:
        return None
    for g in cands:
        if g >= target:
            return g
    return cands[-1]


# ----------------------------------------------------------------------------
# Tiled matmul: bf16 MXU inputs, f32 accumulation, optional bias / QuickGELU /
# residual fused in the epilogue.  Skips the accumulator scratch when n_k==1.
# ----------------------------------------------------------------------------

def _mm_kernel(*refs, n_k, has_bias, has_residual, activation):
    it = iter(refs)
    x_ref = next(it)
    w_ref = next(it)
    b_ref = next(it) if has_bias else None
    r_ref = next(it) if has_residual else None
    o_ref = next(it)
    acc_ref = next(it) if n_k > 1 else None

    def epilogue(acc):
        if has_bias:
            acc = acc + b_ref[...]
        if activation == "quick_gelu":
            # CLIP QuickGELU: x * sigmoid(1.702 x) — sigmoid lowers to the EUP.
            acc = acc * jax.nn.sigmoid(1.702 * acc)
        if has_residual:
            acc = acc + r_ref[...]
        o_ref[...] = acc.astype(o_ref.dtype)

    if n_k == 1:
        epilogue(jnp.dot(x_ref[...], w_ref[...],
                         preferred_element_type=jnp.float32))
    else:
        @pl.when(pl.program_id(2) == 0)
        def _():
            acc_ref[...] = jnp.zeros_like(acc_ref)

        acc_ref[...] += jnp.dot(x_ref[...], w_ref[...],
                                preferred_element_type=jnp.float32)

        @pl.when(pl.program_id(2) == n_k - 1)
        def _():
            epilogue(acc_ref[...])


def matmul(x, w, b=None, residual=None, activation="none",
           out_dtype=jnp.float32, tm_max=256, tn_max=256, tk_max=4096):
    """act(x @ w + b) + residual.  x:(M,K), w:(K,N) bf16-cast, out (M,N)."""
    M, K = x.shape
    K2, N = w.shape
    assert K == K2
    tm, Mp = _tile(M, tm_max, 8)
    tn, Np = _tile(N, tn_max, 128)
    tk, Kp = _tile(K, tk_max, 128)
    n_k = Kp // tk

    xb = x.astype(jnp.bfloat16)
    wb = w.astype(jnp.bfloat16)
    if (Mp, Kp) != (M, K):
        xb = jnp.pad(xb, ((0, Mp - M), (0, Kp - K)))
    if (Kp, Np) != (K, N):
        wb = jnp.pad(wb, ((0, Kp - K), (0, Np - N)))

    operands = [xb, wb]
    in_specs = [
        pl.BlockSpec((tm, tk), lambda i, j, k: (i, k)),
        pl.BlockSpec((tk, tn), lambda i, j, k: (k, j)),
    ]
    if b is not None:
        bb = b.reshape(1, N).astype(jnp.float32)
        if Np != N:
            bb = jnp.pad(bb, ((0, 0), (0, Np - N)))
        operands.append(bb)
        in_specs.append(pl.BlockSpec((1, tn), lambda i, j, k: (0, j)))
    if residual is not None:
        rr = residual.astype(jnp.float32)
        if (Mp, Np) != (M, N):
            rr = jnp.pad(rr, ((0, Mp - M), (0, Np - N)))
        operands.append(rr)
        in_specs.append(pl.BlockSpec((tm, tn), lambda i, j, k: (i, j)))

    kernel = functools.partial(
        _mm_kernel, n_k=n_k, has_bias=b is not None,
        has_residual=residual is not None, activation=activation)
    scratch = [pltpu.VMEM((tm, tn), jnp.float32)] if n_k > 1 else []

    out = pl.pallas_call(
        kernel,
        out_shape=jax.ShapeDtypeStruct((Mp, Np), out_dtype),
        grid=(Mp // tm, Np // tn, n_k),
        in_specs=in_specs,
        out_specs=pl.BlockSpec((tm, tn), lambda i, j, k: (i, j)),
        scratch_shapes=scratch,
        compiler_params=pltpu.CompilerParams(
            dimension_semantics=("parallel", "parallel", "arbitrary"),
            vmem_limit_bytes=_VMEM_LIMIT_BYTES),
    )(*operands)
    if (Mp, Np) != (M, N):
        out = out[:M, :N]
    return out


# ----------------------------------------------------------------------------
# LayerNorm fused into a matmul prologue.  The normalized row tile is computed
# once per i (at j==0) into a bf16 VMEM scratch and reused across all N tiles.
# ----------------------------------------------------------------------------

def _ln_mm_kernel(*refs, has_bias, activation, eps):
    it = iter(refs)
    x_ref = next(it)
    g_ref = next(it)
    beta_ref = next(it)
    w_ref = next(it)
    b_ref = next(it) if has_bias else None
    o_ref = next(it)
    xn_ref = next(it)          # (tm, D) bf16 scratch

    @pl.when(pl.program_id(1) == 0)
    def _():
        x = x_ref[...]
        mu = jnp.mean(x, axis=-1, keepdims=True)
        xc = x - mu
        var = jnp.mean(xc * xc, axis=-1, keepdims=True)
        xn = xc * jax.lax.rsqrt(var + eps) * g_ref[...] + beta_ref[...]
        xn_ref[...] = xn.astype(jnp.bfloat16)

    acc = jnp.dot(xn_ref[...], w_ref[...], preferred_element_type=jnp.float32)
    if has_bias:
        acc = acc + b_ref[...]
    if activation == "quick_gelu":
        acc = acc * jax.nn.sigmoid(1.702 * acc)
    o_ref[...] = acc.astype(o_ref.dtype)


def ln_matmul(x, gamma, beta, w, b=None, activation="none", eps=1e-5,
              out_dtype=jnp.float32, tm_max=256, tn_max=256):
    """act(LayerNorm(x) @ w + b); LN done once per row tile."""
    M, D = x.shape
    D2, N = w.shape
    assert D == D2
    tm, Mp = _tile(M, tm_max, 8)
    tn, Np = _tile(N, tn_max, 128)

    xf = x.astype(jnp.float32)
    if Mp != M:
        xf = jnp.pad(xf, ((0, Mp - M), (0, 0)))
    wb = w.astype(jnp.bfloat16)
    if Np != N:
        wb = jnp.pad(wb, ((0, 0), (0, Np - N)))

    operands = [xf, gamma.reshape(1, D).astype(jnp.float32),
                beta.reshape(1, D).astype(jnp.float32), wb]
    in_specs = [
        pl.BlockSpec((tm, D), lambda i, j: (i, 0)),
        pl.BlockSpec((1, D), lambda i, j: (0, 0)),
        pl.BlockSpec((1, D), lambda i, j: (0, 0)),
        pl.BlockSpec((D, tn), lambda i, j: (0, j)),
    ]
    if b is not None:
        bb = b.reshape(1, N).astype(jnp.float32)
        if Np != N:
            bb = jnp.pad(bb, ((0, 0), (0, Np - N)))
        operands.append(bb)
        in_specs.append(pl.BlockSpec((1, tn), lambda i, j: (0, j)))

    kernel = functools.partial(_ln_mm_kernel, has_bias=b is not None,
                               activation=activation, eps=eps)
    out = pl.pallas_call(
        kernel,
        out_shape=jax.ShapeDtypeStruct((Mp, Np), out_dtype),
        grid=(Mp // tm, Np // tn),
        in_specs=in_specs,
        out_specs=pl.BlockSpec((tm, tn), lambda i, j: (i, j)),
        scratch_shapes=[pltpu.VMEM((tm, D), jnp.bfloat16)],
        compiler_params=pltpu.CompilerParams(
            dimension_semantics=("parallel", "arbitrary"),
            vmem_limit_bytes=_VMEM_LIMIT_BYTES),
    )(*operands)
    if (Mp, Np) != (M, N):
        out = out[:M, :N]
    return out


# ----------------------------------------------------------------------------
# ln_pre with the positional-embedding add fused in (cls concat is JAX glue).
# ----------------------------------------------------------------------------

def _pos_ln_kernel(x_ref, pos_ref, g_ref, b_ref, o_ref, *, eps):
    x = x_ref[...] + pos_ref[...]
    mu = jnp.mean(x, axis=-1, keepdims=True)
    xc = x - mu
    var = jnp.mean(xc * xc, axis=-1, keepdims=True)
    o_ref[...] = (xc * jax.lax.rsqrt(var + eps) * g_ref[...]
                  + b_ref[...]).astype(o_ref.dtype)


def add_pos_layernorm(h, pos, gamma, beta, eps=1e-5):
    """h: (B, S, D) f32, pos: (S, D) f32 -> LayerNorm(h + pos) f32."""
    B, S, D = h.shape
    return pl.pallas_call(
        functools.partial(_pos_ln_kernel, eps=eps),
        out_shape=jax.ShapeDtypeStruct((B, S, D), jnp.float32),
        grid=(B,),
        in_specs=[
            pl.BlockSpec((1, S, D), lambda b: (b, 0, 0)),
            pl.BlockSpec((1, S, D), lambda b: (0, 0, 0)),
            pl.BlockSpec((1, 1, D), lambda b: (0, 0, 0)),
            pl.BlockSpec((1, 1, D), lambda b: (0, 0, 0)),
        ],
        out_specs=pl.BlockSpec((1, S, D), lambda b: (b, 0, 0)),
        compiler_params=pltpu.CompilerParams(
            dimension_semantics=("parallel",),
            vmem_limit_bytes=_VMEM_LIMIT_BYTES),
    )(h, pos.reshape(1, S, D), gamma.reshape(1, 1, D), beta.reshape(1, 1, D))


# ----------------------------------------------------------------------------
# Multi-head attention straight from the packed (B, S, 3D) QKV buffer via
# BlockSpec column offsets; lane-dense (S, hps*Dh) output columns of (B,S,D).
# ----------------------------------------------------------------------------

def _attn_head(qh_scaled, kh, vh, s_real):
    """One head: qh_scaled/kh/vh (S, Dh) bf16 -> (S, Dh) f32."""
    S = qh_scaled.shape[0]
    s = jax.lax.dot_general(qh_scaled, kh, (((1,), (1,)), ((), ())),
                            preferred_element_type=jnp.float32)      # (S, S)
    if s_real < S:
        kidx = jax.lax.broadcasted_iota(jnp.int32, (1, S), 1)
        s = jnp.where(kidx < s_real, s, -1e30)                       # mask pads
    s = s - jnp.max(s, axis=-1, keepdims=True)
    p = jnp.exp(s)
    p = p * pl.reciprocal(jnp.sum(p, axis=-1, keepdims=True), approx=True)
    return jnp.dot(p.astype(jnp.bfloat16), vh,
                   preferred_element_type=jnp.float32)


def _attn_group_kernel(q_ref, k_ref, v_ref, o_ref, *, scale, s_real, hps, dh):
    S = q_ref.shape[1]
    W = hps * dh
    qb = q_ref[...].reshape(S, W)
    kb = k_ref[...].reshape(S, W)
    vb = v_ref[...].reshape(S, W)
    outs = []
    for h in range(hps):
        sl = slice(h * dh, (h + 1) * dh)
        outs.append(_attn_head(qb[:, sl] * scale, kb[:, sl], vb[:, sl], s_real))
    o = jnp.concatenate(outs, axis=-1) if hps > 1 else outs[0]       # (S, W)
    o_ref[...] = o.reshape(1, S, W).astype(o_ref.dtype)


def _attn_full_kernel(qkv_ref, o_ref, *, scale, s_real, nh, dh):
    # Fallback when no lane-aligned head grouping exists (D % 128 != 0).
    S = qkv_ref.shape[1]
    D = nh * dh
    qkv = qkv_ref[...].reshape(S, 3 * D)
    outs = []
    for h in range(nh):
        qh = qkv[:, h * dh:(h + 1) * dh] * scale
        kh = qkv[:, D + h * dh:D + (h + 1) * dh]
        vh = qkv[:, 2 * D + h * dh:2 * D + (h + 1) * dh]
        outs.append(_attn_head(qh, kh, vh, s_real))
    o = jnp.concatenate(outs, axis=-1) if nh > 1 else outs[0]
    o_ref[...] = o.reshape(1, S, D).astype(o_ref.dtype)


def attention(qkv, nh, dh, s_real, out_dtype=jnp.bfloat16):
    """qkv: (B, S_pad, 3D) bf16 -> (B, S_pad, D) out_dtype."""
    B, S_pad, threeD = qkv.shape
    D = nh * dh
    assert threeD == 3 * D
    scale = dh ** -0.5
    hps = _heads_per_step(nh, dh)
    if hps is not None:
        W = hps * dh
        n_grp = nh // hps
        kernel = functools.partial(_attn_group_kernel, scale=scale,
                                   s_real=s_real, hps=hps, dh=dh)
        grid = (B, n_grp)
        in_specs = [
            pl.BlockSpec((1, S_pad, W), lambda b, g: (b, 0, g)),
            pl.BlockSpec((1, S_pad, W), lambda b, g: (b, 0, n_grp + g)),
            pl.BlockSpec((1, S_pad, W), lambda b, g: (b, 0, 2 * n_grp + g)),
        ]
        out_spec = pl.BlockSpec((1, S_pad, W), lambda b, g: (b, 0, g))
        args = (qkv, qkv, qkv)
        dims = ("parallel", "parallel")
    else:
        # TODO(synk): no lane-aligned head grouping (D % 128 != 0) — process
        # the full qkv block per batch element instead of column-offset specs.
        kernel = functools.partial(_attn_full_kernel, scale=scale,
                                   s_real=s_real, nh=nh, dh=dh)
        grid = (B,)
        in_specs = [pl.BlockSpec((1, S_pad, 3 * D), lambda b: (b, 0, 0))]
        out_spec = pl.BlockSpec((1, S_pad, D), lambda b: (b, 0, 0))
        args = (qkv,)
        dims = ("parallel",)

    return pl.pallas_call(
        kernel,
        out_shape=jax.ShapeDtypeStruct((B, S_pad, D), out_dtype),
        grid=grid,
        in_specs=in_specs,
        out_specs=out_spec,
        compiler_params=pltpu.CompilerParams(
            dimension_semantics=dims,
            vmem_limit_bytes=_VMEM_LIMIT_BYTES),
    )(*args)


# ----------------------------------------------------------------------------
# Parameter construction (deterministic, synthetic — mimics the module's RGBD
# patch-embedding surgery).
# TODO(synk): real use loads the pretrained CLIP checkpoint (torch clip.load);
# here the weights are synthetic but the RGBD channel-4 surgery is reproduced.
# ----------------------------------------------------------------------------

def init_params(key, *, width, layers, heads, patch, image_size, output_dim,
                use_rgbd=True):
    D = width
    gh = image_size // patch
    S = gh * gh + 1
    ks = jax.random.split(key, 8 + layers)

    def nrm(k, shape, scale=0.02):
        return (scale * jax.random.normal(k, shape)).astype(jnp.float32)

    params = {}
    w_rgb = nrm(ks[0], (D, 3, patch, patch))
    if use_rgbd:
        w_depth = jnp.mean(w_rgb, axis=1, keepdims=True)        # ch3 = mean(RGB)
        conv_w = jnp.concatenate([w_rgb, w_depth], axis=1)      # (D, 4, p, p)
        cin = 4
    else:
        conv_w = w_rgb
        cin = 3
    # Conv (kernel==stride==patch, no bias) as matmul; stored bf16 (MXU native).
    params["conv1_w"] = conv_w.reshape(D, cin * patch * patch).T.astype(jnp.bfloat16)
    params["cls"] = nrm(ks[1], (D,), D ** -0.5)
    params["pos"] = nrm(ks[2], (S, D), D ** -0.5)
    params["ln_pre_w"] = jnp.ones((D,), jnp.float32)
    params["ln_pre_b"] = jnp.zeros((D,), jnp.float32)
    params["ln_post_w"] = jnp.ones((D,), jnp.float32)
    params["ln_post_b"] = jnp.zeros((D,), jnp.float32)
    params["proj"] = nrm(ks[3], (D, output_dim), D ** -0.5).astype(jnp.bfloat16)

    blocks = []
    for l in range(layers):
        bk = jax.random.split(ks[8 + l], 6)
        blocks.append({
            "ln1_w": jnp.ones((D,), jnp.float32),
            "ln1_b": jnp.zeros((D,), jnp.float32),
            "in_proj_w": nrm(bk[0], (D, 3 * D)).astype(jnp.bfloat16),
            "in_proj_b": jnp.zeros((3 * D,), jnp.float32),
            "out_proj_w": nrm(bk[1], (D, D)).astype(jnp.bfloat16),
            "out_proj_b": jnp.zeros((D,), jnp.float32),
            "ln2_w": jnp.ones((D,), jnp.float32),
            "ln2_b": jnp.zeros((D,), jnp.float32),
            "fc1_w": nrm(bk[2], (D, 4 * D)).astype(jnp.bfloat16),
            "fc1_b": jnp.zeros((4 * D,), jnp.float32),
            "fc2_w": nrm(bk[3], (4 * D, D)).astype(jnp.bfloat16),
            "fc2_b": jnp.zeros((D,), jnp.float32),
        })
    params["blocks"] = blocks
    params["meta"] = dict(width=D, layers=layers, heads=heads, patch=patch,
                          image_size=image_size, output_dim=output_dim,
                          use_rgbd=use_rgbd)
    return params


# ----------------------------------------------------------------------------
# RGBDCLIP forward (== model.encode_image on the RGBD-patched ViT)
# ----------------------------------------------------------------------------

def rgbd_clip_forward(x, params):
    """x: (B, C, H, W) NCHW, C=4 if USE_RGBD else >=3. Returns (B, output_dim)."""
    meta = params["meta"]
    D, NH, p = meta["width"], meta["heads"], meta["patch"]
    use_rgbd = meta["use_rgbd"]
    if not use_rgbd:
        x = x[:, :3]                                   # encode_image(x[:, :3])
    B, C, H, W = x.shape
    gh, gw = H // p, W // p
    Dh = D // NH

    # --- patch embedding: strided conv == per-patch matmul (glue reshape) ---
    patches = x.reshape(B, C, gh, p, gw, p).transpose(0, 2, 4, 1, 3, 5)
    patches = patches.reshape(B * gh * gw, C * p * p)
    emb = matmul(patches, params["conv1_w"])           # (B*gh*gw, D) f32
    emb = emb.reshape(B, gh * gw, D)

    # --- class token, pad S once to a sublane multiple, fuse +pos into ln_pre
    cls = jnp.broadcast_to(params["cls"].reshape(1, 1, D), (B, 1, D))
    h = jnp.concatenate([cls, emb], axis=1)            # (B, S, D)
    S = h.shape[1]
    S_pad = _round_up(S, 8)
    if S_pad != S:
        h = jnp.pad(h, ((0, 0), (0, S_pad - S), (0, 0)))
    pos = params["pos"].astype(jnp.float32)
    if S_pad != S:
        pos = jnp.pad(pos, ((0, S_pad - S), (0, 0)))
    h = add_pos_layernorm(h, pos, params["ln_pre_w"], params["ln_pre_b"])
    h = h.reshape(B * S_pad, D)                        # stays padded until the end

    # --- transformer residual attention blocks ---
    for blk in params["blocks"]:
        # attention sub-block: ln1 fused into the QKV projection kernel
        qkv = ln_matmul(h, blk["ln1_w"], blk["ln1_b"],
                        blk["in_proj_w"], blk["in_proj_b"],
                        out_dtype=jnp.bfloat16)        # (B*S_pad, 3D) bf16
        o = attention(qkv.reshape(B, S_pad, 3 * D), NH, Dh, s_real=S)
        # residual add fused into the out_proj epilogue
        h = matmul(o.reshape(B * S_pad, D), blk["out_proj_w"],
                   blk["out_proj_b"], residual=h)

        # MLP sub-block: ln2 + QuickGELU fused into fc1, residual into fc2
        m = ln_matmul(h, blk["ln2_w"], blk["ln2_b"],
                      blk["fc1_w"], blk["fc1_b"], activation="quick_gelu",
                      out_dtype=jnp.bfloat16)
        h = matmul(m, blk["fc2_w"], blk["fc2_b"], residual=h)

    # --- take class token, ln_post fused into the final projection ---
    h = h.reshape(B, S_pad, D)
    cls_tok = h[:, 0, :]                               # (B, D) — padded rows dropped
    feats = ln_matmul(cls_tok, params["ln_post_w"], params["ln_post_b"],
                      params["proj"])                  # (B, output_dim) f32
    return feats


# ----------------------------------------------------------------------------
# Main
# ----------------------------------------------------------------------------

if __name__ == "__main__":
    # Small, forward-consistent shapes (real ViT-B/32: width=768, layers=12,
    # heads=12, patch=32, image 224, output 512 — scaled down here; width=128
    # keeps head groups lane-aligned like the real model).
    B, C, IMG = 2, 4, 16
    WIDTH, LAYERS, HEADS, PATCH, OUT_DIM = 128, 2, 4, 4, 64

    key = jax.random.PRNGKey(0)
    k_param, k_x = jax.random.split(key)

    params = init_params(k_param, width=WIDTH, layers=LAYERS, heads=HEADS,
                         patch=PATCH, image_size=IMG, output_dim=OUT_DIM,
                         use_rgbd=True)

    # NCHW RGBD input, matching the PyTorch module's expected layout.
    x = jax.random.normal(k_x, (B, C, IMG, IMG), dtype=jnp.float32)

    fwd = jax.jit(lambda inp: rgbd_clip_forward(inp, params))
    feats = jax.block_until_ready(fwd(x))
    assert feats.shape == (B, OUT_DIM) and feats.dtype == jnp.float32
    assert bool(jnp.all(jnp.isfinite(feats)))
    print("KERNEL_OK")
</pallas_src>

<mosaic_0001>
module attributes {stable_mosaic.version = 11 : i64} {
  func.func @_mm_kernel(%arg0: i32, %arg1: i32, %arg2: i32, %arg3: memref<32x64xbf16, #tpu.memory_space<vmem>>, %arg4: memref<64x128xbf16, #tpu.memory_space<vmem>>, %arg5: memref<32x128xf32, #tpu.memory_space<vmem>>) attributes {dimension_semantics = [#tpu.dimension_semantics<parallel>, #tpu.dimension_semantics<parallel>, #tpu.dimension_semantics<arbitrary>], iteration_bounds = array<i64: 1, 1, 1>, scalar_prefetch = 0 : i64, scratch_operands = 0 : i64, tpu.core_type = #tpu.core_type<tc>, window_params = [{transform_indices = @transform_0, window_bounds = array<i64: 32, 64>}, {transform_indices = @transform_1, window_bounds = array<i64: 64, 128>}, {transform_indices = @transform_2, window_bounds = array<i64: 32, 128>}]} {
    %c0 = arith.constant 0 : index
    %c0_0 = arith.constant 0 : index
    %0 = vector.load %arg3[%c0, %c0_0] : memref<32x64xbf16, #tpu.memory_space<vmem>>, vector<32x64xbf16>
    %c0_1 = arith.constant 0 : index
    %c0_2 = arith.constant 0 : index
    %1 = vector.load %arg4[%c0_1, %c0_2] : memref<64x128xbf16, #tpu.memory_space<vmem>>, vector<64x128xbf16>
    %cst = arith.constant dense<0.000000e+00> : vector<32x128xf32>
    %2 = tpu.matmul %0, %1, %cst {dimension_numbers = #tpu.dot_dimension_numbers<[1], [0], [0], [1], [0, 0, 1, 1], [], []>} : vector<32x64xbf16>, vector<64x128xbf16>, vector<32x128xf32> -> vector<32x128xf32>
    %c0_3 = arith.constant 0 : index
    %c0_4 = arith.constant 0 : index
    %3 = vector.load %arg5[%c0_3, %c0_4] : memref<32x128xf32, #tpu.memory_space<vmem>>, vector<32x128xf32>
    tpu.vector_store %arg5[%c0_3, %c0_4], %2 {strides = array<i32>} : memref<32x128xf32, #tpu.memory_space<vmem>>, vector<32x128xf32>,
    return
  }
  func.func @transform_0(%arg0: i32, %arg1: i32, %arg2: i32) -> (i32, i32) {
    %c0_i32 = arith.constant 0 : i32
    return %arg0, %arg2 : i32, i32
  }
  func.func @transform_1(%arg0: i32, %arg1: i32, %arg2: i32) -> (i32, i32) {
    %c0_i32 = arith.constant 0 : i32
    return %arg2, %arg1 : i32, i32
  }
  func.func @transform_2(%arg0: i32, %arg1: i32, %arg2: i32) -> (i32, i32) {
    %c0_i32 = arith.constant 0 : i32
    return %arg0, %arg1 : i32, i32
  }
}

module attributes {stable_mosaic.version = 11 : i64} {
  func.func @_pos_ln_kernel(%arg0: i32, %arg1: memref<1x24x128xf32, #tpu.memory_space<vmem>>, %arg2: memref<1x24x128xf32, #tpu.memory_space<vmem>>, %arg3: memref<1x1x128xf32, #tpu.memory_space<vmem>>, %arg4: memref<1x1x128xf32, #tpu.memory_space<vmem>>, %arg5: memref<1x24x128xf32, #tpu.memory_space<vmem>>) attributes {dimension_semantics = [#tpu.dimension_semantics<parallel>], iteration_bounds = array<i64: 2>, scalar_prefetch = 0 : i64, scratch_operands = 0 : i64, tpu.core_type = #tpu.core_type<tc>, window_params = [{transform_indices = @transform_0, window_bounds = array<i64: 1, 24, 128>}, {pipeline_mode = #tpu.pipeline_mode<synchronous>, transform_indices = @transform_1, window_bounds = array<i64: 1, 24, 128>}, {pipeline_mode = #tpu.pipeline_mode<synchronous>, transform_indices = @transform_2, window_bounds = array<i64: 1, 1, 128>}, {pipeline_mode = #tpu.pipeline_mode<synchronous>, transform_indices = @transform_3, window_bounds = array<i64: 1, 1, 128>}, {transform_indices = @transform_4, window_bounds = array<i64: 1, 24, 128>}]} {
    %c0 = arith.constant 0 : index
    %c0_0 = arith.constant 0 : index
    %c0_1 = arith.constant 0 : index
    %0 = vector.load %arg1[%c0, %c0_0, %c0_1] : memref<1x24x128xf32, #tpu.memory_space<vmem>>, vector<1x24x128xf32>
    %c0_2 = arith.constant 0 : index
    %c0_3 = arith.constant 0 : index
    %c0_4 = arith.constant 0 : index
    %1 = vector.load %arg2[%c0_2, %c0_3, %c0_4] : memref<1x24x128xf32, #tpu.memory_space<vmem>>, vector<1x24x128xf32>
    %2 = arith.addf %0, %1 : vector<1x24x128xf32>
    %cst = arith.constant dense<0.000000e+00> : vector<1x24xf32>
    %3 = vector.multi_reduction <add>, %2, %cst [2] : vector<1x24x128xf32> to vector<1x24xf32>
    %4 = vector.shape_cast %3 : vector<1x24xf32> to vector<1x24x1xf32>
    %cst_5 = arith.constant 1.280000e+02 : f32
    %5 = vector.broadcast %cst_5 : f32 to vector<1x24x1xf32>
    %6 = arith.divf %4, %5 : vector<1x24x1xf32>
    %7 = vector.broadcast %6 : vector<1x24x1xf32> to vector<1x24x128xf32>
    %8 = arith.subf %2, %7 : vector<1x24x128xf32>
    %9 = arith.mulf %8, %8 : vector<1x24x128xf32>
    %cst_6 = arith.constant dense<0.000000e+00> : vector<1x24xf32>
    %10 = vector.multi_reduction <add>, %9, %cst_6 [2] : vector<1x24x128xf32> to vector<1x24xf32>
    %11 = vector.shape_cast %10 : vector<1x24xf32> to vector<1x24x1xf32>
    %cst_7 = arith.constant 1.280000e+02 : f32
    %12 = vector.broadcast %cst_7 : f32 to vector<1x24x1xf32>
    %13 = arith.divf %11, %12 : vector<1x24x1xf32>
    %cst_8 = arith.constant 9.99999974E-6 : f32
    %14 = vector.broadcast %cst_8 : f32 to vector<1x24x1xf32>
    %15 = arith.addf %13, %14 : vector<1x24x1xf32>
    %16 = math.rsqrt %15 : vector<1x24x1xf32>
    %17 = vector.broadcast %16 : vector<1x24x1xf32> to vector<1x24x128xf32>
    %18 = arith.mulf %8, %17 : vector<1x24x128xf32>
    %c0_9 = arith.constant 0 : index
    %c0_10 = arith.constant 0 : index
    %c0_11 = arith.constant 0 : index
    %19 = vector.load %arg3[%c0_9, %c0_10, %c0_11] : memref<1x1x128xf32, #tpu.memory_space<vmem>>, vector<1x1x128xf32>
    %20 = vector.broadcast %19 : vector<1x1x128xf32> to vector<1x24x128xf32>
    %21 = arith.mulf %18, %20 : vector<1x24x128xf32>
    %c0_12 = arith.constant 0 : index
    %c0_13 = arith.constant 0 : index
    %c0_14 = arith.constant 0 : index
    %22 = vector.load %arg4[%c0_12, %c0_13, %c0_14] : memref<1x1x128xf32, #tpu.memory_space<vmem>>, vector<1x1x128xf32>
    %23 = vector.broadcast %22 : vector<1x1x128xf32> to vector<1x24x128xf32>
    %24 = arith.addf %21, %23 : vector<1x24x128xf32>
    %c0_15 = arith.constant 0 : index
    %c0_16 = arith.constant 0 : index
    %c0_17 = arith.constant 0 : index
    %25 = vector.load %arg5[%c0_15, %c0_16, %c0_17] : memref<1x24x128xf32, #tpu.memory_space<vmem>>, vector<1x24x128xf32>
    tpu.vector_store %arg5[%c0_15, %c0_16, %c0_17], %24 {strides = array<i32>} : memref<1x24x128xf32, #tpu.memory_space<vmem>>, vector<1x24x128xf32>,
    return
  }
  func.func @transform_0(%arg0: i32) -> (i32, i32, i32) {
    %c0_i32 = arith.constant 0 : i32
    %c0_i32_0 = arith.constant 0 : i32
    %c0_i32_1 = arith.constant 0 : i32
    return %arg0, %c0_i32, %c0_i32_0 : i32, i32, i32
  }
  func.func @transform_1(%arg0: i32) -> (i32, i32, i32) {
    %c0_i32 = arith.constant 0 : i32
    %c0_i32_0 = arith.constant 0 : i32
    %c0_i32_1 = arith.constant 0 : i32
    %c0_i32_2 = arith.constant 0 : i32
    return %c0_i32, %c0_i32_0, %c0_i32_1 : i32, i32, i32
  }
  func.func @transform_2(%arg0: i32) -> (i32, i32, i32) {
    %c0_i32 = arith.constant 0 : i32
    %c0_i32_0 = arith.constant 0 : i32
    %c0_i32_1 = arith.constant 0 : i32
    %c0_i32_2 = arith.constant 0 : i32
    return %c0_i32, %c0_i32_0, %c0_i32_1 : i32, i32, i32
  }
  func.func @transform_3(%arg0: i32) -> (i32, i32, i32) {
    %c0_i32 = arith.constant 0 : i32
    %c0_i32_0 = arith.constant 0 : i32
    %c0_i32_1 = arith.constant 0 : i32
    %c0_i32_2 = arith.constant 0 : i32
    return %c0_i32, %c0_i32_0, %c0_i32_1 : i32, i32, i32
  }
  func.func @transform_4(%arg0: i32) -> (i32, i32, i32) {
    %c0_i32 = arith.constant 0 : i32
    %c0_i32_0 = arith.constant 0 : i32
    %c0_i32_1 = arith.constant 0 : i32
    return %arg0, %c0_i32, %c0_i32_0 : i32, i32, i32
  }
}

module attributes {stable_mosaic.version = 11 : i64} {
  func.func @_ln_mm_kernel(%arg0: i32, %arg1: i32, %arg2: memref<48x128xf32, #tpu.memory_space<vmem>>, %arg3: memref<1x128xf32, #tpu.memory_space<vmem>>, %arg4: memref<1x128xf32, #tpu.memory_space<vmem>>, %arg5: memref<128x128xbf16, #tpu.memory_space<vmem>>, %arg6: memref<1x128xf32, #tpu.memory_space<vmem>>, %arg7: memref<48x128xbf16, #tpu.memory_space<vmem>>, %arg8: memref<48x128xbf16, #tpu.memory_space<vmem>>) attributes {dimension_semantics = [#tpu.dimension_semantics<parallel>, #tpu.dimension_semantics<arbitrary>], iteration_bounds = array<i64: 1, 3>, scalar_prefetch = 0 : i64, scratch_operands = 1 : i64, tpu.core_type = #tpu.core_type<tc>, window_params = [{transform_indices = @transform_0, window_bounds = array<i64: 48, 128>}, {pipeline_mode = #tpu.pipeline_mode<synchronous>, transform_indices = @transform_1, window_bounds = array<i64: 1, 128>}, {pipeline_mode = #tpu.pipeline_mode<synchronous>, transform_indices = @transform_2, window_bounds = array<i64: 1, 128>}, {transform_indices = @transform_3, window_bounds = array<i64: 128, 128>}, {transform_indices = @transform_4, window_bounds = array<i64: 1, 128>}, {transform_indices = @transform_5, window_bounds = array<i64: 48, 128>}]} {
    %c0_i32 = arith.constant 0 : i32
    %0 = arith.cmpi eq, %arg1, %c0_i32 : i32
    %1 = arith.extui %0 : i1 to i32
    %c0_i32_0 = arith.constant 0 : i32
    %2 = arith.cmpi ne, %1, %c0_i32_0 : i32
    scf.if %2 {
      %c0_8 = arith.constant 0 : index
      %c0_9 = arith.constant 0 : index
      %11 = vector.load %arg2[%c0_8, %c0_9] : memref<48x128xf32, #tpu.memory_space<vmem>>, vector<48x128xf32>
      %cst_10 = arith.constant dense<0.000000e+00> : vector<48xf32>
      %12 = vector.multi_reduction <add>, %11, %cst_10 [1] : vector<48x128xf32> to vector<48xf32>
      %13 = vector.shape_cast %12 : vector<48xf32> to vector<48x1xf32>
      %cst_11 = arith.constant 1.280000e+02 : f32
      %14 = vector.broadcast %cst_11 : f32 to vector<48x1xf32>
      %15 = arith.divf %13, %14 : vector<48x1xf32>
      %16 = vector.broadcast %15 : vector<48x1xf32> to vector<48x128xf32>
      %17 = arith.subf %11, %16 : vector<48x128xf32>
      %18 = arith.mulf %17, %17 : vector<48x128xf32>
      %cst_12 = arith.constant dense<0.000000e+00> : vector<48xf32>
      %19 = vector.multi_reduction <add>, %18, %cst_12 [1] : vector<48x128xf32> to vector<48xf32>
      %20 = vector.shape_cast %19 : vector<48xf32> to vector<48x1xf32>
      %cst_13 = arith.constant 1.280000e+02 : f32
      %21 = vector.broadcast %cst_13 : f32 to vector<48x1xf32>
      %22 = arith.divf %20, %21 : vector<48x1xf32>
      %cst_14 = arith.constant 9.99999974E-6 : f32
      %23 = vector.broadcast %cst_14 : f32 to vector<48x1xf32>
      %24 = arith.addf %22, %23 : vector<48x1xf32>
      %25 = math.rsqrt %24 : vector<48x1xf32>
      %26 = vector.broadcast %25 : vector<48x1xf32> to vector<48x128xf32>
      %27 = arith.mulf %17, %26 : vector<48x128xf32>
      %c0_15 = arith.constant 0 : index
      %c0_16 = arith.constant 0 : index
      %28 = vector.load %arg3[%c0_15, %c0_16] : memref<1x128xf32, #tpu.memory_space<vmem>>, vector<1x128xf32>
      %29 = vector.broadcast %28 : vector<1x128xf32> to vector<48x128xf32>
      %30 = arith.mulf %27, %29 : vector<48x128xf32>
      %c0_17 = arith.constant 0 : index
      %c0_18 = arith.constant 0 : index
      %31 = vector.load %arg4[%c0_17, %c0_18] : memref<1x128xf32, #tpu.memory_space<vmem>>, vector<1x128xf32>
      %32 = vector.broadcast %31 : vector<1x128xf32> to vector<48x128xf32>
      %33 = arith.addf %30, %32 : vector<48x128xf32>
      %34 = arith.truncf %33 : vector<48x128xf32> to vector<48x128xbf16>
      %c0_19 = arith.constant 0 : index
      %c0_20 = arith.constant 0 : index
      %35 = vector.load %arg8[%c0_19, %c0_20] : memref<48x128xbf16, #tpu.memory_space<vmem>>, vector<48x128xbf16>
      tpu.vector_store %arg8[%c0_19, %c0_20], %34 {strides = array<i32>} : memref<48x128xbf16, #tpu.memory_space<vmem>>, vector<48x128xbf16>,
    } else {
    }
    %c0 = arith.constant 0 : index
    %c0_1 = arith.constant 0 : index
    %3 = vector.load %arg8[%c0, %c0_1] : memref<48x128xbf16, #tpu.memory_space<vmem>>, vector<48x128xbf16>
    %c0_2 = arith.constant 0 : index
    %c0_3 = arith.constant 0 : index
    %4 = vector.load %arg5[%c0_2, %c0_3] : memref<128x128xbf16, #tpu.memory_space<vmem>>, vector<128x128xbf16>
    %cst = arith.constant dense<0.000000e+00> : vector<48x128xf32>
    %5 = tpu.matmul %3, %4, %cst {dimension_numbers = #tpu.dot_dimension_numbers<[1], [0], [0], [1], [0, 0, 1, 1], [], []>} : vector<48x128xbf16>, vector<128x128xbf16>, vector<48x128xf32> -> vector<48x128xf32>
    %c0_4 = arith.constant 0 : index
    %c0_5 = arith.constant 0 : index
    %6 = vector.load %arg6[%c0_4, %c0_5] : memref<1x128xf32, #tpu.memory_space<vmem>>, vector<1x128xf32>
    %7 = vector.broadcast %6 : vector<1x128xf32> to vector<48x128xf32>
    %8 = arith.addf %5, %7 : vector<48x128xf32>
    %9 = arith.truncf %8 : vector<48x128xf32> to vector<48x128xbf16>
    %c0_6 = arith.constant 0 : index
    %c0_7 = arith.constant 0 : index
    %10 = vector.load %arg7[%c0_6, %c0_7] : memref<48x128xbf16, #tpu.memory_space<vmem>>, vector<48x128xbf16>
    tpu.vector_store %arg7[%c0_6, %c0_7], %9 {strides = array<i32>} : memref<48x128xbf16, #tpu.memory_space<vmem>>, vector<48x128xbf16>,
    return
  }
  func.func @transform_0(%arg0: i32, %arg1: i32) -> (i32, i32) {
    %c0_i32 = arith.constant 0 : i32
    %c0_i32_0 = arith.constant 0 : i32
    return %arg0, %c0_i32 : i32, i32
  }
  func.func @transform_1(%arg0: i32, %arg1: i32) -> (i32, i32) {
    %c0_i32 = arith.constant 0 : i32
    %c0_i32_0 = arith.constant 0 : i32
    %c0_i32_1 = arith.constant 0 : i32
    return %c0_i32, %c0_i32_0 : i32, i32
  }
  func.func @transform_2(%arg0: i32, %arg1: i32) -> (i32, i32) {
    %c0_i32 = arith.constant 0 : i32
    %c0_i32_0 = arith.constant 0 : i32
    %c0_i32_1 = arith.constant 0 : i32
    return %c0_i32, %c0_i32_0 : i32, i32
  }
  func.func @transform_3(%arg0: i32, %arg1: i32) -> (i32, i32) {
    %c0_i32 = arith.constant 0 : i32
    %c0_i32_0 = arith.constant 0 : i32
    return %c0_i32, %arg1 : i32, i32
  }
  func.func @transform_4(%arg0: i32, %arg1: i32) -> (i32, i32) {
    %c0_i32 = arith.constant 0 : i32
    %c0_i32_0 = arith.constant 0 : i32
    return %c0_i32, %arg1 : i32, i32
  }
  func.func @transform_5(%arg0: i32, %arg1: i32) -> (i32, i32) {
    %c0_i32 = arith.constant 0 : i32
    return %arg0, %arg1 : i32, i32
  }
}

module attributes {stable_mosaic.version = 11 : i64} {
  func.func @_attn_group_kernel(%arg0: i32, %arg1: i32, %arg2: memref<1x24x128xbf16, #tpu.memory_space<vmem>>, %arg3: memref<1x24x128xbf16, #tpu.memory_space<vmem>>, %arg4: memref<1x24x128xbf16, #tpu.memory_space<vmem>>, %arg5: memref<1x24x128xbf16, #tpu.memory_space<vmem>>) attributes {dimension_semantics = [#tpu.dimension_semantics<parallel>, #tpu.dimension_semantics<parallel>], iteration_bounds = array<i64: 2, 1>, scalar_prefetch = 0 : i64, scratch_operands = 0 : i64, tpu.core_type = #tpu.core_type<tc>, window_params = [{transform_indices = @transform_0, window_bounds = array<i64: 1, 24, 128>}, {transform_indices = @transform_1, window_bounds = array<i64: 1, 24, 128>}, {transform_indices = @transform_2, window_bounds = array<i64: 1, 24, 128>}, {transform_indices = @transform_3, window_bounds = array<i64: 1, 24, 128>}]} {
    %c0 = arith.constant 0 : index
    %c0_0 = arith.constant 0 : index
    %c0_1 = arith.constant 0 : index
    %0 = vector.load %arg2[%c0, %c0_0, %c0_1] : memref<1x24x128xbf16, #tpu.memory_space<vmem>>, vector<1x24x128xbf16>
    %1 = vector.shape_cast %0 : vector<1x24x128xbf16> to vector<24x128xbf16>
    %c0_2 = arith.constant 0 : index
    %c0_3 = arith.constant 0 : index
    %c0_4 = arith.constant 0 : index
    %2 = vector.load %arg3[%c0_2, %c0_3, %c0_4] : memref<1x24x128xbf16, #tpu.memory_space<vmem>>, vector<1x24x128xbf16>
    %3 = vector.shape_cast %2 : vector<1x24x128xbf16> to vector<24x128xbf16>
    %c0_5 = arith.constant 0 : index
    %c0_6 = arith.constant 0 : index
    %c0_7 = arith.constant 0 : index
    %4 = vector.load %arg4[%c0_5, %c0_6, %c0_7] : memref<1x24x128xbf16, #tpu.memory_space<vmem>>, vector<1x24x128xbf16>
    %5 = vector.shape_cast %4 : vector<1x24x128xbf16> to vector<24x128xbf16>
    %6 = vector.extract_strided_slice %1 {offsets = [0, 0], sizes = [24, 32], strides = [1, 1]} : vector<24x128xbf16> to vector<24x32xbf16>
    %cst = arith.constant 1.767580e-01 : bf16
    %7 = vector.broadcast %cst : bf16 to vector<24x32xbf16>
    %8 = arith.mulf %6, %7 : vector<24x32xbf16>
    %9 = vector.extract_strided_slice %3 {offsets = [0, 0], sizes = [24, 32], strides = [1, 1]} : vector<24x128xbf16> to vector<24x32xbf16>
    %10 = vector.extract_strided_slice %5 {offsets = [0, 0], sizes = [24, 32], strides = [1, 1]} : vector<24x128xbf16> to vector<24x32xbf16>
    %cst_8 = arith.constant dense<0.000000e+00> : vector<24x24xf32>
    %11 = tpu.matmul %8, %9, %cst_8 {dimension_numbers = #tpu.dot_dimension_numbers<[1], [1], [0], [0], [0, 0, 1, 0], [], []>} : vector<24x32xbf16>, vector<24x32xbf16>, vector<24x24xf32> -> vector<24x24xf32>
    %12 = tpu.iota {dimensions = array<i32: 1>} : vector<1x24xi32>
    %c17_i32 = arith.constant 17 : i32
    %13 = vector.broadcast %c17_i32 : i32 to vector<1x24xi32>
    %14 = arith.cmpi slt, %12, %13 : vector<1x24xi32>
    %cst_9 = arith.constant -1.000000e+30 : f32
    %15 = vector.shape_cast %14 : vector<1x24xi1> to vector<1x24xi1>
    %16 = vector.broadcast %15 : vector<1x24xi1> to vector<24x24xi1>
    %17 = vector.broadcast %cst_9 : f32 to vector<24x24xf32>
    %18 = arith.select %16, %11, %17 : vector<24x24xi1>, vector<24x24xf32>
    %cst_10 = arith.constant dense<0xFF800000> : vector<24xf32>
    %19 = vector.multi_reduction <maximumf>, %18, %cst_10 [1] : vector<24x24xf32> to vector<24xf32>
    %20 = vector.shape_cast %19 : vector<24xf32> to vector<24x1xf32>
    %21 = vector.broadcast %20 : vector<24x1xf32> to vector<24x24xf32>
    %22 = arith.subf %18, %21 : vector<24x24xf32>
    %23 = math.exp %22 : vector<24x24xf32>
    %cst_11 = arith.constant dense<0.000000e+00> : vector<24xf32>
    %24 = vector.multi_reduction <add>, %23, %cst_11 [1] : vector<24x24xf32> to vector<24xf32>
    %25 = vector.shape_cast %24 : vector<24xf32> to vector<24x1xf32>
    %26 = tpu.reciprocal %25 {approx = true} : vector<24x1xf32> -> vector<24x1xf32>
    %27 = vector.broadcast %26 : vector<24x1xf32> to vector<24x24xf32>
    %28 = arith.mulf %23, %27 : vector<24x24xf32>
    %29 = arith.truncf %28 : vector<24x24xf32> to vector<24x24xbf16>
    %cst_12 = arith.constant dense<0.000000e+00> : vector<24x32xf32>
    %30 = tpu.matmul %29, %10, %cst_12 {dimension_numbers = #tpu.dot_dimension_numbers<[1], [0], [0], [1], [0, 0, 1, 1], [], []>} : vector<24x24xbf16>, vector<24x32xbf16>, vector<24x32xf32> -> vector<24x32xf32>
    %31 = vector.extract_strided_slice %1 {offsets = [0, 32], sizes = [24, 32], strides = [1, 1]} : vector<24x128xbf16> to vector<24x32xbf16>
    %cst_13 = arith.constant 1.767580e-01 : bf16
    %32 = vector.broadcast %cst_13 : bf16 to vector<24x32xbf16>
    %33 = arith.mulf %31, %32 : vector<24x32xbf16>
    %34 = vector.extract_strided_slice %3 {offsets = [0, 32], sizes = [24, 32], strides = [1, 1]} : vector<24x128xbf16> to vector<24x32xbf16>
    %35 = vector.extract_strided_slice %5 {offsets = [0, 32], sizes = [24, 32], strides = [1, 1]} : vector<24x128xbf16> to vector<24x32xbf16>
    %cst_14 = arith.constant dense<0.000000e+00> : vector<24x24xf32>
    %36 = tpu.matmul %33, %34, %cst_14 {dimension_numbers = #tpu.dot_dimension_numbers<[1], [1], [0], [0], [0, 0, 1, 0], [], []>} : vector<24x32xbf16>, vector<24x32xbf16>, vector<24x24xf32> -> vector<24x24xf32>
    %37 = tpu.iota {dimensions = array<i32: 1>} : vector<1x24xi32>
    %c17_i32_15 = arith.constant 17 : i32
    %38 = vector.broadcast %c17_i32_15 : i32 to vector<1x24xi32>
    %39 = arith.cmpi slt, %37, %38 : vector<1x24xi32>
    %cst_16 = arith.constant -1.000000e+30 : f32
    %40 = vector.shape_cast %39 : vector<1x24xi1> to vector<1x24xi1>
    %41 = vector.broadcast %40 : vector<1x24xi1> to vector<24x24xi1>
    %42 = vector.broadcast %cst_16 : f32 to vector<24x24xf32>
    %43 = arith.select %41, %36, %42 : vector<24x24xi1>, vector<24x24xf32>
    %cst_17 = arith.constant dense<0xFF800000> : vector<24xf32>
    %44 = vector.multi_reduction <maximumf>, %43, %cst_17 [1] : vector<24x24xf32> to vector<24xf32>
    %45 = vector.shape_cast %44 : vector<24xf32> to vector<24x1xf32>
    %46 = vector.broadcast %45 : vector<24x1xf32> to vector<24x24xf32>
    %47 = arith.subf %43, %46 : vector<24x24xf32>
    %48 = math.exp %47 : vector<24x24xf32>
    %cst_18 = arith.constant dense<0.000000e+00> : vector<24xf32>
    %49 = vector.multi_reduction <add>, %48, %cst_18 [1] : vector<24x24xf32> to vector<24xf32>
    %50 = vector.shape_cast %49 : vector<24xf32> to vector<24x1xf32>
    %51 = tpu.reciprocal %50 {approx = true} : vector<24x1xf32> -> vector<24x1xf32>
    %52 = vector.broadcast %51 : vector<24x1xf32> to vector<24x24xf32>
    %53 = arith.mulf %48, %52 : vector<24x24xf32>
    %54 = arith.truncf %53 : vector<24x24xf32> to vector<24x24xbf16>
    %cst_19 = arith.constant dense<0.000000e+00> : vector<24x32xf32>
    %55 = tpu.matmul %54, %35, %cst_19 {dimension_numbers = #tpu.dot_dimension_numbers<[1], [0], [0], [1], [0, 0, 1, 1], [], []>} : vector<24x24xbf16>, vector<24x32xbf16>, vector<24x32xf32> -> vector<24x32xf32>
    %56 = vector.extract_strided_slice %1 {offsets = [0, 64], sizes = [24, 32], strides = [1, 1]} : vector<24x128xbf16> to vector<24x32xbf16>
    %cst_20 = arith.constant 1.767580e-01 : bf16
    %57 = vector.broadcast %cst_20 : bf16 to vector<24x32xbf16>
    %58 = arith.mulf %56, %57 : vector<24x32xbf16>
    %59 = vector.extract_strided_slice %3 {offsets = [0, 64], sizes = [24, 32], strides = [1, 1]} : vector<24x128xbf16> to vector<24x32xbf16>
    %60 = vector.extract_strided_slice %5 {offsets = [0, 64], sizes = [24, 32], strides = [1, 1]} : vector<24x128xbf16> to vector<24x32xbf16>
    %cst_21 = arith.constant dense<0.000000e+00> : vector<24x24xf32>
    %61 = tpu.matmul %58, %59, %cst_21 {dimension_numbers = #tpu.dot_dimension_numbers<[1], [1], [0], [0], [0, 0, 1, 0], [], []>} : vector<24x32xbf16>, vector<24x32xbf16>, vector<24x24xf32> -> vector<24x24xf32>
    %62 = tpu.iota {dimensions = array<i32: 1>} : vector<1x24xi32>
    %c17_i32_22 = arith.constant 17 : i32
    %63 = vector.broadcast %c17_i32_22 : i32 to vector<1x24xi32>
    %64 = arith.cmpi slt, %62, %63 : vector<1x24xi32>
    %cst_23 = arith.constant -1.000000e+30 : f32
    %65 = vector.shape_cast %64 : vector<1x24xi1> to vector<1x24xi1>
    %66 = vector.broadcast %65 : vector<1x24xi1> to vector<24x24xi1>
    %67 = vector.broadcast %cst_23 : f32 to vector<24x24xf32>
    %68 = arith.select %66, %61, %67 : vector<24x24xi1>, vector<24x24xf32>
    %cst_24 = arith.constant dense<0xFF800000> : vector<24xf32>
    %69 = vector.multi_reduction <maximumf>, %68, %cst_24 [1] : vector<24x24xf32> to vector<24xf32>
    %70 = vector.shape_cast %69 : vector<24xf32> to vector<24x1xf32>
    %71 = vector.broadcast %70 : vector<24x1xf32> to vector<24x24xf32>
    %72 = arith.subf %68, %71 : vector<24x24xf32>
    %73 = math.exp %72 : vector<24x24xf32>
    %cst_25 = arith.constant dense<0.000000e+00> : vector<24xf32>
    %74 = vector.multi_reduction <add>, %73, %cst_25 [1] : vector<24x24xf32> to vector<24xf32>
    %75 = vector.shape_cast %74 : vector<24xf32> to vector<24x1xf32>
    %76 = tpu.reciprocal %75 {approx = true} : vector<24x1xf32> -> vector<24x1xf32>
    %77 = vector.broadcast %76 : vector<24x1xf32> to vector<24x24xf32>
    %78 = arith.mulf %73, %77 : vector<24x24xf32>
    %79 = arith.truncf %78 : vector<24x24xf32> to vector<24x24xbf16>
    %cst_26 = arith.constant dense<0.000000e+00> : vector<24x32xf32>
    %80 = tpu.matmul %79, %60, %cst_26 {dimension_numbers = #tpu.dot_dimension_numbers<[1], [0], [0], [1], [0, 0, 1, 1], [], []>} : vector<24x24xbf16>, vector<24x32xbf16>, vector<24x32xf32> -> vector<24x32xf32>
    %81 = vector.extract_strided_slice %1 {offsets = [0, 96], sizes = [24, 32], strides = [1, 1]} : vector<24x128xbf16> to vector<24x32xbf16>
    %cst_27 = arith.constant 1.767580e-01 : bf16
    %82 = vector.broadcast %cst_27 : bf16 to vector<24x32xbf16>
    %83 = arith.mulf %81, %82 : vector<24x32xbf16>
    %84 = vector.extract_strided_slice %3 {offsets = [0, 96], sizes = [24, 32], strides = [1, 1]} : vector<24x128xbf16> to vector<24x32xbf16>
    %85 = vector.extract_strided_slice %5 {offsets = [0, 96], sizes = [24, 32], strides = [1, 1]} : vector<24x128xbf16> to vector<24x32xbf16>
    %cst_28 = arith.constant dense<0.000000e+00> : vector<24x24xf32>
    %86 = tpu.matmul %83, %84, %cst_28 {dimension_numbers = #tpu.dot_dimension_numbers<[1], [1], [0], [0], [0, 0, 1, 0], [], []>} : vector<24x32xbf16>, vector<24x32xbf16>, vector<24x24xf32> -> vector<24x24xf32>
    %87 = tpu.iota {dimensions = array<i32: 1>} : vector<1x24xi32>
    %c17_i32_29 = arith.constant 17 : i32
    %88 = vector.broadcast %c17_i32_29 : i32 to vector<1x24xi32>
    %89 = arith.cmpi slt, %87, %88 : vector<1x24xi32>
    %cst_30 = arith.constant -1.000000e+30 : f32
    %90 = vector.shape_cast %89 : vector<1x24xi1> to vector<1x24xi1>
    %91 = vector.broadcast %90 : vector<1x24xi1> to vector<24x24xi1>
    %92 = vector.broadcast %cst_30 : f32 to vector<24x24xf32>
    %93 = arith.select %91, %86, %92 : vector<24x24xi1>, vector<24x24xf32>
    %cst_31 = arith.constant dense<0xFF800000> : vector<24xf32>
    %94 = vector.multi_reduction <maximumf>, %93, %cst_31 [1] : vector<24x24xf32> to vector<24xf32>
    %95 = vector.shape_cast %94 : vector<24xf32> to vector<24x1xf32>
    %96 = vector.broadcast %95 : vector<24x1xf32> to vector<24x24xf32>
    %97 = arith.subf %93, %96 : vector<24x24xf32>
    %98 = math.exp %97 : vector<24x24xf32>
    %cst_32 = arith.constant dense<0.000000e+00> : vector<24xf32>
    %99 = vector.multi_reduction <add>, %98, %cst_32 [1] : vector<24x24xf32> to vector<24xf32>
    %100 = vector.shape_cast %99 : vector<24xf32> to vector<24x1xf32>
    %101 = tpu.reciprocal %100 {approx = true} : vector<24x1xf32> -> vector<24x1xf32>
    %102 = vector.broadcast %101 : vector<24x1xf32> to vector<24x24xf32>
    %103 = arith.mulf %98, %102 : vector<24x24xf32>
    %104 = arith.truncf %103 : vector<24x24xf32> to vector<24x24xbf16>
    %cst_33 = arith.constant dense<0.000000e+00> : vector<24x32xf32>
    %105 = tpu.matmul %104, %85, %cst_33 {dimension_numbers = #tpu.dot_dimension_numbers<[1], [0], [0], [1], [0, 0, 1, 1], [], []>} : vector<24x24xbf16>, vector<24x32xbf16>, vector<24x32xf32> -> vector<24x32xf32>
    %106 = tpu.concatenate %30, %55, %80, %105 in 1 : vector<24x32xf32>, vector<24x32xf32>, vector<24x32xf32>, vector<24x32xf32> -> vector<24x128xf32>
    %107 = vector.shape_cast %106 : vector<24x128xf32> to vector<1x24x128xf32>
    %108 = arith.truncf %107 : vector<1x24x128xf32> to vector<1x24x128xbf16>
    %c0_34 = arith.constant 0 : index
    %c0_35 = arith.constant 0 : index
    %c0_36 = arith.constant 0 : index
    %109 = vector.load %arg5[%c0_34, %c0_35, %c0_36] : memref<1x24x128xbf16, #tpu.memory_space<vmem>>, vector<1x24x128xbf16>
    tpu.vector_store %arg5[%c0_34, %c0_35, %c0_36], %108 {strides = array<i32>} : memref<1x24x128xbf16, #tpu.memory_space<vmem>>, vector<1x24x128xbf16>,
    return
  }
  func.func @transform_0(%arg0: i32, %arg1: i32) -> (i32, i32, i32) {
    %c0_i32 = arith.constant 0 : i32
    %c0_i32_0 = arith.constant 0 : i32
    return %arg0, %c0_i32, %arg1 : i32, i32, i32
  }
  func.func @transform_1(%arg0: i32, %arg1: i32) -> (i32, i32, i32) {
    %c1_i32 = arith.constant 1 : i32
    %0 = arith.addi %c1_i32, %arg1 : i32
    %c0_i32 = arith.constant 0 : i32
    %c0_i32_0 = arith.constant 0 : i32
    return %arg0, %c0_i32, %0 : i32, i32, i32
  }
  func.func @transform_2(%arg0: i32, %arg1: i32) -> (i32, i32, i32) {
    %c2_i32 = arith.constant 2 : i32
    %0 = arith.addi %c2_i32, %arg1 : i32
    %c0_i32 = arith.constant 0 : i32
    %c0_i32_0 = arith.constant 0 : i32
    return %arg0, %c0_i32, %0 : i32, i32, i32
  }
  func.func @transform_3(%arg0: i32, %arg1: i32) -> (i32, i32, i32) {
    %c0_i32 = arith.constant 0 : i32
    %c0_i32_0 = arith.constant 0 : i32
    return %arg0, %c0_i32, %arg1 : i32, i32, i32
  }
}

module attributes {stable_mosaic.version = 11 : i64} {
  func.func @_mm_kernel(%arg0: i32, %arg1: i32, %arg2: i32, %arg3: memref<48x128xbf16, #tpu.memory_space<vmem>>, %arg4: memref<128x128xbf16, #tpu.memory_space<vmem>>, %arg5: memref<1x128xf32, #tpu.memory_space<vmem>>, %arg6: memref<48x128xf32, #tpu.memory_space<vmem>>, %arg7: memref<48x128xf32, #tpu.memory_space<vmem>>) attributes {dimension_semantics = [#tpu.dimension_semantics<parallel>, #tpu.dimension_semantics<parallel>, #tpu.dimension_semantics<arbitrary>], iteration_bounds = array<i64: 1, 1, 1>, scalar_prefetch = 0 : i64, scratch_operands = 0 : i64, tpu.core_type = #tpu.core_type<tc>, window_params = [{transform_indices = @transform_0, window_bounds = array<i64: 48, 128>}, {transform_indices = @transform_1, window_bounds = array<i64: 128, 128>}, {transform_indices = @transform_2, window_bounds = array<i64: 1, 128>}, {transform_indices = @transform_3, window_bounds = array<i64: 48, 128>}, {transform_indices = @transform_4, window_bounds = array<i64: 48, 128>}]} {
    %c0 = arith.constant 0 : index
    %c0_0 = arith.constant 0 : index
    %0 = vector.load %arg3[%c0, %c0_0] : memref<48x128xbf16, #tpu.memory_space<vmem>>, vector<48x128xbf16>
    %c0_1 = arith.constant 0 : index
    %c0_2 = arith.constant 0 : index
    %1 = vector.load %arg4[%c0_1, %c0_2] : memref<128x128xbf16, #tpu.memory_space<vmem>>, vector<128x128xbf16>
    %cst = arith.constant dense<0.000000e+00> : vector<48x128xf32>
    %2 = tpu.matmul %0, %1, %cst {dimension_numbers = #tpu.dot_dimension_numbers<[1], [0], [0], [1], [0, 0, 1, 1], [], []>} : vector<48x128xbf16>, vector<128x128xbf16>, vector<48x128xf32> -> vector<48x128xf32>
    %c0_3 = arith.constant 0 : index
    %c0_4 = arith.constant 0 : index
    %3 = vector.load %arg5[%c0_3, %c0_4] : memref<1x128xf32, #tpu.memory_space<vmem>>, vector<1x128xf32>
    %4 = vector.broadcast %3 : vector<1x128xf32> to vector<48x128xf32>
    %5 = arith.addf %2, %4 : vector<48x128xf32>
    %c0_5 = arith.constant 0 : index
    %c0_6 = arith.constant 0 : index
    %6 = vector.load %arg6[%c0_5, %c0_6] : memref<48x128xf32, #tpu.memory_space<vmem>>, vector<48x128xf32>
    %7 = arith.addf %5, %6 : vector<48x128xf32>
    %c0_7 = arith.constant 0 : index
    %c0_8 = arith.constant 0 : index
    %8 = vector.load %arg7[%c0_7, %c0_8] : memref<48x128xf32, #tpu.memory_space<vmem>>, vector<48x128xf32>
    tpu.vector_store %arg7[%c0_7, %c0_8], %7 {strides = array<i32>} : memref<48x128xf32, #tpu.memory_space<vmem>>, vector<48x128xf32>,
    return
  }
  func.func @transform_0(%arg0: i32, %arg1: i32, %arg2: i32) -> (i32, i32) {
    %c0_i32 = arith.constant 0 : i32
    return %arg0, %arg2 : i32, i32
  }
  func.func @transform_1(%arg0: i32, %arg1: i32, %arg2: i32) -> (i32, i32) {
    %c0_i32 = arith.constant 0 : i32
    return %arg2, %arg1 : i32, i32
  }
  func.func @transform_2(%arg0: i32, %arg1: i32, %arg2: i32) -> (i32, i32) {
    %c0_i32 = arith.constant 0 : i32
    %c0_i32_0 = arith.constant 0 : i32
    return %c0_i32, %arg1 : i32, i32
  }
  func.func @transform_3(%arg0: i32, %arg1: i32, %arg2: i32) -> (i32, i32) {
    %c0_i32 = arith.constant 0 : i32
    return %arg0, %arg1 : i32, i32
  }
  func.func @transform_4(%arg0: i32, %arg1: i32, %arg2: i32) -> (i32, i32) {
    %c0_i32 = arith.constant 0 : i32
    return %arg0, %arg1 : i32, i32
  }
}

module attributes {stable_mosaic.version = 11 : i64} {
  func.func @_mm_kernel(%arg0: i32, %arg1: i32, %arg2: i32, %arg3: memref<48x512xbf16, #tpu.memory_space<vmem>>, %arg4: memref<512x128xbf16, #tpu.memory_space<vmem>>, %arg5: memref<1x128xf32, #tpu.memory_space<vmem>>, %arg6: memref<48x128xf32, #tpu.memory_space<vmem>>, %arg7: memref<48x128xf32, #tpu.memory_space<vmem>>) attributes {dimension_semantics = [#tpu.dimension_semantics<parallel>, #tpu.dimension_semantics<parallel>, #tpu.dimension_semantics<arbitrary>], iteration_bounds = array<i64: 1, 1, 1>, scalar_prefetch = 0 : i64, scratch_operands = 0 : i64, tpu.core_type = #tpu.core_type<tc>, window_params = [{transform_indices = @transform_0, window_bounds = array<i64: 48, 512>}, {transform_indices = @transform_1, window_bounds = array<i64: 512, 128>}, {transform_indices = @transform_2, window_bounds = array<i64: 1, 128>}, {transform_indices = @transform_3, window_bounds = array<i64: 48, 128>}, {transform_indices = @transform_4, window_bounds = array<i64: 48, 128>}]} {
    %c0 = arith.constant 0 : index
    %c0_0 = arith.constant 0 : index
    %0 = vector.load %arg3[%c0, %c0_0] : memref<48x512xbf16, #tpu.memory_space<vmem>>, vector<48x512xbf16>
    %c0_1 = arith.constant 0 : index
    %c0_2 = arith.constant 0 : index
    %1 = vector.load %arg4[%c0_1, %c0_2] : memref<512x128xbf16, #tpu.memory_space<vmem>>, vector<512x128xbf16>
    %cst = arith.constant dense<0.000000e+00> : vector<48x128xf32>
    %2 = tpu.matmul %0, %1, %cst {dimension_numbers = #tpu.dot_dimension_numbers<[1], [0], [0], [1], [0, 0, 1, 1], [], []>} : vector<48x512xbf16>, vector<512x128xbf16>, vector<48x128xf32> -> vector<48x128xf32>
    %c0_3 = arith.constant 0 : index
    %c0_4 = arith.constant 0 : index
    %3 = vector.load %arg5[%c0_3, %c0_4] : memref<1x128xf32, #tpu.memory_space<vmem>>, vector<1x128xf32>
    %4 = vector.broadcast %3 : vector<1x128xf32> to vector<48x128xf32>
    %5 = arith.addf %2, %4 : vector<48x128xf32>
    %c0_5 = arith.constant 0 : index
    %c0_6 = arith.constant 0 : index
    %6 = vector.load %arg6[%c0_5, %c0_6] : memref<48x128xf32, #tpu.memory_space<vmem>>, vector<48x128xf32>
    %7 = arith.addf %5, %6 : vector<48x128xf32>
    %c0_7 = arith.constant 0 : index
    %c0_8 = arith.constant 0 : index
    %8 = vector.load %arg7[%c0_7, %c0_8] : memref<48x128xf32, #tpu.memory_space<vmem>>, vector<48x128xf32>
    tpu.vector_store %arg7[%c0_7, %c0_8], %7 {strides = array<i32>} : memref<48x128xf32, #tpu.memory_space<vmem>>, vector<48x128xf32>,
    return
  }
  func.func @transform_0(%arg0: i32, %arg1: i32, %arg2: i32) -> (i32, i32) {
    %c0_i32 = arith.constant 0 : i32
    return %arg0, %arg2 : i32, i32
  }
  func.func @transform_1(%arg0: i32, %arg1: i32, %arg2: i32) -> (i32, i32) {
    %c0_i32 = arith.constant 0 : i32
    return %arg2, %arg1 : i32, i32
  }
  func.func @transform_2(%arg0: i32, %arg1: i32, %arg2: i32) -> (i32, i32) {
    %c0_i32 = arith.constant 0 : i32
    %c0_i32_0 = arith.constant 0 : i32
    return %c0_i32, %arg1 : i32, i32
  }
  func.func @transform_3(%arg0: i32, %arg1: i32, %arg2: i32) -> (i32, i32) {
    %c0_i32 = arith.constant 0 : i32
    return %arg0, %arg1 : i32, i32
  }
  func.func @transform_4(%arg0: i32, %arg1: i32, %arg2: i32) -> (i32, i32) {
    %c0_i32 = arith.constant 0 : i32
    return %arg0, %arg1 : i32, i32
  }
}

module attributes {stable_mosaic.version = 11 : i64} {
  func.func @_ln_mm_kernel(%arg0: i32, %arg1: i32, %arg2: memref<48x128xf32, #tpu.memory_space<vmem>>, %arg3: memref<1x128xf32, #tpu.memory_space<vmem>>, %arg4: memref<1x128xf32, #tpu.memory_space<vmem>>, %arg5: memref<128x256xbf16, #tpu.memory_space<vmem>>, %arg6: memref<1x256xf32, #tpu.memory_space<vmem>>, %arg7: memref<48x256xbf16, #tpu.memory_space<vmem>>, %arg8: memref<48x128xbf16, #tpu.memory_space<vmem>>) attributes {dimension_semantics = [#tpu.dimension_semantics<parallel>, #tpu.dimension_semantics<arbitrary>], iteration_bounds = array<i64: 1, 2>, scalar_prefetch = 0 : i64, scratch_operands = 1 : i64, tpu.core_type = #tpu.core_type<tc>, window_params = [{transform_indices = @transform_0, window_bounds = array<i64: 48, 128>}, {pipeline_mode = #tpu.pipeline_mode<synchronous>, transform_indices = @transform_1, window_bounds = array<i64: 1, 128>}, {pipeline_mode = #tpu.pipeline_mode<synchronous>, transform_indices = @transform_2, window_bounds = array<i64: 1, 128>}, {transform_indices = @transform_3, window_bounds = array<i64: 128, 256>}, {transform_indices = @transform_4, window_bounds = array<i64: 1, 256>}, {transform_indices = @transform_5, window_bounds = array<i64: 48, 256>}]} {
    %c0_i32 = arith.constant 0 : i32
    %0 = arith.cmpi eq, %arg1, %c0_i32 : i32
    %1 = arith.extui %0 : i1 to i32
    %c0_i32_0 = arith.constant 0 : i32
    %2 = arith.cmpi ne, %1, %c0_i32_0 : i32
    scf.if %2 {
      %c0_10 = arith.constant 0 : index
      %c0_11 = arith.constant 0 : index
      %19 = vector.load %arg2[%c0_10, %c0_11] : memref<48x128xf32, #tpu.memory_space<vmem>>, vector<48x128xf32>
      %cst_12 = arith.constant dense<0.000000e+00> : vector<48xf32>
      %20 = vector.multi_reduction <add>, %19, %cst_12 [1] : vector<48x128xf32> to vector<48xf32>
      %21 = vector.shape_cast %20 : vector<48xf32> to vector<48x1xf32>
      %cst_13 = arith.constant 1.280000e+02 : f32
      %22 = vector.broadcast %cst_13 : f32 to vector<48x1xf32>
      %23 = arith.divf %21, %22 : vector<48x1xf32>
      %24 = vector.broadcast %23 : vector<48x1xf32> to vector<48x128xf32>
      %25 = arith.subf %19, %24 : vector<48x128xf32>
      %26 = arith.mulf %25, %25 : vector<48x128xf32>
      %cst_14 = arith.constant dense<0.000000e+00> : vector<48xf32>
      %27 = vector.multi_reduction <add>, %26, %cst_14 [1] : vector<48x128xf32> to vector<48xf32>
      %28 = vector.shape_cast %27 : vector<48xf32> to vector<48x1xf32>
      %cst_15 = arith.constant 1.280000e+02 : f32
      %29 = vector.broadcast %cst_15 : f32 to vector<48x1xf32>
      %30 = arith.divf %28, %29 : vector<48x1xf32>
      %cst_16 = arith.constant 9.99999974E-6 : f32
      %31 = vector.broadcast %cst_16 : f32 to vector<48x1xf32>
      %32 = arith.addf %30, %31 : vector<48x1xf32>
      %33 = math.rsqrt %32 : vector<48x1xf32>
      %34 = vector.broadcast %33 : vector<48x1xf32> to vector<48x128xf32>
      %35 = arith.mulf %25, %34 : vector<48x128xf32>
      %c0_17 = arith.constant 0 : index
      %c0_18 = arith.constant 0 : index
      %36 = vector.load %arg3[%c0_17, %c0_18] : memref<1x128xf32, #tpu.memory_space<vmem>>, vector<1x128xf32>
      %37 = vector.broadcast %36 : vector<1x128xf32> to vector<48x128xf32>
      %38 = arith.mulf %35, %37 : vector<48x128xf32>
      %c0_19 = arith.constant 0 : index
      %c0_20 = arith.constant 0 : index
      %39 = vector.load %arg4[%c0_19, %c0_20] : memref<1x128xf32, #tpu.memory_space<vmem>>, vector<1x128xf32>
      %40 = vector.broadcast %39 : vector<1x128xf32> to vector<48x128xf32>
      %41 = arith.addf %38, %40 : vector<48x128xf32>
      %42 = arith.truncf %41 : vector<48x128xf32> to vector<48x128xbf16>
      %c0_21 = arith.constant 0 : index
      %c0_22 = arith.constant 0 : index
      %43 = vector.load %arg8[%c0_21, %c0_22] : memref<48x128xbf16, #tpu.memory_space<vmem>>, vector<48x128xbf16>
      tpu.vector_store %arg8[%c0_21, %c0_22], %42 {strides = array<i32>} : memref<48x128xbf16, #tpu.memory_space<vmem>>, vector<48x128xbf16>,
    } else {
    }
    %c0 = arith.constant 0 : index
    %c0_1 = arith.constant 0 : index
    %3 = vector.load %arg8[%c0, %c0_1] : memref<48x128xbf16, #tpu.memory_space<vmem>>, vector<48x128xbf16>
    %c0_2 = arith.constant 0 : index
    %c0_3 = arith.constant 0 : index
    %4 = vector.load %arg5[%c0_2, %c0_3] : memref<128x256xbf16, #tpu.memory_space<vmem>>, vector<128x256xbf16>
    %cst = arith.constant dense<0.000000e+00> : vector<48x256xf32>
    %5 = tpu.matmul %3, %4, %cst {dimension_numbers = #tpu.dot_dimension_numbers<[1], [0], [0], [1], [0, 0, 1, 1], [], []>} : vector<48x128xbf16>, vector<128x256xbf16>, vector<48x256xf32> -> vector<48x256xf32>
    %c0_4 = arith.constant 0 : index
    %c0_5 = arith.constant 0 : index
    %6 = vector.load %arg6[%c0_4, %c0_5] : memref<1x256xf32, #tpu.memory_space<vmem>>, vector<1x256xf32>
    %7 = vector.broadcast %6 : vector<1x256xf32> to vector<48x256xf32>
    %8 = arith.addf %5, %7 : vector<48x256xf32>
    %cst_6 = arith.constant 1.702000e+00 : f32
    %9 = vector.broadcast %cst_6 : f32 to vector<48x256xf32>
    %10 = arith.mulf %9, %8 : vector<48x256xf32>
    %11 = arith.negf %10 : vector<48x256xf32>
    %12 = math.exp %11 : vector<48x256xf32>
    %cst_7 = arith.constant 1.000000e+00 : f32
    %13 = vector.broadcast %cst_7 : f32 to vector<48x256xf32>
    %14 = arith.addf %13, %12 : vector<48x256xf32>
    %15 = arith.divf %13, %14 : vector<48x256xf32>
    %16 = arith.mulf %8, %15 : vector<48x256xf32>
    %17 = arith.truncf %16 : vector<48x256xf32> to vector<48x256xbf16>
    %c0_8 = arith.constant 0 : index
    %c0_9 = arith.constant 0 : index
    %18 = vector.load %arg7[%c0_8, %c0_9] : memref<48x256xbf16, #tpu.memory_space<vmem>>, vector<48x256xbf16>
    tpu.vector_store %arg7[%c0_8, %c0_9], %17 {strides = array<i32>} : memref<48x256xbf16, #tpu.memory_space<vmem>>, vector<48x256xbf16>,
    return
  }
  func.func @transform_0(%arg0: i32, %arg1: i32) -> (i32, i32) {
    %c0_i32 = arith.constant 0 : i32
    %c0_i32_0 = arith.constant 0 : i32
    return %arg0, %c0_i32 : i32, i32
  }
  func.func @transform_1(%arg0: i32, %arg1: i32) -> (i32, i32) {
    %c0_i32 = arith.constant 0 : i32
    %c0_i32_0 = arith.constant 0 : i32
    %c0_i32_1 = arith.constant 0 : i32
    return %c0_i32, %c0_i32_0 : i32, i32
  }
  func.func @transform_2(%arg0: i32, %arg1: i32) -> (i32, i32) {
    %c0_i32 = arith.constant 0 : i32
    %c0_i32_0 = arith.constant 0 : i32
    %c0_i32_1 = arith.constant 0 : i32
    return %c0_i32, %c0_i32_0 : i32, i32
  }
  func.func @transform_3(%arg0: i32, %arg1: i32) -> (i32, i32) {
    %c0_i32 = arith.constant 0 : i32
    %c0_i32_0 = arith.constant 0 : i32
    return %c0_i32, %arg1 : i32, i32
  }
  func.func @transform_4(%arg0: i32, %arg1: i32) -> (i32, i32) {
    %c0_i32 = arith.constant 0 : i32
    %c0_i32_0 = arith.constant 0 : i32
    return %c0_i32, %arg1 : i32, i32
  }
  func.func @transform_5(%arg0: i32, %arg1: i32) -> (i32, i32) {
    %c0_i32 = arith.constant 0 : i32
    return %arg0, %arg1 : i32, i32
  }
}

module attributes {stable_mosaic.version = 11 : i64} {
  func.func @_ln_mm_kernel(%arg0: i32, %arg1: i32, %arg2: memref<2x128xf32, #tpu.memory_space<vmem>>, %arg3: memref<1x128xf32, #tpu.memory_space<vmem>>, %arg4: memref<1x128xf32, #tpu.memory_space<vmem>>, %arg5: memref<128x64xbf16, #tpu.memory_space<vmem>>, %arg6: memref<2x64xf32, #tpu.memory_space<vmem>>, %arg7: memref<2x128xbf16, #tpu.memory_space<vmem>>) attributes {dimension_semantics = [#tpu.dimension_semantics<parallel>, #tpu.dimension_semantics<arbitrary>], iteration_bounds = array<i64: 1, 1>, scalar_prefetch = 0 : i64, scratch_operands = 1 : i64, tpu.core_type = #tpu.core_type<tc>, window_params = [{transform_indices = @transform_0, window_bounds = array<i64: 2, 128>}, {pipeline_mode = #tpu.pipeline_mode<synchronous>, transform_indices = @transform_1, window_bounds = array<i64: 1, 128>}, {pipeline_mode = #tpu.pipeline_mode<synchronous>, transform_indices = @transform_2, window_bounds = array<i64: 1, 128>}, {transform_indices = @transform_3, window_bounds = array<i64: 128, 64>}, {transform_indices = @transform_4, window_bounds = array<i64: 2, 64>}]} {
    %c0_i32 = arith.constant 0 : i32
    %0 = arith.cmpi eq, %arg1, %c0_i32 : i32
    %1 = arith.extui %0 : i1 to i32
    %c0_i32_0 = arith.constant 0 : i32
    %2 = arith.cmpi ne, %1, %c0_i32_0 : i32
    scf.if %2 {
      %c0_6 = arith.constant 0 : index
      %c0_7 = arith.constant 0 : index
      %7 = vector.load %arg2[%c0_6, %c0_7] : memref<2x128xf32, #tpu.memory_space<vmem>>, vector<2x128xf32>
      %cst_8 = arith.constant dense<0.000000e+00> : vector<2xf32>
      %8 = vector.multi_reduction <add>, %7, %cst_8 [1] : vector<2x128xf32> to vector<2xf32>
      %9 = vector.shape_cast %8 : vector<2xf32> to vector<2x1xf32>
      %cst_9 = arith.constant 1.280000e+02 : f32
      %10 = vector.broadcast %cst_9 : f32 to vector<2x1xf32>
      %11 = arith.divf %9, %10 : vector<2x1xf32>
      %12 = vector.broadcast %11 : vector<2x1xf32> to vector<2x128xf32>
      %13 = arith.subf %7, %12 : vector<2x128xf32>
      %14 = arith.mulf %13, %13 : vector<2x128xf32>
      %cst_10 = arith.constant dense<0.000000e+00> : vector<2xf32>
      %15 = vector.multi_reduction <add>, %14, %cst_10 [1] : vector<2x128xf32> to vector<2xf32>
      %16 = vector.shape_cast %15 : vector<2xf32> to vector<2x1xf32>
      %cst_11 = arith.constant 1.280000e+02 : f32
      %17 = vector.broadcast %cst_11 : f32 to vector<2x1xf32>
      %18 = arith.divf %16, %17 : vector<2x1xf32>
      %cst_12 = arith.constant 9.99999974E-6 : f32
      %19 = vector.broadcast %cst_12 : f32 to vector<2x1xf32>
      %20 = arith.addf %18, %19 : vector<2x1xf32>
      %21 = math.rsqrt %20 : vector<2x1xf32>
      %22 = vector.broadcast %21 : vector<2x1xf32> to vector<2x128xf32>
      %23 = arith.mulf %13, %22 : vector<2x128xf32>
      %c0_13 = arith.constant 0 : index
      %c0_14 = arith.constant 0 : index
      %24 = vector.load %arg3[%c0_13, %c0_14] : memref<1x128xf32, #tpu.memory_space<vmem>>, vector<1x128xf32>
      %25 = vector.broadcast %24 : vector<1x128xf32> to vector<2x128xf32>
      %26 = arith.mulf %23, %25 : vector<2x128xf32>
      %c0_15 = arith.constant 0 : index
      %c0_16 = arith.constant 0 : index
      %27 = vector.load %arg4[%c0_15, %c0_16] : memref<1x128xf32, #tpu.memory_space<vmem>>, vector<1x128xf32>
      %28 = vector.broadcast %27 : vector<1x128xf32> to vector<2x128xf32>
      %29 = arith.addf %26, %28 : vector<2x128xf32>
      %30 = arith.truncf %29 : vector<2x128xf32> to vector<2x128xbf16>
      %c0_17 = arith.constant 0 : index
      %c0_18 = arith.constant 0 : index
      %31 = vector.load %arg7[%c0_17, %c0_18] : memref<2x128xbf16, #tpu.memory_space<vmem>>, vector<2x128xbf16>
      tpu.vector_store %arg7[%c0_17, %c0_18], %30 {strides = array<i32>} : memref<2x128xbf16, #tpu.memory_space<vmem>>, vector<2x128xbf16>,
    } else {
    }
    %c0 = arith.constant 0 : index
    %c0_1 = arith.constant 0 : index
    %3 = vector.load %arg7[%c0, %c0_1] : memref<2x128xbf16, #tpu.memory_space<vmem>>, vector<2x128xbf16>
    %c0_2 = arith.constant 0 : index
    %c0_3 = arith.constant 0 : index
    %4 = vector.load %arg5[%c0_2, %c0_3] : memref<128x64xbf16, #tpu.memory_space<vmem>>, vector<128x64xbf16>
    %cst = arith.constant dense<0.000000e+00> : vector<2x64xf32>
    %5 = tpu.matmul %3, %4, %cst {dimension_numbers = #tpu.dot_dimension_numbers<[1], [0], [0], [1], [0, 0, 1, 1], [], []>} : vector<2x128xbf16>, vector<128x64xbf16>, vector<2x64xf32> -> vector<2x64xf32>
    %c0_4 = arith.constant 0 : index
    %c0_5 = arith.constant 0 : index
    %6 = vector.load %arg6[%c0_4, %c0_5] : memref<2x64xf32, #tpu.memory_space<vmem>>, vector<2x64xf32>
    tpu.vector_store %arg6[%c0_4, %c0_5], %5 {strides = array<i32>} : memref<2x64xf32, #tpu.memory_space<vmem>>, vector<2x64xf32>,
    return
  }
  func.func @transform_0(%arg0: i32, %arg1: i32) -> (i32, i32) {
    %c0_i32 = arith.constant 0 : i32
    %c0_i32_0 = arith.constant 0 : i32
    return %arg0, %c0_i32 : i32, i32
  }
  func.func @transform_1(%arg0: i32, %arg1: i32) -> (i32, i32) {
    %c0_i32 = arith.constant 0 : i32
    %c0_i32_0 = arith.constant 0 : i32
    %c0_i32_1 = arith.constant 0 : i32
    return %c0_i32, %c0_i32_0 : i32, i32
  }
  func.func @transform_2(%arg0: i32, %arg1: i32) -> (i32, i32) {
    %c0_i32 = arith.constant 0 : i32
    %c0_i32_0 = arith.constant 0 : i32
    %c0_i32_1 = arith.constant 0 : i32
    return %c0_i32, %c0_i32_0 : i32, i32
  }
  func.func @transform_3(%arg0: i32, %arg1: i32) -> (i32, i32) {
    %c0_i32 = arith.constant 0 : i32
    %c0_i32_0 = arith.constant 0 : i32
    return %c0_i32, %arg1 : i32, i32
  }
  func.func @transform_4(%arg0: i32, %arg1: i32) -> (i32, i32) {
    %c0_i32 = arith.constant 0 : i32
    return %arg0, %arg1 : i32, i32
  }
}

</mosaic_0001>

<bundles_post_ra>
// kernel: _lambda_.13
= control target key start
LH: loop header
LB: loop body
LE: loop exit
PB: predicated region body
PF: predicated region fallthrough
CT: control target
= control target key end

     0   :  { %vm58_vm0 = vcmask 523264   ;;  %s199_s1 = inlined_call_operand.vmem [shape: bf16[64,128], index: 1, kind: input, shape index: {}]   ;;  %s200_s0 = inlined_call_operand.vmem [shape: bf16[32,64], index: 0, kind: input, shape index: {}]   ;;  %s201_s2 = inlined_call_operand.vmem [shape: f32[32,128], index: 2, kind: output, shape index: {}]  }
   0x1   :  { %v148_v0 = vld [vmem:[%s199_s1 + $0x18] sm:$0xff]   ;;  %v149_v1 = vld [vmem:[%s199_s1 + $0x10] sm:$0xff]   ;;  %v150_v2 = vld [vmem:[%s199_s1 + $0x8] sm:$0xff]  }
   0x2   :  { %136 = vmatprep.subr.bf16.mxu0 %v148_v0  ;;  %v152_v3 = vld [vmem:[%s200_s0] sm:$0xff]   ;;  %v153_v5 = vld [vmem:[%s200_s0 + $0x8] sm:$0xff]  }
   0x3   :  { %137 = vmatpush3.bf16.msra.mxu0 %v148_v0  ;;  %144 = vmatprep.mubr.msk.bf16.mxu0 %vm58_vm0, %v152_v3  ;;  %v151_v4 = vld [vmem:[%s199_s1] sm:$0xff]  }
   0x4   :  { %138 = vmatprep.subr.bf16.mxu0 %v149_v1 }
   0x7   :  { %139 = vmatpush3.bf16.msra.mxu0 %v149_v1 }
   0x8   :  { %140 = vmatprep.subr.bf16.mxu0 %v150_v2 }
   0xb   :  { %141 = vmatpush3.bf16.msra.mxu0 %v150_v2 }
   0xc   :  { %142 = vmatprep.subr.bf16.mxu0 %v151_v4 }
   0xf   :  { %143 = vmatpush3.bf16.msra.mxu0 %v151_v4 }
  0x12   :  { %145 = vmatmul.mubr.msk.bf16.vlgmr.msra.gmra.mxu0 %vm58_vm0, %v153_v5 }
  0xd2   :  { %v146_v6 = vpop.f32.mrf.mxu0 }
  0xd3   :  { %116 = vst [vmem:[%s201_s2 + $0x10] sm:$0xff] %v146_v6 }
  0xd4   :  { %v99_v7 = vpop.f32.mrf.mxu0 }
  0xd5   :  { %114 = vst [vmem:[%s201_s2] sm:$0xff] %v99_v7 }
  0xd6   :  { %v147_v8 = vpop.f32.mrf.mxu0 }
  0xd7   :  { %117 = vst [vmem:[%s201_s2 + $0x18] sm:$0xff] %v147_v8 }
  0xd8   :  { %v102_v9 = vpop.f32.mrf.mxu0 }
  0xd9   :  { %115 = vst [vmem:[%s201_s2 + $0x8] sm:$0xff] %v102_v9 }

// kernel: _lambda_.14
= control target key start
LH: loop header
LB: loop body
LE: loop exit
PB: predicated region body
PF: predicated region fallthrough
CT: control target
= control target key end

     0   :  { %s378_s15 = smov 0   ;;  %s417_s0 = inlined_call_operand.vmem [shape: f32[2,24,128], index: 0, kind: input, shape index: {}]   ;;  %s418_s1 = inlined_call_operand.vmem [shape: f32[1,24,128], index: 1, kind: input, shape index: {}]   ;;  %s419_s2 = inlined_call_operand.vmem [shape: f32[1,1,128], index: 2, kind: input, shape index: {}]   ;;  %s420_s3 = inlined_call_operand.vmem [shape: f32[1,1,128], index: 3, kind: input, shape index: {}]   ;;  %s421_s4 = inlined_call_operand.vmem [shape: f32[2,24,128], index: 4, kind: output, shape index: {}]  }
   0x1 LB: > { %s319_s16 = sadd.s32 4294967295, %s351_s15   ;;  %p323_p0 = scmp.ge.s32.totalorder %s351_s15, 1  ;;  %s351_s15 = sphi %s378_s15, %s14_s15  }
   0x2   : > { %p162_p1 = scmp.lt.s32.totalorder %s351_s15, 3 }
   0x4   : > { %p163_p2 = pnand %p323_p0, %p162_p1 }
   0x5   : > { %p188_p3 = scmp.lt.s32.totalorder (!%p163_p2), %s319_s16, 1 }
   0x6   : > { %166 = sbr.rel (%p163_p2) target bundleno = 330 (0x14a), region = 36 }
   0xb   : > { %s423_s16 = smov (!%p188_p3, %s319_s16), 1  ;;  %v201_v0 = vld [vmem:[%s418_s1] sm:$0xff]  ;;  %v203_v1 = vld [vmem:[%s418_s1 + $0x10] sm:$0xff]  ;;  %v202_v2 = vld [vmem:[%s418_s1 + $0x8] sm:$0xff] }
   0xc   : > { %s330_s17 = smul.u32 24, %s423_s16  ;;  %v326_v31 = vld [vmem:[%s419_s2] ss:$0 sm:$0xff] }
   0xd   : > { %v327_v33 = vld [vmem:[%s420_s3] ss:$0 sm:$0xff] }
   0xe   : > { %s192_s24 = scalar_lea.vmem %s417_s0, %s330_s17  ;;  %s197_s7 = scalar_lea.vmem %s421_s4, %s330_s17 }
   0xf   : > { %v198_v3 = vld [vmem:[%s192_s24] sm:$0xff]  ;;  %v200_v4 = vld [vmem:[%s192_s24 + $0x10] sm:$0xff]  ;;  %v199_v5 = vld [vmem:[%s192_s24 + $0x8] sm:$0xff] }
  0x10   : > { %v204_v6 = vadd.f32 %v201_v0, %v198_v3  ;;  %v206_v7 = vadd.f32 %v203_v1, %v200_v4  ;;  %v205_v8 = vadd.f32 %v202_v2, %v199_v5 }
  0x12   : > { %207 = vadd.xlane.f32.xlu0 %v204_v6  ;;  %211 = vadd.xlane.f32.xlu1 %v206_v7 }
  0x16   : > { %209 = vadd.xlane.f32.xlu0 %v205_v8 }
  0x9b   : > { %v208_v9 = vpop.xlane.xlu0 %207  ;;  %v212_v10 = vpop.xlane.xlu1 %211 }
  0x9c   : > { %v214_v11 = vmul.f32 0.0078125, %v208_v9  ;;  %v216_v12 = vmul.f32 0.0078125, %v212_v10 }
  0x9e   : > { %v217_v13 = vsub.f32 %v204_v6, %v214_v11  ;;  %v219_v14 = vsub.f32 %v206_v7, %v216_v12 }
  0x9f   : > { %v210_v15 = vpop.xlane.xlu0 %209 }
  0xa0   : > { %v215_v16 = vmul.f32 0.0078125, %v210_v15  ;;  %v220_v17 = vmul.f32 %v217_v13, %v217_v13  ;;  %v222_v19 = vmul.f32 %v219_v14, %v219_v14 }
  0xa2   : > { %v218_v18 = vsub.f32 %v205_v8, %v215_v16  ;;  %223 = vadd.xlane.f32.xlu1 %v220_v17 }
  0xa4   : > { %v221_v20 = vmul.f32 %v218_v18, %v218_v18 }
  0xa6   : > { %227 = vadd.xlane.f32.xlu1 %v222_v19  ;;  %225 = vadd.xlane.f32.xlu0 %v221_v20 }
 0x12b   : > { %v224_v21 = vpop.xlane.xlu1 %223 }
 0x12c   : > { %v229_v22 = vmul.f32 0.0078125, %v224_v21 }
 0x12e   : > { %v232_v23 = vadd.f32 1e-05, %v229_v22 }
 0x12f   : > { %v228_v24 = vpop.xlane.xlu1 %227  ;;  %v226_v25 = vpop.xlane.xlu0 %225 }
 0x130   : > { %339 = vrsqrt.f32 %v232_v23  ;;  %v231_v26 = vmul.f32 0.0078125, %v228_v24  ;;  %v230_v27 = vmul.f32 0.0078125, %v226_v25 }
 0x132   : > { %v234_v28 = vadd.f32 1e-05, %v231_v26  ;;  %v233_v29 = vadd.f32 1e-05, %v230_v27 }
 0x134   : > { %341 = vrsqrt.f32 %v234_v28 }
 0x135   : > { %343 = vrsqrt.f32 %v233_v29 }
 0x13d   : > { %v340_v30 = vpop.eup %339 }
 0x13e   : > { %v238_v32 = vmul.f32 %v340_v30, %v217_v13 }
 0x140   : > { %v248_v34 = vmul.f32 %v326_v31, %v238_v32 }
 0x141   : > { %v342_v35 = vpop.eup %341 }
 0x142   : > { %v344_v36 = vpop.eup %343  ;;  %v258_v37 = vadd.f32 %v327_v33, %v248_v34  ;;  %v240_v38 = vmul.f32 %v342_v35, %v219_v14 }
 0x143   : > { %v239_v39 = vmul.f32 %v344_v36, %v218_v18 }
 0x144   : > { %261 = vst [vmem:[%s197_s7] sm:$0xff] %v258_v37  ;;  %v250_v40 = vmul.f32 %v326_v31, %v240_v38 }
 0x145   : > { %v249_v41 = vmul.f32 %v326_v31, %v239_v39 }
 0x146   : > { %v260_v42 = vadd.f32 %v327_v33, %v250_v40 }
 0x147   : > { %v259_v43 = vadd.f32 %v327_v33, %v249_v41 }
 0x148   : > { %263 = vst [vmem:[%s197_s7 + $0x10] sm:$0xff] %v260_v42 }
 0x149   : > { %262 = vst [vmem:[%s197_s7 + $0x8] sm:$0xff] %v259_v43 }
 0x14a PF: > { %s14_s15 = sadd.s32 1, %s351_s15  }
 0x14b   : > { %p11_p4 = scmp.ge.s32.totalorder %s14_s15, 4  }
 0x14d   :  { %13 = sbr.rel (!%p11_p4) target bundleno = 1 (0x1), region = 66 }

// kernel: _lambda_.15
= control target key start
LH: loop header
LB: loop body
LE: loop exit
PB: predicated region body
PF: predicated region fallthrough
CT: control target
= control target key end

     0   :  { %s1131_s18 = smov 0   ;;  %s1133_s19 = smov 0   ;;  %s1283_s0 = inlined_call_operand.vmem [shape: f32[48,128], index: 0, kind: input, shape index: {}]   ;;  %s1284_s1 = inlined_call_operand.vmem [shape: f32[1,128], index: 1, kind: input, shape index: {}]   ;;  %s1285_s2 = inlined_call_operand.vmem [shape: f32[1,128], index: 2, kind: input, shape index: {}]   ;;  %s1286_s3 = inlined_call_operand.vmem [shape: bf16[128,384], index: 3, kind: input, shape index: {}]   ;;  %s1287_s4 = inlined_call_operand.vmem [shape: f32[1,384], index: 4, kind: input, shape index: {}]   ;;  %s1288_s5 = inlined_call_operand.vmem [shape: bf16[48,384], index: 5, kind: output, shape index: {}]  }
   0x1   :  { %s1135_s20 = smov 0   ;;  %s1137_s21 = smov 0  }
   0x2   :  { %s1139_s22 = smov 0  }
   0x3 LB: > { %s24_s23 = sadd.s32 1, %s1093_s21  ;;  %s853_s24 = sadd.s32 4294967295, %s1097_s22   ;;  %s1097_s22 = sphi %s1139_s22, %s15_s22   ;;  %s1093_s21 = sphi %s1137_s21, %s1293_s21   ;;  %s1089_s20 = sphi %s1135_s20, %s1292_s20   ;;  %s1085_s19 = sphi %s1133_s19, %s1291_s19   ;;  %s1081_s18 = sphi %s1131_s18, %s1290_s18  }
   0x4   : > { %p25_p0 = scmp.ge.s32.totalorder %s24_s23, 3  ;;  %p109_p1 = scmp.ne.s32.totalorder %s1085_s19, %s1081_s18 }
   0x5   : > { %p110_p2 = scmp.eq.s32.totalorder %s1097_s22, 0  ;;  %p167_p4 = scmp.eq.s32.totalorder %s853_s24, 2 }
   0x6   : > { %s1295_s23 = smov (%p25_p0, %s24_s23), 0  ;;  %s102_s26 = sadd.s32 1, %s1085_s19 }
   0x7   : > { %p111_p3 = por %p110_p2, %p109_p1  ;;  %s99_s25 = ssub.s32 %s1093_s21, %s1295_s23 }
   0x8   : > { %p100_p5 = scmp.eq.s32.totalorder %s99_s25, 0  ;;  %p1166_p6 = por %p167_p4, %p109_p1 }
   0x9   : > { %p857_p7 = scmp.ge.s32.totalorder %s1097_s22, 3 }
   0xa   : > { %s1171_s28 = scalar_select %p100_p5, %s1085_s19, %s102_s26  }
   0xb   : > { %204 = sbr.rel (%p857_p7) target bundleno = 30 (0x1e), region = 28 }
  0x10   : > { %207 = sbr.rel (!%p111_p3) target bundleno = 30 (0x1e), region = 32  ;;  %s209_s29 = sand.u32 (%p111_p3), 1, %s1085_s19  }
  0x11   : > { %s859_s30 = sshll.u32 (%p111_p3), %s1093_s21, 2  ;;  %s858_s6 = sshll.u32 (%p111_p3), %s209_s29, 6 }
  0x12   : > { %s1179_s9 = scalar_lea.vmem (%p111_p3), %s1286_s3, %s859_s30  ;;  %s211_s10 = scalar_lea.vmem (%p111_p3), [#allocation3], %s858_s6 }
  0x13   : > { %v230_v0 = vld [vmem:[%s1179_s9] sm:$0xf] (%p111_p3)  ;;  %v232_v1 = vld [vmem:[%s1179_s9 + $0xc] sm:$0xf] (%p111_p3)  ;;  %v234_v2 = vld [vmem:[%s1179_s9 + $0x18] sm:$0xf] (%p111_p3) }
  0x14   : > { %231 = vst [vmem:[%s211_s10] sm:$0xf] (%p111_p3), %v230_v0  ;;  %233 = vst [vmem:[%s211_s10 + $0x4] sm:$0xf] (%p111_p3), %v232_v1  ;;  %v236_v3 = vld [vmem:[%s1179_s9 + $0x24] sm:$0xf] (%p111_p3) }
  0x15   : > { %v238_v4 = vld [vmem:[%s1179_s9 + $0x30] sm:$0xf]  ;;  %235 = vst [vmem:[%s211_s10 + $0x8] sm:$0xf] %v234_v2  ;;  %237 = vst [vmem:[%s211_s10 + $0xc] sm:$0xf] %v236_v3 }
  0x16   : > { %239 = vst [vmem:[%s211_s10 + $0x10] sm:$0xf] %v238_v4  ;;  %v240_v5 = vld [vmem:[%s1179_s9 + $0x3c] sm:$0xf]  ;;  %v242_v6 = vld [vmem:[%s1179_s9 + $0x48] sm:$0xf] }
  0x17   : > { %v244_v7 = vld [vmem:[%s1179_s9 + $0x54] sm:$0xf]  ;;  %241 = vst [vmem:[%s211_s10 + $0x14] sm:$0xf] %v240_v5  ;;  %243 = vst [vmem:[%s211_s10 + $0x18] sm:$0xf] %v242_v6 }
  0x18   : > { %245 = vst [vmem:[%s211_s10 + $0x1c] sm:$0xf] %v244_v7  ;;  %v246_v8 = vld [vmem:[%s1179_s9 + $0x60] sm:$0xf]  ;;  %v248_v9 = vld [vmem:[%s1179_s9 + $0x6c] sm:$0xf] }
  0x19   : > { %v250_v10 = vld [vmem:[%s1179_s9 + $0x78] sm:$0xf]  ;;  %247 = vst [vmem:[%s211_s10 + $0x20] sm:$0xf] %v246_v8  ;;  %249 = vst [vmem:[%s211_s10 + $0x24] sm:$0xf] %v248_v9 }
  0x1a   : > { %251 = vst [vmem:[%s211_s10 + $0x28] sm:$0xf] %v250_v10  ;;  %v252_v11 = vld [vmem:[%s1179_s9 + $0x84] sm:$0xf]  ;;  %v254_v12 = vld [vmem:[%s1179_s9 + $0x90] sm:$0xf] }
  0x1b   : > { %v256_v13 = vld [vmem:[%s1179_s9 + $0x9c] sm:$0xf]  ;;  %253 = vst [vmem:[%s211_s10 + $0x2c] sm:$0xf] %v252_v11  ;;  %255 = vst [vmem:[%s211_s10 + $0x30] sm:$0xf] %v254_v12 }
  0x1c   : > { %257 = vst [vmem:[%s211_s10 + $0x34] sm:$0xf] %v256_v13  ;;  %v258_v14 = vld [vmem:[%s1179_s9 + $0xa8] sm:$0xf]  ;;  %v260_v15 = vld [vmem:[%s1179_s9 + $0xb4] sm:$0xf] }
  0x1d   : > { %259 = vst [vmem:[%s211_s10 + $0x38] sm:$0xf] %v258_v14  ;;  %261 = vst [vmem:[%s211_s10 + $0x3c] sm:$0xf] %v260_v15 }
  0x1e PF: > { %p860_p8 = scmp.ge.s32.totalorder %s1097_s22, 1  ;;  %p322_p9 = scmp.lt.s32.totalorder %s1097_s22, 4 }
  0x20   : > { %p323_p10 = pnand %p860_p8, %p322_p9 }
  0x21   : > { %s329_s11 = sand.u32 (!%p323_p10), 1, %s1081_s18   ;;  %p369_p11 = scmp.lt.s32.totalorder (!%p323_p10), %s1089_s20, 2 }
  0x22   : > { %326 = sbr.rel (%p323_p10) target bundleno = 618 (0x26a), region = 77  ;;  %s861_s12 = sshll.u32 (!%p323_p10), %s329_s11, 6 }
  0x23   : > { %s993_s13 = smul.u32 (!%p323_p10), 24, %s329_s11  ;;  %s1208_s24 = scalar_lea.vmem (!%p323_p10), [#allocation3], %s861_s12 }
  0x24   : > { %p862_p12 = scmp.ne.s32.totalorder (!%p323_p10), %s1089_s20, 0 }
  0x25   : > { %s1210_s25 = scalar_lea.vmem (!%p323_p10), [#allocation4], %s993_s13 }
  0x27   : > { %s1202_s14 = scalar_select %p369_p11, %s1089_s20, 2 }
  0x28   : > { %377 = sbr.rel (%p862_p12) target bundleno = 367 (0x16f), region = 85 }
  0x29   : > { %s371_s17 = scalar_lea.vmem %s1287_s4, %s1202_s14 }
  0x2d   : > { %v378_v16 = vld [vmem:[%s1283_s0] sm:$0xff]  ;;  %v380_v17 = vld [vmem:[%s1283_s0 + $0x10] sm:$0xff]  ;;  %v379_v18 = vld [vmem:[%s1283_s0 + $0x8] sm:$0xff] }
  0x2e   : > { %384 = vadd.xlane.f32.xlu0 %v378_v16  ;;  %388 = vadd.xlane.f32.xlu1 %v380_v17  ;;  %v381_v19 = vld [vmem:[%s1283_s0 + $0x18] sm:$0xff]  ;;  %v382_v20 = vld [vmem:[%s1283_s0 + $0x20] sm:$0xff]  ;;  %v383_v21 = vld [vmem:[%s1283_s0 + $0x28] sm:$0xff] }
  0x2f   : > { %v863_v2 = vld [vmem:[%s1284_s1] ss:$0 sm:$0xff] }
  0x30   : > { %v864_v7 = vld [vmem:[%s1285_s2] ss:$0 sm:$0xff] }
  0x32   : > { %386 = vadd.xlane.f32.xlu0 %v379_v18  ;;  %390 = vadd.xlane.f32.xlu1 %v381_v19 }
  0x36   : > { %392 = vadd.xlane.f32.xlu0 %v382_v20  ;;  %394 = vadd.xlane.f32.xlu1 %v383_v21 }
  0xb7   : > { %v385_v22 = vpop.xlane.xlu0 %384  ;;  %v389_v23 = vpop.xlane.xlu1 %388 }
  0xb8   : > { %v397_v24 = vmul.f32 0.0078125, %v385_v22  ;;  %v399_v25 = vmul.f32 0.0078125, %v389_v23 }
  0xba   : > { %v403_v26 = vsub.f32 %v378_v16, %v397_v24  ;;  %v405_v27 = vsub.f32 %v380_v17, %v399_v25 }
  0xbb   : > { %v387_v28 = vpop.xlane.xlu0 %386  ;;  %v391_v29 = vpop.xlane.xlu1 %390 }
  0xbc   : > { %v398_v30 = vmul.f32 0.0078125, %v387_v28  ;;  %v409_v31 = vmul.f32 %v403_v26, %v403_v26  ;;  %v400_v32 = vmul.f32 0.0078125, %v391_v29  ;;  %v411_v35 = vmul.f32 %v405_v27, %v405_v27 }
  0xbe   : > { %v404_v33 = vsub.f32 %v379_v18, %v398_v30  ;;  %415 = vadd.xlane.f32.xlu0 %v409_v31  ;;  %v406_v34 = vsub.f32 %v381_v19, %v400_v32 }
  0xbf   : > { %v393_v36 = vpop.xlane.xlu0 %392  ;;  %v395_v37 = vpop.xlane.xlu1 %394 }
  0xc0   : > { %v401_v38 = vmul.f32 0.0078125, %v393_v36  ;;  %v410_v39 = vmul.f32 %v404_v33, %v404_v33  ;;  %v402_v40 = vmul.f32 0.0078125, %v395_v37  ;;  %v412_v43 = vmul.f32 %v406_v34, %v406_v34 }
  0xc2   : > { %v407_v41 = vsub.f32 %v382_v20, %v401_v38  ;;  %419 = vadd.xlane.f32.xlu0 %v411_v35  ;;  %417 = vadd.xlane.f32.xlu1 %v410_v39  ;;  %v408_v42 = vsub.f32 %v383_v21, %v402_v40 }
  0xc4   : > { %v413_v44 = vmul.f32 %v407_v41, %v407_v41  ;;  %v414_v45 = vmul.f32 %v408_v42, %v408_v42 }
  0xc6   : > { %421 = vadd.xlane.f32.xlu1 %v412_v43  ;;  %423 = vadd.xlane.f32.xlu0 %v413_v44 }
  0xca   : > { %425 = vadd.xlane.f32.xlu1 %v414_v45 }
 0x147   : > { %v416_v46 = vpop.xlane.xlu0 %415 }
 0x148   : > { %v427_v47 = vmul.f32 0.0078125, %v416_v46 }
 0x14a   : > { %v433_v48 = vadd.f32 1e-05, %v427_v47 }
 0x14b   : > { %v418_v49 = vpop.xlane.xlu1 %417  ;;  %v420_v50 = vpop.xlane.xlu0 %419 }
 0x14c   : > { %1036 = vrsqrt.f32 %v433_v48  ;;  %v428_v51 = vmul.f32 0.0078125, %v418_v49  ;;  %v429_v52 = vmul.f32 0.0078125, %v420_v50 }
 0x14e   : > { %v434_v53 = vadd.f32 1e-05, %v428_v51  ;;  %v435_v54 = vadd.f32 1e-05, %v429_v52 }
 0x14f   : > { %v422_v55 = vpop.xlane.xlu1 %421  ;;  %v424_v56 = vpop.xlane.xlu0 %423 }
 0x150   : > { %1038 = vrsqrt.f32 %v434_v53  ;;  %v430_v57 = vmul.f32 0.0078125, %v422_v55  ;;  %v431_v58 = vmul.f32 0.0078125, %v424_v56 }
 0x151   : > { %1040 = vrsqrt.f32 %v435_v54 }
 0x152   : > { %v436_v59 = vadd.f32 1e-05, %v430_v57  ;;  %v437_v60 = vadd.f32 1e-05, %v431_v58 }
 0x153   : > { %v426_v61 = vpop.xlane.xlu1 %425 }
 0x154   : > { %1042 = vrsqrt.f32 %v436_v59  ;;  %v432_v62 = vmul.f32 0.0078125, %v426_v61 }
 0x155   : > { %1044 = vrsqrt.f32 %v437_v60 }
 0x156   : > { %v438_v63 = vadd.f32 1e-05, %v432_v62 }
 0x158   : > { %1046 = vrsqrt.f32 %v438_v63 }
 0x159   : > { %v1037_v0 = vpop.eup %1036 }
 0x15a   : > { %v445_v1 = vmul.f32 %v1037_v0, %v403_v26 }
 0x15c   : > { %v458_v5 = vmul.f32 %v863_v2, %v445_v1 }
 0x15d   : > { %v1039_v3 = vpop.eup %1038 }
 0x15e   : > { %v1041_v4 = vpop.eup %1040  ;;  %v446_v6 = vmul.f32 %v1039_v3, %v404_v33  ;;  %v471_v12 = vadd.f32 %v864_v7, %v458_v5 }
 0x15f   : > { %v447_v8 = vmul.f32 %v1041_v4, %v405_v27 }
 0x160   : > { %v459_v9 = vmul.f32 %v863_v2, %v446_v6 }
 0x161   : > { %v1043_v10 = vpop.eup %1042  ;;  %v460_v14 = vmul.f32 %v863_v2, %v447_v8 }
 0x162   : > { %v1045_v11 = vpop.eup %1044  ;;  %v472_v13 = vadd.f32 %v864_v7, %v459_v9  ;;  %v448_v15 = vmul.f32 %v1043_v10, %v406_v34 }
 0x163   : > { %v449_v16 = vmul.f32 %v1045_v11, %v407_v41  ;;  %v473_v20 = vadd.f32 %v864_v7, %v460_v14 }
 0x164   : > { %v907_v17 = vpack.c.bf16 %v472_v13, %v471_v12  ;;  %v461_v18 = vmul.f32 %v863_v2, %v448_v15 }
 0x165   : > { %v1047_v19 = vpop.eup %1046  ;;  %v462_v22 = vmul.f32 %v863_v2, %v449_v16 }
 0x166   : > { %908 = vst [vmem:[#allocation2] sm:$0xff] %v907_v17   ;;  %v474_v21 = vadd.f32 %v864_v7, %v461_v18  ;;  %v450_v23 = vmul.f32 %v1047_v19, %v408_v42 }
 0x167   : > { %v475_v26 = vadd.f32 %v864_v7, %v462_v22 }
 0x168   : > { %v912_v24 = vpack.c.bf16 %v474_v21, %v473_v20  ;;  %v463_v25 = vmul.f32 %v863_v2, %v450_v23 }
 0x16a   : > { %934 = vst [vmem:[#allocation2 + $0x8] sm:$0xff] %v912_v24   ;;  %v476_v27 = vadd.f32 %v864_v7, %v463_v25 }
 0x16c   : > { %v917_v28 = vpack.c.bf16 %v476_v27, %v475_v26 }
 0x16e   : > { %935 = vst [vmem:[#allocation2 + $0x10] sm:$0xff] %v917_v28  }
 0x16f PF: > { %v1048_v29 = vld [vmem:[%s1208_s24 + $0x38] sm:$0xff]   ;;  %v1099_v30 = vmov 0.0   ;;  %v1049_v31 = vld [vmem:[%s1208_s24 + $0x30] sm:$0xff]   ;;  %vm1100_vm0 = vmmov 0   ;;  %v1050_v32 = vld [vmem:[%s1208_s24 + $0x28] sm:$0xff]   ;;  %s889_s14 = sshll.u32 (%p1166_p6), %s1089_s20, 2 }
 0x170   : > { %977 = vmatprep.subr.bf16.mxu1 %v1099_v30  ;;  %949 = vmatprep.subr.bf16.mxu0 %v1099_v30  ;;  %v1051_v33 = vld [vmem:[%s1208_s24 + $0x20] sm:$0xff]   ;;  %v1052_v34 = vld [vmem:[%s1208_s24 + $0x18] sm:$0xff]   ;;  %v1053_v35 = vld [vmem:[%s1208_s24 + $0x10] sm:$0xff]   ;;  %s700_s6 = scalar_lea.vmem (%p1166_p6), %s1288_s5, %s889_s14 }
 0x171   : > { %985 = vmatpush3.bf16.msra.mxu1 %v1048_v29  ;;  %950 = vmatpush3.bf16.msra.mxu0 %v1048_v29  ;;  %v1054_v36 = vld [vmem:[%s1208_s24 + $0x8] sm:$0xff]   ;;  %v1055_v37 = vld [vmem:[%s1208_s24] sm:$0xff]   ;;  %v1056_v38 = vld [vmem:[#allocation2 + $0x8] sm:$0xff]  }
 0x172   : > { %978 = vmatprep.subr.bf16.mxu1 %v1099_v30  ;;  %951 = vmatprep.subr.bf16.mxu0 %v1099_v30  ;;  %v1057_v39 = vld [vmem:[#allocation2] sm:$0xff]  }
 0x173   : > { %969 = vmatprep.mubr.msk.bf16.mxu1 %vm1100_vm0, %v1099_v30  ;;  %965 = vmatprep.mubr.msk.bf16.mxu0 %vm1100_vm0, %v1099_v30  ;;  %v871_v43 = vld [vmem:[%s371_s17] ss:$0 sm:$0xff] }
 0x175   : > { %986 = vmatpush3.bf16.msra.mxu1 %v1049_v31  ;;  %952 = vmatpush3.bf16.msra.mxu0 %v1049_v31  ;;  %v1058_v40 = vld [vmem:[#allocation2 + $0x10] sm:$0xff]  }
 0x176   : > { %979 = vmatprep.subr.bf16.mxu1 %v1099_v30  ;;  %953 = vmatprep.subr.bf16.mxu0 %v1099_v30 }
 0x179   : > { %987 = vmatpush3.bf16.msra.mxu1 %v1050_v32  ;;  %954 = vmatpush3.bf16.msra.mxu0 %v1050_v32 }
 0x17a   : > { %980 = vmatprep.subr.bf16.mxu1 %v1099_v30  ;;  %955 = vmatprep.subr.bf16.mxu0 %v1099_v30 }
 0x17d   : > { %988 = vmatpush3.bf16.msra.mxu1 %v1051_v33  ;;  %956 = vmatpush3.bf16.msra.mxu0 %v1051_v33 }
 0x17e   : > { %981 = vmatprep.subr.bf16.mxu1 %v1099_v30  ;;  %957 = vmatprep.subr.bf16.mxu0 %v1099_v30 }
 0x181   : > { %989 = vmatpush3.bf16.msra.mxu1 %v1052_v34  ;;  %958 = vmatpush3.bf16.msra.mxu0 %v1052_v34 }
 0x182   : > { %982 = vmatprep.subr.bf16.mxu1 %v1099_v30  ;;  %959 = vmatprep.subr.bf16.mxu0 %v1099_v30 }
 0x185   : > { %990 = vmatpush3.bf16.msra.mxu1 %v1053_v35  ;;  %960 = vmatpush3.bf16.msra.mxu0 %v1053_v35 }
 0x186   : > { %983 = vmatprep.subr.bf16.mxu1 %v1099_v30  ;;  %961 = vmatprep.subr.bf16.mxu0 %v1099_v30 }
 0x189   : > { %991 = vmatpush3.bf16.msra.mxu1 %v1054_v36  ;;  %962 = vmatpush3.bf16.msra.mxu0 %v1054_v36 }
 0x18a   : > { %984 = vmatprep.subr.bf16.mxu1 %v1099_v30  ;;  %963 = vmatprep.subr.bf16.mxu0 %v1099_v30 }
 0x18d   : > { %992 = vmatpush3.bf16.msra.mxu1 %v1055_v37  ;;  %964 = vmatpush3.bf16.msra.mxu0 %v1055_v37 }
 0x190   : > { %970 = vmatmul.mubr.bf16.vlgmr.msra.gmra.mxu1 %v1056_v38  ;;  %966 = vmatmul.mubr.bf16.vlgmr.msra.gmra.mxu0 %v1057_v39 }
 0x191   : > { %973 = vmatprep.mubr.msk.bf16.mxu1 %vm1100_vm0, %v1099_v30 }
 0x198   : > { %974 = vmatmul.mubr.bf16.gmra.mxu1 %v1058_v40 }
 0x250   : > { %v644_v41 = vpop.f32.mrf.mxu1  ;;  %v636_v42 = vpop.f32.mrf.mxu0 }
 0x251   : > { %v637_v46 = vadd.f32 %v871_v43, %v636_v42  ;;  %v645_v49 = vadd.f32 %v871_v43, %v644_v41 }
 0x252   : > { %v971_v44 = vpop.f32.mrf.mxu1  ;;  %v967_v45 = vpop.f32.mrf.mxu0 }
 0x254   : > { %v647_v47 = vpop.f32.mrf.mxu1  ;;  %v639_v48 = vpop.f32.mrf.mxu0 }
 0x255   : > { %v648_v50 = vadd.f32 %v871_v43, %v647_v47  ;;  %v640_v51 = vadd.f32 %v871_v43, %v639_v48 }
 0x256   : > { %v972_v52 = vpop.f32.mrf.mxu1  ;;  %v968_v53 = vpop.f32.mrf.mxu0 }
 0x257   : > { %v927_v54 = vpack.c.bf16 %v648_v50, %v645_v49  ;;  %v922_v55 = vpack.c.bf16 %v640_v51, %v637_v46 }
 0x258   : > { %v652_v56 = vpop.f32.mrf.mxu1 }
 0x259   : > { %936 = vst [vmem:[%s1210_s25 + $0x8] sm:$0xff] %v927_v54   ;;  %923 = vst [vmem:[%s1210_s25] sm:$0xff] %v922_v55   ;;  %v653_v59 = vadd.f32 %v871_v43, %v652_v56 }
 0x25a   : > { %v975_v57 = vpop.f32.mrf.mxu1 }
 0x25c   : > { %v655_v58 = vpop.f32.mrf.mxu1 }
 0x25d   : > { %v656_v60 = vadd.f32 %v871_v43, %v655_v58  ;;  %695 = sbr.rel (!%p1166_p6) target bundleno = 618 (0x26a), region = 89 }
 0x25e   : > { %v976_v61 = vpop.f32.mrf.mxu1 }
 0x25f   : > { %v932_v62 = vpack.c.bf16 %v656_v60, %v653_v59 }
 0x260   : > { %v717_v63 = vld [vmem:[%s1210_s25] sm:$0xf] (%p1166_p6)  ;;  %v719_v0 = vld [vmem:[%s1210_s25 + $0x4] sm:$0xf] (%p1166_p6)  ;;  %v721_v1 = vld [vmem:[%s1210_s25 + $0x8] sm:$0xf] (%p1166_p6) }
 0x261   : > { %937 = vst [vmem:[%s1210_s25 + $0x10] sm:$0xff] %v932_v62   ;;  %v723_v2 = vld [vmem:[%s1210_s25 + $0xc] sm:$0xf] (%p1166_p6)  ;;  %718 = vst [vmem:[%s700_s6] sm:$0xf] (%p1166_p6), %v717_v63 }
 0x262   : > { %720 = vst [vmem:[%s700_s6 + $0xc] sm:$0xf] %v719_v0  ;;  %722 = vst [vmem:[%s700_s6 + $0x18] sm:$0xf] %v721_v1 }
 0x263   : > { %724 = vst [vmem:[%s700_s6 + $0x24] sm:$0xf] %v723_v2 }
 0x268   : > { %v725_v3 = vld [vmem:[%s1210_s25 + $0x10] sm:$0xf]  ;;  %v727_v4 = vld [vmem:[%s1210_s25 + $0x14] sm:$0xf] }
 0x269   : > { %726 = vst [vmem:[%s700_s6 + $0x30] sm:$0xf] %v725_v3  ;;  %728 = vst [vmem:[%s700_s6 + $0x3c] sm:$0xf] %v727_v4 }
 0x26a PF: > { %s15_s22 = sadd.s32 1, %s1097_s22   ;;  %s1290_s18 = smov %s1085_s19 }
 0x26b   : > { %p12_p13 = scmp.ge.s32.totalorder %s15_s22, 5   ;;  %s1291_s19 = smov %s1171_s28 }
 0x26c   : > { %s1292_s20 = smov %s1093_s21  ;;  %s1293_s21 = smov %s1295_s23 }
 0x26d   :  { %14 = sbr.rel (!%p12_p13) target bundleno = 3 (0x3), region = 167 }

// kernel: _lambda_.17
= control target key start
LH: loop header
LB: loop body
LE: loop exit
PB: predicated region body
PF: predicated region fallthrough
CT: control target
= control target key end

     0   :  { %v272_v0 = vmov 0.0   ;;  %vm273_vm0 = vmmov 0   ;;  %s374_s1 = inlined_call_operand.vmem [shape: bf16[128,128], index: 1, kind: input, shape index: {}]   ;;  %s375_s0 = inlined_call_operand.vmem [shape: bf16[48,128], index: 0, kind: input, shape index: {}]   ;;  %s376_s2 = inlined_call_operand.vmem [shape: f32[1,128], index: 2, kind: input, shape index: {}]   ;;  %s377_s3 = inlined_call_operand.vmem [shape: f32[48,128], index: 3, kind: input, shape index: {}]   ;;  %s378_s4 = inlined_call_operand.vmem [shape: f32[48,128], index: 4, kind: output, shape index: {}]  }
   0x1   :  { %243 = vmatprep.subr.bf16.mxu1 %v272_v0  ;;  %v261_v1 = vld [vmem:[%s374_s1 + $0x38] sm:$0xff]   ;;  %215 = vmatprep.subr.bf16.mxu0 %v272_v0  ;;  %v262_v2 = vld [vmem:[%s374_s1 + $0x30] sm:$0xff]   ;;  %v263_v3 = vld [vmem:[%s374_s1 + $0x28] sm:$0xff]  }
   0x2   :  { %235 = vmatprep.mubr.msk.bf16.mxu1 %vm273_vm0, %v272_v0  ;;  %231 = vmatprep.mubr.msk.bf16.mxu0 %vm273_vm0, %v272_v0  ;;  %v264_v4 = vld [vmem:[%s374_s1 + $0x20] sm:$0xff]   ;;  %v265_v5 = vld [vmem:[%s374_s1 + $0x18] sm:$0xff]   ;;  %v266_v6 = vld [vmem:[%s374_s1 + $0x10] sm:$0xff]  }
   0x3   :  { %251 = vmatpush3.bf16.msra.mxu1 %v261_v1  ;;  %216 = vmatpush3.bf16.msra.mxu0 %v261_v1  ;;  %v267_v7 = vld [vmem:[%s374_s1 + $0x8] sm:$0xff]   ;;  %v268_v8 = vld [vmem:[%s374_s1] sm:$0xff]   ;;  %v271_v11 = vld [vmem:[%s375_s0 + $0x10] sm:$0xff]  }
   0x4   :  { %244 = vmatprep.subr.bf16.mxu1 %v272_v0  ;;  %217 = vmatprep.subr.bf16.mxu0 %v272_v0  ;;  %v269_v9 = vld [vmem:[%s375_s0 + $0x8] sm:$0xff]   ;;  %v270_v10 = vld [vmem:[%s375_s0] sm:$0xff]   ;;  %v172_v14 = vld [vmem:[%s377_s3 + $0x10] sm:$0xff] }
   0x5   :  { %v192_v12 = vld [vmem:[%s376_s2] ss:$0 sm:$0xff]  ;;  %v173_v24 = vld [vmem:[%s377_s3 + $0x18] sm:$0xff]  ;;  %v171_v26 = vld [vmem:[%s377_s3 + $0x8] sm:$0xff] }
   0x6   :  { %v170_v16 = vld [vmem:[%s377_s3] sm:$0xff]  ;;  %v175_v39 = vld [vmem:[%s377_s3 + $0x28] sm:$0xff] }
   0x7   :  { %252 = vmatpush3.bf16.msra.mxu1 %v262_v2  ;;  %218 = vmatpush3.bf16.msra.mxu0 %v262_v2  ;;  %v174_v34 = vld [vmem:[%s377_s3 + $0x20] sm:$0xff] }
   0x8   :  { %245 = vmatprep.subr.bf16.mxu1 %v272_v0  ;;  %219 = vmatprep.subr.bf16.mxu0 %v272_v0 }
   0xb   :  { %253 = vmatpush3.bf16.msra.mxu1 %v263_v3  ;;  %220 = vmatpush3.bf16.msra.mxu0 %v263_v3 }
   0xc   :  { %246 = vmatprep.subr.bf16.mxu1 %v272_v0  ;;  %221 = vmatprep.subr.bf16.mxu0 %v272_v0 }
   0xf   :  { %254 = vmatpush3.bf16.msra.mxu1 %v264_v4  ;;  %222 = vmatpush3.bf16.msra.mxu0 %v264_v4 }
  0x10   :  { %247 = vmatprep.subr.bf16.mxu1 %v272_v0  ;;  %223 = vmatprep.subr.bf16.mxu0 %v272_v0 }
  0x13   :  { %255 = vmatpush3.bf16.msra.mxu1 %v265_v5  ;;  %224 = vmatpush3.bf16.msra.mxu0 %v265_v5 }
  0x14   :  { %248 = vmatprep.subr.bf16.mxu1 %v272_v0  ;;  %225 = vmatprep.subr.bf16.mxu0 %v272_v0 }
  0x17   :  { %256 = vmatpush3.bf16.msra.mxu1 %v266_v6  ;;  %226 = vmatpush3.bf16.msra.mxu0 %v266_v6 }
  0x18   :  { %249 = vmatprep.subr.bf16.mxu1 %v272_v0  ;;  %227 = vmatprep.subr.bf16.mxu0 %v272_v0 }
  0x1b   :  { %257 = vmatpush3.bf16.msra.mxu1 %v267_v7  ;;  %228 = vmatpush3.bf16.msra.mxu0 %v267_v7 }
  0x1c   :  { %250 = vmatprep.subr.bf16.mxu1 %v272_v0  ;;  %229 = vmatprep.subr.bf16.mxu0 %v272_v0 }
  0x1f   :  { %258 = vmatpush3.bf16.msra.mxu1 %v268_v8  ;;  %230 = vmatpush3.bf16.msra.mxu0 %v268_v8 }
  0x22   :  { %236 = vmatmul.mubr.bf16.vlgmr.msra.gmra.mxu1 %v269_v9  ;;  %232 = vmatmul.mubr.bf16.vlgmr.msra.gmra.mxu0 %v270_v10 }
  0x23   :  { %239 = vmatprep.mubr.msk.bf16.mxu1 %vm273_vm0, %v272_v0 }
  0x2a   :  { %240 = vmatmul.mubr.bf16.gmra.mxu1 %v271_v11 }
  0xe2   :  { %v155_v13 = vpop.f32.mrf.mxu1  ;;  %v147_v15 = vpop.f32.mrf.mxu0 }
  0xe3   :  { %v156_v17 = vadd.f32 %v192_v12, %v155_v13  ;;  %v148_v18 = vadd.f32 %v192_v12, %v147_v15 }
  0xe4   :  { %v237_v19 = vpop.f32.mrf.mxu1  ;;  %v233_v20 = vpop.f32.mrf.mxu0 }
  0xe5   :  { %v178_v21 = vadd.f32 %v172_v14, %v156_v17  ;;  %v176_v22 = vadd.f32 %v170_v16, %v148_v18 }
  0xe6   :  { %v158_v23 = vpop.f32.mrf.mxu1  ;;  %v150_v25 = vpop.f32.mrf.mxu0 }
  0xe7   :  { %184 = vst [vmem:[%s378_s4 + $0x10] sm:$0xff] %v178_v21  ;;  %182 = vst [vmem:[%s378_s4] sm:$0xff] %v176_v22  ;;  %v159_v27 = vadd.f32 %v192_v12, %v158_v23  ;;  %v151_v28 = vadd.f32 %v192_v12, %v150_v25 }
  0xe8   :  { %v238_v29 = vpop.f32.mrf.mxu1  ;;  %v234_v30 = vpop.f32.mrf.mxu0 }
  0xe9   :  { %v179_v31 = vadd.f32 %v173_v24, %v159_v27  ;;  %v177_v32 = vadd.f32 %v171_v26, %v151_v28 }
  0xea   :  { %v163_v33 = vpop.f32.mrf.mxu1 }
  0xeb   :  { %185 = vst [vmem:[%s378_s4 + $0x18] sm:$0xff] %v179_v31  ;;  %183 = vst [vmem:[%s378_s4 + $0x8] sm:$0xff] %v177_v32  ;;  %v164_v35 = vadd.f32 %v192_v12, %v163_v33 }
  0xec   :  { %v241_v36 = vpop.f32.mrf.mxu1 }
  0xed   :  { %v180_v37 = vadd.f32 %v174_v34, %v164_v35 }
  0xee   :  { %v166_v38 = vpop.f32.mrf.mxu1 }
  0xef   :  { %186 = vst [vmem:[%s378_s4 + $0x20] sm:$0xff] %v180_v37  ;;  %v167_v40 = vadd.f32 %v192_v12, %v166_v38 }
  0xf0   :  { %v242_v41 = vpop.f32.mrf.mxu1 }
  0xf1   :  { %v181_v42 = vadd.f32 %v175_v39, %v167_v40 }
  0xf3   :  { %187 = vst [vmem:[%s378_s4 + $0x28] sm:$0xff] %v181_v42 }

// kernel: _lambda_.16
= control target key start
LH: loop header
LB: loop body
LE: loop exit
PB: predicated region body
PF: predicated region fallthrough
CT: control target
= control target key end

     0   :  { %s1637_s12 = smov 0   ;;  %s1639_s13 = smov 0   ;;  %s1913_s0 = inlined_call_operand.vmem [shape: bf16[2,24,384], index: 0, kind: input, shape index: {}, may-alias: {0,1,2}]   ;;  %s1914_s1 = inlined_call_operand.vmem [shape: bf16[2,24,384], index: 1, kind: input, shape index: {}, may-alias: {0,1,2}]   ;;  %s1915_s2 = inlined_call_operand.vmem [shape: bf16[2,24,384], index: 2, kind: input, shape index: {}, may-alias: {0,1,2}]   ;;  %s1916_s3 = inlined_call_operand.vmem [shape: bf16[2,24,128], index: 3, kind: output, shape index: {}]  }
   0x1   :  { %s1641_s14 = smov 0   ;;  %s1643_s15 = smov 0  }
   0x2   :  { %s1645_s16 = smov 0  }
   0x3 LB: > { %s25_s17 = sadd.s32 1, %s1608_s15  ;;  %p41_p1 = scmp.ne.s32.totalorder %s1600_s13, %s1596_s12  ;;  %s1612_s16 = sphi %s1645_s16, %s13_s16   ;;  %s1608_s15 = sphi %s1643_s15, %s1921_s15   ;;  %s1604_s14 = sphi %s1641_s14, %s1920_s14   ;;  %s1600_s13 = sphi %s1639_s13, %s1919_s13   ;;  %s1596_s12 = sphi %s1637_s12, %s1918_s12  }
   0x4   : > { %p27_p0 = scmp.ge.s32.totalorder %s25_s17, 2  ;;  %p42_p2 = scmp.eq.s32.totalorder %s1612_s16, 0 }
   0x5   : > { %s34_s20 = sadd.s32 1, %s1600_s13  ;;  %p1303_p5 = scmp.ge.s32.totalorder %s1612_s16, 2 }
   0x6   : > { %s1923_s17 = smov (%p27_p0, %s25_s17), 0  ;;  %p1668_p3 = por %p42_p2, %p41_p1 }
   0x7   : > { %s29_s19 = ssub.s32 %s1608_s15, %s1923_s17  ;;  %155 = sbr.rel (%p1303_p5) target bundleno = 33 (0x21), region = 16 }
   0x8   : > { %p32_p4 = scmp.eq.s32.totalorder %s29_s19, 0 }
   0xa   : > { %s1676_s21 = scalar_select %p32_p4, %s1600_s13, %s34_s20  }
   0xc   : > { %158 = sbr.rel (!%p1668_p3) target bundleno = 19 (0x13), region = 20  ;;  %s160_s22 = sand.u32 (%p1668_p3), 1, %s1600_s13  }
   0xd   : > { %s1459_s23 = smul.u32 (%p1668_p3), 36, %s1608_s15 }
   0xe   : > { %s1458_s24 = smul.u32 (%p1668_p3), 12, %s160_s22 }
   0xf   : > { %s166_s27 = scalar_lea.vmem (%p1668_p3), %s1913_s0, %s1459_s23 }
  0x10   : > { %v183_v0 = vld [vmem:[%s166_s27] sm:$0xf] (%p1668_p3)  ;;  %v185_v1 = vld [vmem:[%s166_s27 + $0xc] sm:$0xf] (%p1668_p3)  ;;  %s162_s28 = scalar_lea.vmem (%p1668_p3), [#allocation2], %s1458_s24 }
  0x11   : > { %184 = vst [vmem:[%s162_s28] sm:$0xf] %v183_v0  ;;  %186 = vst [vmem:[%s162_s28 + $0x4] sm:$0xf] %v185_v1  ;;  %v187_v2 = vld [vmem:[%s166_s27 + $0x18] sm:$0xf] }
  0x12   : > { %188 = vst [vmem:[%s162_s28 + $0x8] sm:$0xf] %v187_v2 }
  0x13 PF: > { %218 = sbr.rel (!%p1668_p3) target bundleno = 26 (0x1a), region = 61  ;;  %s220_s29 = sand.u32 (%p1668_p3), 1, %s1600_s13  }
  0x14   : > { %s1305_s30 = smul.u32 (%p1668_p3), 36, %s1608_s15 }
  0x15   : > { %s1460_s4 = smul.u32 (%p1668_p3), 12, %s220_s29 }
  0x16   : > { %s1211_s7 = scalar_lea.vmem (%p1668_p3), %s1914_s1, %s1305_s30 }
  0x17   : > { %v1306_v3 = vld [vmem:[%s1211_s7 + $0x4] sm:$0xf] (%p1668_p3)  ;;  %v1307_v4 = vld [vmem:[%s1211_s7 + $0x10] sm:$0xf] (%p1668_p3)  ;;  %s222_s8 = scalar_lea.vmem (%p1668_p3), [#allocation3], %s1460_s4 }
  0x18   : > { %245 = vst [vmem:[%s222_s8] sm:$0xf] %v1306_v3  ;;  %247 = vst [vmem:[%s222_s8 + $0x4] sm:$0xf] %v1307_v4  ;;  %v1308_v5 = vld [vmem:[%s1211_s7 + $0x1c] sm:$0xf] }
  0x19   : > { %249 = vst [vmem:[%s222_s8 + $0x8] sm:$0xf] %v1308_v5 }
  0x1a PF: > { %279 = sbr.rel (!%p1668_p3) target bundleno = 33 (0x21), region = 102  ;;  %s281_s9 = sand.u32 (%p1668_p3), 1, %s1600_s13  }
  0x1b   : > { %s1309_s10 = smul.u32 (%p1668_p3), 36, %s1608_s15 }
  0x1c   : > { %s1461_s11 = smul.u32 (%p1668_p3), 12, %s281_s9 }
  0x1d   : > { %s1218_s22 = scalar_lea.vmem (%p1668_p3), %s1915_s2, %s1309_s10 }
  0x1e   : > { %v1310_v6 = vld [vmem:[%s1218_s22 + $0x8] sm:$0xf] (%p1668_p3)  ;;  %v1311_v7 = vld [vmem:[%s1218_s22 + $0x14] sm:$0xf] (%p1668_p3)  ;;  %s283_s23 = scalar_lea.vmem (%p1668_p3), [#allocation4], %s1461_s11 }
  0x1f   : > { %306 = vst [vmem:[%s283_s23] sm:$0xf] %v1310_v6  ;;  %308 = vst [vmem:[%s283_s23 + $0x4] sm:$0xf] %v1311_v7  ;;  %v1312_v8 = vld [vmem:[%s1218_s22 + $0x20] sm:$0xf] }
  0x20   : > { %310 = vst [vmem:[%s283_s23 + $0x8] sm:$0xf] %v1312_v8 }
  0x21 PF: > { %p1313_p6 = scmp.ge.s32.totalorder %s1612_s16, 1  ;;  %p339_p7 = scmp.lt.s32.totalorder %s1612_s16, 3 }
  0x23   : > { %p340_p8 = pnand %p1313_p6, %p339_p7 }
  0x24   : > { %s346_s18 = sand.u32 (!%p340_p8), 1, %s1596_s12   ;;  %s1614_s27 = smov (!%p340_p8), 96  }
  0x25   : > { %343 = sbr.rel (%p340_p8) target bundleno = 2493 (0x9bd), region = 143  ;;  %s1615_s28 = smov (!%p340_p8), 64  }
  0x26   : > { %s1703_s24 = smul.u32 (!%p340_p8), 12, %s346_s18  ;;  %s1616_s29 = smov (!%p340_p8), 32  }
  0x27   : > { %p396_p9 = scmp.lt.s32.totalorder (!%p340_p8), %s1604_s14, 1 }
  0x28   : > { %s355_s25 = scalar_lea.vmem (!%p340_p8), [#allocation3], %s1703_s24  ;;  %s348_s26 = scalar_lea.vmem (!%p340_p8), [#allocation2], %s1703_s24 }
  0x29   : > { %s362_s12 = scalar_lea.vmem (!%p340_p8), [#allocation4], %s1703_s24 }
  0x2a   : > { %vm434_vm0 = vcmask 261120   ;;  %v1706_v9 = vld [vmem:[%s355_s25 + $0x8] ss:$0 sps:$4 sm:$0xff]   ;;  %v1708_v10 = vld [vmem:[%s355_s25] sm:$0xff]   ;;  %v407_v13 = vld [vmem:[%s348_s26 + $0x4] sm:$0xf]  ;;  %v495_v21 = vlaneseq }
  0x2b   : > { %v406_v11 = vld [vmem:[%s348_s26] sm:$0xf]  ;;  %1446 = vmatprep.subr.msk.bf16.mxu0 %vm434_vm0, %v1706_v9  ;;  %v445_v12 = vsel %vm434_vm0, %v1706_v9, 0  ;;  %v416_v15 = vmul.bf16 1043676725, %v407_v13  ;;  %v442_v18 = vsel %vm434_vm0, %v1708_v10, 0 }
  0x2c   : > { %v415_v14 = vmul.bf16 1043676725, %v406_v11  ;;  %1383 = vmatpush3.bf16.xpose.msra.mxu0 %v445_v12  ;;  %v408_v17 = vld [vmem:[%s348_s26 + $0x8] sm:$0xf]  ;;  %v1727_v22 = vand.u32 127, %v495_v21  ;;  %vm503_vm2 = vcmask 195584  }
  0x2d   : > { %1447 = vmatprep.subr.msk.bf16.mxu0 %vm434_vm0, %v1708_v10  ;;  %v417_v19 = vmul.bf16 1043676725, %v408_v17  ;;  %vm554_vm3 = vcmask 1043456   ;;  %v1743_v48 = vld [vmem:[%s362_s12 + $0x8] ss:$0 sps:$4 sm:$0xff]   ;;  %v1745_v49 = vld [vmem:[%s362_s12] sm:$0xff]  }
  0x2e   : > { %v1717_v16 = vcombine.low %v415_v14, %v416_v15  ;;  %vm497_vm1 = vcmp.lt.s32.totalorder %v1727_v22, 17  ;;  %1448 = vmatprep.subr.msk.bf16.mxu1 %vm554_vm3, %v1743_v48  ;;  %v556_v50 = vsel %vm554_vm3, %v1743_v48, 0  ;;  %s1925_s14 = smov (!%p396_p9, %s1604_s14), 1  ;;  %vm1153_vm4 = vcmask 785408  }
  0x2f   : > { %v1723_v20 = vcombine.low %v417_v19, %v417_v19  ;;  %1391 = vmatpush3.bf16.msra.mxu1 %v556_v50  ;;  %s1463_s30 = smul.u32 12, %s1925_s14  ;;  %vm1149_vm5 = vcmask 523264  }
  0x30   : > { %1386 = vmatprep.mubr.msk.bf16.mxu0 %vm434_vm0, %v1717_v16  ;;  %1392 = vmatprep.subr.bf16.mxu1 %v1745_v49 }
  0x31   : > { %s403_s6 = scalar_lea.vmem %s1916_s3, %s1463_s30 }
  0x33   : > { %1393 = vmatpush3.bf16.msra.mxu1 %v1745_v49 }
  0x34   : > { %1385 = vmatpush3.bf16.xpose.msra.mxu0 %v442_v18 }
  0x3b   : > { %1387 = vmatmul.mubr.msk.bf16.vlgmr.msra.gmra.mxu0 %vm434_vm0, %v1723_v20 }
  0xfb   : > { %v1388_v23 = vpop.f32.mrf.mxu0 }
  0xfc   : > { %v502_v24 = vsel %vm497_vm1, %v1388_v23, -1e+30 }
  0xfd   : > { %v481_v25 = vpop.f32.mrf.mxu0  ;;  %v510_v26 = vsel %vm503_vm2, %v502_v24, -inf }
  0xfe   : > { %v500_v27 = vsel %vm497_vm1, %v481_v25, -1e+30  ;;  %511 = vmax.xlane.f32.xlu1 %v510_v26 }
  0xff   : > { %v1389_v28 = vpop.f32.mrf.mxu0  ;;  %v504_v29 = vsel %vm503_vm2, %v500_v27, -inf }
 0x100   : > { %505 = vmax.xlane.f32.xlu0 %v504_v29 }
 0x101   : > { %v484_v30 = vpop.f32.mrf.mxu0 }
 0x102   : > { %v501_v31 = vsel %vm497_vm1, %v484_v30, -1e+30 }
 0x103   : > { %v507_v32 = vsel %vm503_vm2, %v501_v31, -inf }
 0x104   : > { %508 = vmax.xlane.f32.xlu0 %v507_v32 }
 0x187   : > { %v512_v33 = vpop.xlane.xlu1 %511 }
 0x188   : > { %v515_v34 = vsub.f32 %v502_v24, %v512_v33 }
 0x189   : > { %v506_v35 = vpop.xlane.xlu0 %505 }
 0x18a   : > { %v513_v36 = vsub.f32 %v500_v27, %v506_v35  ;;  %v520_v37 = vmul.f32 1.442695, %v515_v34 }
 0x18c   : > { %v516_v38 = vmul.f32 1.442695, %v513_v36 }
 0x18d   : > { %v509_v39 = vpop.xlane.xlu0 %508 }
 0x18e   : > { %1526 = vpow2.f32 %v516_v38  ;;  %v514_v40 = vsub.f32 %v501_v31, %v509_v39 }
 0x18f   : > { %1528 = vpow2.f32 %v520_v37 }
 0x190   : > { %v518_v41 = vmul.f32 1.442695, %v514_v40 }
 0x192   : > { %1530 = vpow2.f32 %v518_v41 }
 0x19b   : > { %v1527_v42 = vpop.eup %1526 }
 0x19c   : > { %v522_v43 = vsel %vm503_vm2, %v1527_v42, 0.0  ;;  %v1529_v44 = vpop.eup %1528 }
 0x19d   : > { %523 = vadd.xlane.f32.xlu1 %v522_v43  ;;  %v528_v46 = vsel %vm503_vm2, %v1529_v44, 0.0 }
 0x19f   : > { %v1531_v45 = vpop.eup %1530 }
 0x1a0   : > { %v525_v47 = vsel %vm503_vm2, %v1531_v45, 0.0 }
 0x1a1   : > { %529 = vadd.xlane.f32.xlu1 %v528_v46  ;;  %526 = vadd.xlane.f32.xlu0 %v525_v47 }
 0x1b2   : > { %610 = vrot.lane.b32.xlu1 %v1708_v10, %s1614_s27 }
 0x1b6   : > { %606 = vrot.lane.b32.xlu1 %v1717_v16, %s1614_s27 }
 0x1b7   : > { %612 = vrot.lane.b32.xlu0 %v1706_v9, %s1614_s27 }
 0x1ba   : > { %608 = vrot.lane.b32.xlu1 %v1723_v20, %s1614_s27 }
 0x226   : > { %v524_v51 = vpop.xlane.xlu1 %523 }
 0x227   : > { %1532 = vrcp.f32 %v524_v51 }
 0x22a   : > { %v530_v52 = vpop.xlane.xlu1 %529  ;;  %v527_v53 = vpop.xlane.xlu0 %526 }
 0x22b   : > { %1534 = vrcp.f32 %v530_v52 }
 0x22c   : > { %1536 = vrcp.f32 %v527_v53 }
 0x22e   : > { %v613_v54 = vpop.permute.xlu0 %612  ;;  %v611_v56 = vpop.permute.xlu1 %610 }
 0x22f   : > { %1449 = vmatprep.subr.msk.bf16.mxu1 %vm434_vm0, %v613_v54  ;;  %v624_v0 = vsel %vm434_vm0, %v613_v54, 0  ;;  %v621_v2 = vsel %vm434_vm0, %v611_v56, 0 }
 0x232   : > { %v607_v1 = vpop.permute.xlu1 %606 }
 0x234   : > { %v1533_v55 = vpop.eup %1532 }
 0x235   : > { %v534_v60 = vmul.f32 %v1533_v55, %v1527_v42 }
 0x236   : > { %v609_v3 = vpop.permute.xlu1 %608 }
 0x238   : > { %v1535_v57 = vpop.eup %1534 }
 0x239   : > { %v1537_v58 = vpop.eup %1536  ;;  %v536_v59 = vmul.f32 %v1535_v57, %v1529_v44 }
 0x23a   : > { %v535_v61 = vmul.f32 %v1537_v58, %v1531_v45 }
 0x23b   : > { %v538_v62 = vpack.c.bf16 %v536_v59, %v536_v59 }
 0x23c   : > { %v537_v63 = vpack.c.bf16 %v535_v61, %v534_v60 }
 0x23e   : > { %1394 = vmatprep.mubr.msk.bf16.mxu1 %vm503_vm2, %v537_v63 }
 0x23f   : > { %1395 = vmatmul.mubr.msk.bf16.vlgmr.msra.gmra.mxu1 %vm503_vm2, %v538_v62 }
 0x240   : > { %1399 = vmatpush3.bf16.xpose.msra.mxu1 %v624_v0  ;;  %1402 = vmatprep.mubr.msk.bf16.mxu1 %vm434_vm0, %v607_v1 }
 0x241   : > { %1450 = vmatprep.subr.msk.bf16.mxu1 %vm434_vm0, %v611_v56 }
 0x248   : > { %1401 = vmatpush3.bf16.xpose.msra.mxu1 %v621_v2 }
 0x24f   : > { %1403 = vmatmul.mubr.msk.bf16.vlgmr.msra.gmra.mxu1 %vm434_vm0, %v609_v3 }
 0x2ff   : > { %v1769_v4 = vpop.f32.mrf.mxu1 }
 0x301   : > { %v1771_v5 = vpop.f32.mrf.mxu1 }
 0x303   : > { %v1397_v6 = vpop.f32.mrf.mxu1 }
 0x305   : > { %v1773_v7 = vpop.f32.mrf.mxu1 }
 0x30f   : > { %v1404_v8 = vpop.f32.mrf.mxu1 }
 0x310   : > { %v676_v15 = vsel %vm497_vm1, %v1404_v8, -1e+30 }
 0x311   : > { %v660_v11 = vpop.f32.mrf.mxu1  ;;  %v683_v19 = vsel %vm503_vm2, %v676_v15, -inf }
 0x312   : > { %v674_v12 = vsel %vm497_vm1, %v660_v11, -1e+30 }
 0x313   : > { %v1405_v13 = vpop.f32.mrf.mxu1  ;;  %v677_v14 = vsel %vm503_vm2, %v674_v12, -inf }
 0x314   : > { %678 = vmax.xlane.f32.xlu0 %v677_v14 }
 0x315   : > { %v663_v17 = vpop.f32.mrf.mxu1 }
 0x316   : > { %v675_v18 = vsel %vm497_vm1, %v663_v17, -1e+30 }
 0x317   : > { %v680_v21 = vsel %vm503_vm2, %v675_v18, -inf }
 0x318   : > { %684 = vmax.xlane.f32.xlu0 %v683_v19  ;;  %681 = vmax.xlane.f32.xlu1 %v680_v21 }
 0x39d   : > { %v679_v23 = vpop.xlane.xlu0 %678 }
 0x39e   : > { %v686_v24 = vsub.f32 %v674_v12, %v679_v23 }
 0x3a0   : > { %v689_v25 = vmul.f32 1.442695, %v686_v24 }
 0x3a1   : > { %v685_v26 = vpop.xlane.xlu0 %684  ;;  %v682_v27 = vpop.xlane.xlu1 %681 }
 0x3a2   : > { %1538 = vpow2.f32 %v689_v25  ;;  %v688_v28 = vsub.f32 %v676_v15, %v685_v26  ;;  %v687_v29 = vsub.f32 %v675_v18, %v682_v27 }
 0x3a4   : > { %v693_v30 = vmul.f32 1.442695, %v688_v28  ;;  %v691_v31 = vmul.f32 1.442695, %v687_v29 }
 0x3a6   : > { %1540 = vpow2.f32 %v693_v30 }
 0x3a7   : > { %1542 = vpow2.f32 %v691_v31 }
 0x3af   : > { %v1539_v32 = vpop.eup %1538 }
 0x3b0   : > { %v695_v33 = vsel %vm503_vm2, %v1539_v32, 0.0 }
 0x3b1   : > { %696 = vadd.xlane.f32.xlu0 %v695_v33 }
 0x3b3   : > { %v1541_v34 = vpop.eup %1540 }
 0x3b4   : > { %v1543_v35 = vpop.eup %1542  ;;  %v701_v36 = vsel %vm503_vm2, %v1541_v34, 0.0 }
 0x3b5   : > { %702 = vadd.xlane.f32.xlu1 %v701_v36  ;;  %v698_v37 = vsel %vm503_vm2, %v1543_v35, 0.0 }
 0x3b6   : > { %699 = vadd.xlane.f32.xlu0 %v698_v37 }
 0x3c6   : > { %712 = vrot.lane.b32.xlu1 %v1745_v49, %s1614_s27 }
 0x3ca   : > { %780 = vrot.lane.b32.xlu1 %v1706_v9, %s1615_s28 }
 0x3cc   : > { %714 = vrot.lane.b32.xlu0 %v1743_v48, %s1614_s27 }
 0x3ce   : > { %778 = vrot.lane.b32.xlu1 %v1708_v10, %s1615_s28 }
 0x3d0   : > { %774 = vrot.lane.b32.xlu0 %v1717_v16, %s1615_s28 }
 0x3d2   : > { %776 = vrot.lane.b32.xlu1 %v1723_v20, %s1615_s28 }
 0x43a   : > { %v697_v38 = vpop.xlane.xlu0 %696 }
 0x43b   : > { %1544 = vrcp.f32 %v697_v38 }
 0x43e   : > { %v703_v39 = vpop.xlane.xlu1 %702 }
 0x43f   : > { %v700_v40 = vpop.xlane.xlu0 %699  ;;  %1546 = vrcp.f32 %v703_v39 }
 0x440   : > { %1548 = vrcp.f32 %v700_v40 }
 0x442   : > { %v713_v41 = vpop.permute.xlu1 %712 }
 0x443   : > { %v715_v42 = vpop.permute.xlu0 %714 }
 0x444   : > { %v724_v43 = vsel %vm554_vm3, %v715_v42, 0  ;;  %1451 = vmatprep.subr.msk.bf16.mxu0 %vm554_vm3, %v715_v42 }
 0x445   : > { %1407 = vmatpush3.bf16.msra.mxu0 %v724_v43 }
 0x446   : > { %1408 = vmatprep.subr.bf16.mxu0 %v713_v41  ;;  %v781_v44 = vpop.permute.xlu1 %780 }
 0x447   : > { %v792_v55 = vsel %vm434_vm0, %v781_v44, 0  ;;  %v775_v56 = vpop.permute.xlu0 %774 }
 0x448   : > { %v1545_v45 = vpop.eup %1544 }
 0x449   : > { %1409 = vmatpush3.bf16.msra.mxu0 %v713_v41  ;;  %v707_v51 = vmul.f32 %v1545_v45, %v1539_v32 }
 0x44a   : > { %1452 = vmatprep.subr.msk.bf16.mxu0 %vm434_vm0, %v781_v44  ;;  %v779_v57 = vpop.permute.xlu1 %778 }
 0x44b   : > { %v789_v58 = vsel %vm434_vm0, %v779_v57, 0 }
 0x44c   : > { %v1547_v46 = vpop.eup %1546 }
 0x44d   : > { %v1549_v47 = vpop.eup %1548  ;;  %v709_v50 = vmul.f32 %v1547_v46, %v1541_v34 }
 0x44e   : > { %v708_v52 = vmul.f32 %v1549_v47, %v1543_v35  ;;  %v777_v59 = vpop.permute.xlu1 %776 }
 0x44f   : > { %v711_v53 = vpack.c.bf16 %v709_v50, %v709_v50 }
 0x450   : > { %v710_v54 = vpack.c.bf16 %v708_v52, %v707_v51 }
 0x452   : > { %1410 = vmatprep.mubr.msk.bf16.mxu0 %vm503_vm2, %v710_v54 }
 0x453   : > { %1411 = vmatmul.mubr.msk.bf16.vlgmr.msra.gmra.mxu0 %vm503_vm2, %v711_v53 }
 0x454   : > { %1415 = vmatpush3.bf16.xpose.msra.mxu0 %v792_v55  ;;  %1418 = vmatprep.mubr.msk.bf16.mxu0 %vm434_vm0, %v775_v56 }
 0x455   : > { %1453 = vmatprep.subr.msk.bf16.mxu0 %vm434_vm0, %v779_v57 }
 0x45c   : > { %1417 = vmatpush3.bf16.xpose.msra.mxu0 %v789_v58 }
 0x463   : > { %1419 = vmatmul.mubr.msk.bf16.vlgmr.msra.gmra.mxu0 %vm434_vm0, %v777_v59 }
 0x513   : > { %v1809_v60 = vpop.f32.mrf.mxu0 }
 0x515   : > { %v1811_v61 = vpop.f32.mrf.mxu0 }
 0x517   : > { %v1413_v62 = vpop.f32.mrf.mxu0 }
 0x519   : > { %v1813_v63 = vpop.f32.mrf.mxu0 }
 0x51a   : > { %v1507_v0 = vpack.i.bf16 %v1813_v63, %v1811_v61 }
 0x523   : > { %v1420_v1 = vpop.f32.mrf.mxu0 }
 0x524   : > { %v844_v11 = vsel %vm497_vm1, %v1420_v1, -1e+30 }
 0x525   : > { %v828_v2 = vpop.f32.mrf.mxu0  ;;  %v851_v14 = vsel %vm503_vm2, %v844_v11, -inf }
 0x526   : > { %v842_v3 = vsel %vm497_vm1, %v828_v2, -1e+30 }
 0x527   : > { %v1421_v6 = vpop.f32.mrf.mxu0  ;;  %v845_v8 = vsel %vm503_vm2, %v842_v3, -inf }
 0x528   : > { %846 = vmax.xlane.f32.xlu0 %v845_v8 }
 0x529   : > { %v831_v12 = vpop.f32.mrf.mxu0 }
 0x52a   : > { %v843_v13 = vsel %vm497_vm1, %v831_v12, -1e+30 }
 0x52b   : > { %v848_v15 = vsel %vm503_vm2, %v843_v13, -inf }
 0x52c   : > { %852 = vmax.xlane.f32.xlu0 %v851_v14  ;;  %849 = vmax.xlane.f32.xlu1 %v848_v15 }
 0x5b1   : > { %v847_v17 = vpop.xlane.xlu0 %846 }
 0x5b2   : > { %v854_v18 = vsub.f32 %v842_v3, %v847_v17 }
 0x5b4   : > { %v857_v19 = vmul.f32 1.442695, %v854_v18 }
 0x5b5   : > { %v853_v21 = vpop.xlane.xlu0 %852  ;;  %v850_v23 = vpop.xlane.xlu1 %849 }
 0x5b6   : > { %1550 = vpow2.f32 %v857_v19  ;;  %v856_v24 = vsub.f32 %v844_v11, %v853_v21  ;;  %v855_v25 = vsub.f32 %v843_v13, %v850_v23 }
 0x5b8   : > { %v861_v26 = vmul.f32 1.442695, %v856_v24  ;;  %v859_v27 = vmul.f32 1.442695, %v855_v25 }
 0x5ba   : > { %1552 = vpow2.f32 %v861_v26 }
 0x5bb   : > { %1554 = vpow2.f32 %v859_v27 }
 0x5c3   : > { %v1551_v28 = vpop.eup %1550 }
 0x5c4   : > { %v863_v29 = vsel %vm503_vm2, %v1551_v28, 0.0 }
 0x5c5   : > { %864 = vadd.xlane.f32.xlu0 %v863_v29 }
 0x5c7   : > { %v1553_v30 = vpop.eup %1552 }
 0x5c8   : > { %v1555_v31 = vpop.eup %1554  ;;  %v869_v32 = vsel %vm503_vm2, %v1553_v30, 0.0 }
 0x5c9   : > { %870 = vadd.xlane.f32.xlu1 %v869_v32  ;;  %v866_v33 = vsel %vm503_vm2, %v1555_v31, 0.0 }
 0x5ca   : > { %867 = vadd.xlane.f32.xlu0 %v866_v33 }
 0x5da   : > { %880 = vrot.lane.b32.xlu1 %v1745_v49, %s1615_s28 }
 0x5de   : > { %948 = vrot.lane.b32.xlu1 %v1706_v9, %s1616_s29 }
 0x5e0   : > { %882 = vrot.lane.b32.xlu0 %v1743_v48, %s1615_s28 }
 0x5e2   : > { %946 = vrot.lane.b32.xlu1 %v1708_v10, %s1616_s29 }
 0x5e4   : > { %942 = vrot.lane.b32.xlu0 %v1717_v16, %s1616_s29 }
 0x5e6   : > { %944 = vrot.lane.b32.xlu1 %v1723_v20, %s1616_s29 }
 0x64e   : > { %v865_v34 = vpop.xlane.xlu0 %864 }
 0x64f   : > { %1556 = vrcp.f32 %v865_v34 }
 0x652   : > { %v871_v35 = vpop.xlane.xlu1 %870 }
 0x653   : > { %v868_v36 = vpop.xlane.xlu0 %867  ;;  %1558 = vrcp.f32 %v871_v35 }
 0x654   : > { %1560 = vrcp.f32 %v868_v36 }
 0x656   : > { %v881_v37 = vpop.permute.xlu1 %880 }
 0x657   : > { %v883_v9 = vpop.permute.xlu0 %882 }
 0x658   : > { %v892_v38 = vsel %vm554_vm3, %v883_v9, 0  ;;  %1454 = vmatprep.subr.msk.bf16.mxu1 %vm554_vm3, %v883_v9 }
 0x659   : > { %1423 = vmatpush3.bf16.msra.mxu1 %v892_v38 }
 0x65a   : > { %1424 = vmatprep.subr.bf16.mxu1 %v881_v37  ;;  %v949_v10 = vpop.permute.xlu1 %948 }
 0x65b   : > { %v960_v45 = vsel %vm434_vm0, %v949_v10, 0  ;;  %v943_v46 = vpop.permute.xlu0 %942 }
 0x65c   : > { %v1557_v16 = vpop.eup %1556 }
 0x65d   : > { %1425 = vmatpush3.bf16.msra.mxu1 %v881_v37  ;;  %v875_v41 = vmul.f32 %v1557_v16, %v1551_v28 }
 0x65e   : > { %1455 = vmatprep.subr.msk.bf16.mxu1 %vm434_vm0, %v949_v10  ;;  %v947_v47 = vpop.permute.xlu1 %946 }
 0x65f   : > { %v957_v50 = vsel %vm434_vm0, %v947_v47, 0 }
 0x660   : > { %v1559_v20 = vpop.eup %1558 }
 0x661   : > { %v1561_v39 = vpop.eup %1560  ;;  %v877_v40 = vmul.f32 %v1559_v20, %v1553_v30 }
 0x662   : > { %v876_v42 = vmul.f32 %v1561_v39, %v1555_v31  ;;  %v945_v51 = vpop.permute.xlu1 %944 }
 0x663   : > { %v879_v43 = vpack.c.bf16 %v877_v40, %v877_v40 }
 0x664   : > { %v878_v44 = vpack.c.bf16 %v876_v42, %v875_v41 }
 0x666   : > { %1426 = vmatprep.mubr.msk.bf16.mxu1 %vm503_vm2, %v878_v44 }
 0x667   : > { %1427 = vmatmul.mubr.msk.bf16.vlgmr.msra.gmra.mxu1 %vm503_vm2, %v879_v43 }
 0x668   : > { %1431 = vmatpush3.bf16.xpose.msra.mxu1 %v960_v45  ;;  %1434 = vmatprep.mubr.msk.bf16.mxu1 %vm434_vm0, %v943_v46 }
 0x669   : > { %1456 = vmatprep.subr.msk.bf16.mxu1 %vm434_vm0, %v947_v47 }
 0x670   : > { %1433 = vmatpush3.bf16.xpose.msra.mxu1 %v957_v50 }
 0x677   : > { %1435 = vmatmul.mubr.msk.bf16.vlgmr.msra.gmra.mxu1 %vm434_vm0, %v945_v51 }
 0x727   : > { %v1428_v52 = vpop.f32.mrf.mxu1 }
 0x729   : > { %v928_v53 = vpop.f32.mrf.mxu1 }
 0x72b   : > { %v1429_v54 = vpop.f32.mrf.mxu1 }
 0x72d   : > { %v931_v55 = vpop.f32.mrf.mxu1 }
 0x72e   : > { %v1512_v56 = vpack.i.bf16 %v931_v55, %v928_v53 }
 0x737   : > { %v1436_v57 = vpop.f32.mrf.mxu1 }
 0x738   : > { %v1012_v2 = vsel %vm497_vm1, %v1436_v57, -1e+30 }
 0x739   : > { %v996_v58 = vpop.f32.mrf.mxu1  ;;  %v1019_v8 = vsel %vm503_vm2, %v1012_v2, -inf }
 0x73a   : > { %v1010_v59 = vsel %vm497_vm1, %v996_v58, -1e+30 }
 0x73b   : > { %v1437_v62 = vpop.f32.mrf.mxu1  ;;  %v1013_v1 = vsel %vm503_vm2, %v1010_v59, -inf }
 0x73c   : > { %1014 = vmax.xlane.f32.xlu0 %v1013_v1 }
 0x73d   : > { %v999_v3 = vpop.f32.mrf.mxu1 }
 0x73e   : > { %v1011_v6 = vsel %vm497_vm1, %v999_v3, -1e+30 }
 0x73f   : > { %v1016_v11 = vsel %vm503_vm2, %v1011_v6, -inf }
 0x740   : > { %1020 = vmax.xlane.f32.xlu0 %v1019_v8  ;;  %1017 = vmax.xlane.f32.xlu1 %v1016_v11 }
 0x7c5   : > { %v1015_v12 = vpop.xlane.xlu0 %1014 }
 0x7c6   : > { %v1022_v13 = vsub.f32 %v1010_v59, %v1015_v12 }
 0x7c8   : > { %v1025_v14 = vmul.f32 1.442695, %v1022_v13 }
 0x7c9   : > { %v1021_v15 = vpop.xlane.xlu0 %1020  ;;  %v1018_v17 = vpop.xlane.xlu1 %1017 }
 0x7ca   : > { %1562 = vpow2.f32 %v1025_v14  ;;  %v1024_v18 = vsub.f32 %v1012_v2, %v1021_v15  ;;  %v1023_v19 = vsub.f32 %v1011_v6, %v1018_v17 }
 0x7cc   : > { %v1029_v21 = vmul.f32 1.442695, %v1024_v18  ;;  %v1027_v23 = vmul.f32 1.442695, %v1023_v19 }
 0x7ce   : > { %1564 = vpow2.f32 %v1029_v21 }
 0x7cf   : > { %1566 = vpow2.f32 %v1027_v23 }
 0x7d7   : > { %v1563_v22 = vpop.eup %1562 }
 0x7d8   : > { %v1031_v24 = vsel %vm503_vm2, %v1563_v22, 0.0 }
 0x7d9   : > { %1032 = vadd.xlane.f32.xlu0 %v1031_v24 }
 0x7db   : > { %v1565_v25 = vpop.eup %1564 }
 0x7dc   : > { %v1567_v26 = vpop.eup %1566  ;;  %v1037_v27 = vsel %vm503_vm2, %v1565_v25, 0.0 }
 0x7dd   : > { %1038 = vadd.xlane.f32.xlu1 %v1037_v27  ;;  %v1034_v28 = vsel %vm503_vm2, %v1567_v26, 0.0 }
 0x7de   : > { %1035 = vadd.xlane.f32.xlu0 %v1034_v28 }
 0x7ee   : > { %1048 = vrot.lane.b32.xlu1 %v1745_v49, %s1616_s29 }
 0x7f2   : > { %1508 = vrot.lane.b32.xlu1 %v1507_v0, %s1616_s29 }
 0x7f4   : > { %1050 = vrot.lane.b32.xlu0 %v1743_v48, %s1616_s29 }
 0x7f6   : > { %1117 = vrot.lane.b32.xlu1 %v1809_v60, %s1616_s29 }
 0x7f8   : > { %1513 = vrot.lane.b32.xlu0 %v1512_v56, %s1615_s28 }
 0x7fa   : > { %1129 = vrot.lane.b32.xlu1 %v1428_v52, %s1615_s28 }
 0x862   : > { %v1033_v29 = vpop.xlane.xlu0 %1032 }
 0x863   : > { %1568 = vrcp.f32 %v1033_v29 }
 0x866   : > { %v1039_v30 = vpop.xlane.xlu1 %1038 }
 0x867   : > { %v1036_v31 = vpop.xlane.xlu0 %1035  ;;  %1570 = vrcp.f32 %v1039_v30 }
 0x868   : > { %1572 = vrcp.f32 %v1036_v31 }
 0x86a   : > { %v1049_v63 = vpop.permute.xlu1 %1048 }
 0x86b   : > { %v1051_v49 = vpop.permute.xlu0 %1050 }
 0x86c   : > { %v1060_v61 = vsel %vm554_vm3, %v1051_v49, 0  ;;  %1457 = vmatprep.subr.msk.bf16.mxu0 %vm554_vm3, %v1051_v49 }
 0x86d   : > { %1439 = vmatpush3.bf16.msra.mxu0 %v1060_v61 }
 0x86e   : > { %1440 = vmatprep.subr.bf16.mxu0 %v1049_v63  ;;  %v1509_v20 = vpop.permute.xlu1 %1508 }
 0x86f   : > { %v1514_v46 = vpop.permute.xlu0 %1513  ;;  %v1511_v47 = vunpack.i.h.bf16 %v1509_v20  ;;  %v1510_v50 = vunpack.i.l.bf16 %v1509_v20 }
 0x870   : > { %v1569_v48 = vpop.eup %1568  ;;  %v1516_v51 = vunpack.i.h.bf16 %v1514_v46  ;;  %v1515_v52 = vunpack.i.l.bf16 %v1514_v46 }
 0x871   : > { %1441 = vmatpush3.bf16.msra.mxu0 %v1049_v63  ;;  %v1043_v33 = vmul.f32 %v1569_v48, %v1563_v22  ;;  %v1146_v53 = vsel %vm434_vm0, %v1771_v5, %v1510_v50 }
 0x872   : > { %v1118_v39 = vpop.permute.xlu1 %1117  ;;  %v1150_v57 = vsel %vm1149_vm5, %v1146_v53, %v1515_v52 }
 0x873   : > { %v1148_v41 = vsel %vm434_vm0, %v1769_v4, %v1118_v39  ;;  %v1147_v4 = vsel %vm434_vm0, %v1773_v7, %v1511_v47 }
 0x874   : > { %v1571_v60 = vpop.eup %1570  ;;  %v1151_v58 = vsel %vm1149_vm5, %v1147_v4, %v1516_v51 }
 0x875   : > { %v1573_v0 = vpop.eup %1572  ;;  %v1045_v32 = vmul.f32 %v1571_v60, %v1565_v25 }
 0x876   : > { %v1044_v34 = vmul.f32 %v1573_v0, %v1567_v26  ;;  %v1130_v40 = vpop.permute.xlu1 %1129 }
 0x877   : > { %v1047_v35 = vpack.c.bf16 %v1045_v32, %v1045_v32  ;;  %v1152_v42 = vsel %vm1149_vm5, %v1148_v41, %v1130_v40 }
 0x878   : > { %v1046_v36 = vpack.c.bf16 %v1044_v34, %v1043_v33 }
 0x87a   : > { %1442 = vmatprep.mubr.msk.bf16.mxu0 %vm503_vm2, %v1046_v36 }
 0x87b   : > { %1443 = vmatmul.mubr.msk.bf16.vlgmr.msra.gmra.mxu0 %vm503_vm2, %v1047_v35 }
 0x93b   : > { %v1444_v37 = vpop.f32.mrf.mxu0 }
 0x93c   : > { %1141 = vrot.lane.b32.xlu1 %v1444_v37, %s1614_s27 }
 0x93d   : > { %v1096_v9 = vpop.f32.mrf.mxu0 }
 0x93f   : > { %v1445_v38 = vpop.f32.mrf.mxu0 }
 0x941   : > { %v1099_v10 = vpop.f32.mrf.mxu0 }
 0x942   : > { %v1517_v16 = vpack.i.bf16 %v1099_v10, %v1096_v9 }
 0x944   : > { %1518 = vrot.lane.b32.xlu0 %v1517_v16, %s1614_s27 }
 0x9ae   : > { %v1142_v43 = vpop.permute.xlu1 %1141 }
 0x9af   : > { %v1156_v44 = vsel %vm1153_vm4, %v1152_v42, %v1142_v43 }
 0x9b0   : > { %v1344_v45 = vpack.c.bf16 %v1156_v44, %v1156_v44 }
 0x9b2   : > { %1172 = vst [vmem:[%s403_s6 + $0x8] sm:$0xf] %v1344_v45 }
 0x9b6   : > { %v1519_v54 = vpop.permute.xlu0 %1518 }
 0x9b7   : > { %v1521_v55 = vunpack.i.h.bf16 %v1519_v54  ;;  %v1520_v56 = vunpack.i.l.bf16 %v1519_v54 }
 0x9b9   : > { %v1154_v59 = vsel %vm1153_vm4, %v1150_v57, %v1520_v56  ;;  %v1155_v62 = vsel %vm1153_vm4, %v1151_v58, %v1521_v55 }
 0x9ba   : > { %v1348_v1 = vpack.c.bf16 %v1155_v62, %v1154_v59 }
 0x9bc   : > { %1349 = vst [vmem:[%s403_s6] sm:$0xff] %v1348_v1  }
 0x9bd PF: > { %s13_s16 = sadd.s32 1, %s1612_s16   ;;  %s1918_s12 = smov %s1600_s13 }
 0x9be   : > { %p10_p10 = scmp.ge.s32.totalorder %s13_s16, 4   ;;  %s1919_s13 = smov %s1676_s21 }
 0x9bf   : > { %s1920_s14 = smov %s1608_s15  ;;  %s1921_s15 = smov %s1923_s17 }
 0x9c0   :  { %12 = sbr.rel (!%p10_p10) target bundleno = 3 (0x3), region = 206 }

// kernel: _lambda_.19
= control target key start
LH: loop header
LB: loop body
LE: loop exit
PB: predicated region body
PF: predicated region fallthrough
CT: control target
= control target key end

     0   :  { %s848_s1 = inlined_call_operand.vmem [shape: bf16[512,128], index: 1, kind: input, shape index: {}]   ;;  %s849_s0 = inlined_call_operand.vmem [shape: bf16[48,512], index: 0, kind: input, shape index: {}]   ;;  %s850_s2 = inlined_call_operand.vmem [shape: f32[1,128], index: 2, kind: input, shape index: {}]   ;;  %s851_s3 = inlined_call_operand.vmem [shape: f32[48,128], index: 3, kind: input, shape index: {}]   ;;  %s852_s4 = inlined_call_operand.vmem [shape: f32[48,128], index: 4, kind: output, shape index: {}]  }
   0x1   :  { %v602_v0 = vld [vmem:[%s848_s1 + $0x78] sm:$0xff]   ;;  %v606_v4 = vld [vmem:[%s848_s1 + $0x70] sm:$0xff]   ;;  %v610_v8 = vld [vmem:[%s848_s1 + $0x68] sm:$0xff]  }
   0x2   :  { %v603_v1 = vld [vmem:[%s848_s1 + $0xf8] sm:$0xff]   ;;  %534 = vmatprep.subr.bf16.mxu0 %v602_v0  ;;  %v607_v5 = vld [vmem:[%s848_s1 + $0xf0] sm:$0xff]   ;;  %v611_v9 = vld [vmem:[%s848_s1 + $0xe8] sm:$0xff]  }
   0x3   :  { %v604_v2 = vld [vmem:[%s848_s1 + $0x38] sm:$0xff]   ;;  %568 = vmatprep.subr.bf16.mxu1 %v603_v1  ;;  %v608_v6 = vld [vmem:[%s848_s1 + $0x30] sm:$0xff]   ;;  %v612_v10 = vld [vmem:[%s848_s1 + $0x28] sm:$0xff]  }
   0x4   :  { %v605_v3 = vld [vmem:[%s848_s1 + $0xb8] sm:$0xff]   ;;  %535 = vmatpush3.bf16.msra.mxu0 %v604_v2  ;;  %v609_v7 = vld [vmem:[%s848_s1 + $0xb0] sm:$0xff]   ;;  %v613_v11 = vld [vmem:[%s848_s1 + $0xa8] sm:$0xff]  }
   0x5   :  { %569 = vmatpush3.bf16.msra.mxu1 %v605_v3  ;;  %536 = vmatprep.subr.bf16.mxu0 %v606_v4  ;;  %v614_v12 = vld [vmem:[%s848_s1 + $0x60] sm:$0xff]   ;;  %v618_v16 = vld [vmem:[%s848_s1 + $0x58] sm:$0xff]   ;;  %v622_v20 = vld [vmem:[%s848_s1 + $0x50] sm:$0xff]  }
   0x6   :  { %570 = vmatprep.subr.bf16.mxu1 %v607_v5  ;;  %v615_v13 = vld [vmem:[%s848_s1 + $0xe0] sm:$0xff]   ;;  %v619_v17 = vld [vmem:[%s848_s1 + $0xd8] sm:$0xff]   ;;  %v623_v21 = vld [vmem:[%s848_s1 + $0xd0] sm:$0xff]  }
   0x7   :  { %v616_v14 = vld [vmem:[%s848_s1 + $0x20] sm:$0xff]   ;;  %v620_v18 = vld [vmem:[%s848_s1 + $0x18] sm:$0xff]   ;;  %v624_v22 = vld [vmem:[%s848_s1 + $0x10] sm:$0xff]  }
   0x8   :  { %537 = vmatpush3.bf16.msra.mxu0 %v608_v6  ;;  %v617_v15 = vld [vmem:[%s848_s1 + $0xa0] sm:$0xff]   ;;  %v621_v19 = vld [vmem:[%s848_s1 + $0x98] sm:$0xff]   ;;  %v625_v23 = vld [vmem:[%s848_s1 + $0x90] sm:$0xff]  }
   0x9   :  { %571 = vmatpush3.bf16.msra.mxu1 %v609_v7  ;;  %538 = vmatprep.subr.bf16.mxu0 %v610_v8  ;;  %v626_v24 = vld [vmem:[%s848_s1 + $0x48] sm:$0xff]   ;;  %v630_v28 = vld [vmem:[%s848_s1 + $0x40] sm:$0xff]  }
   0xa   :  { %572 = vmatprep.subr.bf16.mxu1 %v611_v9  ;;  %v627_v25 = vld [vmem:[%s848_s1 + $0xc8] sm:$0xff]   ;;  %v631_v29 = vld [vmem:[%s848_s1 + $0xc0] sm:$0xff]  }
   0xb   :  { %v628_v26 = vld [vmem:[%s848_s1 + $0x8] sm:$0xff]   ;;  %v632_v30 = vld [vmem:[%s848_s1] sm:$0xff]  }
   0xc   :  { %539 = vmatpush3.bf16.msra.mxu0 %v612_v10  ;;  %v629_v27 = vld [vmem:[%s848_s1 + $0x88] sm:$0xff]   ;;  %v633_v31 = vld [vmem:[%s848_s1 + $0x80] sm:$0xff]   ;;  %v469_v10 = vld [vmem:[%s851_s3 + $0x10] sm:$0xff] }
   0xd   :  { %573 = vmatpush3.bf16.msra.mxu1 %v613_v11  ;;  %540 = vmatprep.subr.bf16.mxu0 %v614_v12  ;;  %v634_v32 = vld [vmem:[%s849_s0] ss:$16 sps:$4 sm:$0xff]   ;;  %v636_v33 = vld [vmem:[%s849_s0 + $0x4] ss:$16 sps:$4 sm:$0xff]   ;;  %v637_v34 = vld [vmem:[%s849_s0 + $0x8] ss:$16 sps:$4 sm:$0xff]  }
   0xe   :  { %574 = vmatprep.subr.bf16.mxu1 %v615_v13  ;;  %v639_v35 = vld [vmem:[%s849_s0 + $0xc] ss:$16 sps:$4 sm:$0xff]   ;;  %385 = vmatprep.mubr.bf16.mxu0 %v636_v33  ;;  %v640_v36 = vld [vmem:[%s849_s0 + $0x24] ss:$16 sps:$4 sm:$0xff]   ;;  %v644_v38 = vld [vmem:[%s849_s0 + $0x20] ss:$16 sps:$4 sm:$0xff]  }
   0xf   :  { %442 = vmatprep.mubr.bf16.mxu1 %v639_v35  ;;  %v642_v37 = vld [vmem:[%s849_s0 + $0x2c] ss:$16 sps:$4 sm:$0xff]   ;;  %v645_v39 = vld [vmem:[%s849_s0 + $0x28] ss:$16 sps:$4 sm:$0xff]   ;;  %v646_v40 = vld [vmem:[%s849_s0 + $0x44] ss:$16 sps:$4 sm:$0xff]  }
  0x10   :  { %541 = vmatpush3.bf16.msra.mxu0 %v616_v14  ;;  %v648_v41 = vld [vmem:[%s849_s0 + $0x4c] ss:$16 sps:$4 sm:$0xff]   ;;  %v650_v42 = vld [vmem:[%s849_s0 + $0x40] ss:$16 sps:$4 sm:$0xff]   ;;  %v651_v43 = vld [vmem:[%s849_s0 + $0x48] ss:$16 sps:$4 sm:$0xff]  }
  0x11   :  { %575 = vmatpush3.bf16.msra.mxu1 %v617_v15  ;;  %542 = vmatprep.subr.bf16.mxu0 %v618_v16  ;;  %v489_v46 = vld [vmem:[%s850_s2] ss:$0 sm:$0xff]  ;;  %v468_v0 = vld [vmem:[%s851_s3 + $0x8] sm:$0xff] }
  0x12   :  { %576 = vmatprep.subr.bf16.mxu1 %v619_v17  ;;  %v467_v54 = vld [vmem:[%s851_s3] sm:$0xff] }
  0x14   :  { %543 = vmatpush3.bf16.msra.mxu0 %v620_v18 }
  0x15   :  { %577 = vmatpush3.bf16.msra.mxu1 %v621_v19  ;;  %544 = vmatprep.subr.bf16.mxu0 %v622_v20  ;;  %v470_v20 = vld [vmem:[%s851_s3 + $0x18] sm:$0xff] }
  0x16   :  { %578 = vmatprep.subr.bf16.mxu1 %v623_v21 }
  0x18   :  { %545 = vmatpush3.bf16.msra.mxu0 %v624_v22 }
  0x19   :  { %579 = vmatpush3.bf16.msra.mxu1 %v625_v23  ;;  %546 = vmatprep.subr.bf16.mxu0 %v626_v24 }
  0x1a   :  { %580 = vmatprep.subr.bf16.mxu1 %v627_v25 }
  0x1c   :  { %547 = vmatpush3.bf16.msra.mxu0 %v628_v26 }
  0x1d   :  { %581 = vmatpush3.bf16.msra.mxu1 %v629_v27  ;;  %548 = vmatprep.subr.bf16.mxu0 %v630_v28 }
  0x1e   :  { %582 = vmatprep.subr.bf16.mxu1 %v631_v29 }
  0x20   :  { %549 = vmatpush3.bf16.msra.mxu0 %v632_v30  ;;  %v471_v30 = vld [vmem:[%s851_s3 + $0x20] sm:$0xff] }
  0x21   :  { %583 = vmatpush3.bf16.msra.mxu1 %v633_v31 }
  0x23   :  { %386 = vmatmul.mubr.bf16.vlgmr.msra.gmra.mxu0 %v634_v32 }
  0x24   :  { %443 = vmatmul.mubr.bf16.vlgmr.msra.gmra.mxu1 %v637_v34  ;;  %393 = vmatprep.mubr.bf16.mxu0 %v640_v36 }
  0x25   :  { %450 = vmatprep.mubr.bf16.mxu1 %v642_v37 }
  0x2b   :  { %394 = vmatmul.mubr.bf16.gmra.mxu0 %v644_v38  ;;  %v472_v38 = vld [vmem:[%s851_s3 + $0x28] sm:$0xff] }
  0x2c   :  { %451 = vmatmul.mubr.bf16.gmra.mxu1 %v645_v39  ;;  %401 = vmatprep.mubr.bf16.mxu0 %v646_v40 }
  0x2d   :  { %458 = vmatprep.mubr.bf16.mxu1 %v648_v41 }
  0x33   :  { %402 = vmatmul.mubr.bf16.gmra.mxu0 %v650_v42 }
  0x34   :  { %459 = vmatmul.mubr.bf16.gmra.mxu1 %v651_v43 }
  0xe3   :  { %v550_v44 = vpop.f32.mrf.mxu0 }
  0xe4   :  { %v584_v45 = vpop.f32.mrf.mxu1 }
  0xe5   :  { %v551_v47 = vpop.f32.mrf.mxu0 }
  0xe6   :  { %v552_v48 = vadd.f32 %v551_v47, %v550_v44  ;;  %v585_v49 = vpop.f32.mrf.mxu1 }
  0xe7   :  { %v553_v50 = vpop.f32.mrf.mxu0  ;;  %v586_v52 = vadd.f32 %v585_v49, %v584_v45 }
  0xe8   :  { %v388_v51 = vadd.f32 %v552_v48, %v489_v46  ;;  %v587_v53 = vpop.f32.mrf.mxu1 }
  0xe9   :  { %v554_v55 = vpop.f32.mrf.mxu0 }
  0xea   :  { %v445_v56 = vadd.f32 %v586_v52, %v388_v51  ;;  %v555_v57 = vadd.f32 %v554_v55, %v553_v50  ;;  %v588_v58 = vpop.f32.mrf.mxu1 }
  0xeb   :  { %v556_v59 = vpop.f32.mrf.mxu0  ;;  %v589_v62 = vadd.f32 %v588_v58, %v587_v53 }
  0xec   :  { %v473_v60 = vadd.f32 %v467_v54, %v445_v56  ;;  %v391_v61 = vadd.f32 %v555_v57, %v489_v46  ;;  %v590_v63 = vpop.f32.mrf.mxu1 }
  0xed   :  { %v557_v1 = vpop.f32.mrf.mxu0 }
  0xee   :  { %479 = vst [vmem:[%s852_s4] sm:$0xff] %v473_v60  ;;  %v448_v2 = vadd.f32 %v589_v62, %v391_v61  ;;  %v558_v3 = vadd.f32 %v557_v1, %v556_v59  ;;  %v591_v4 = vpop.f32.mrf.mxu1 }
  0xef   :  { %v559_v5 = vpop.f32.mrf.mxu0  ;;  %v592_v8 = vadd.f32 %v591_v4, %v590_v63 }
  0xf0   :  { %v474_v6 = vadd.f32 %v468_v0, %v448_v2  ;;  %v396_v7 = vadd.f32 %v558_v3, %v489_v46  ;;  %v593_v9 = vpop.f32.mrf.mxu1 }
  0xf1   :  { %v560_v11 = vpop.f32.mrf.mxu0 }
  0xf2   :  { %480 = vst [vmem:[%s852_s4 + $0x8] sm:$0xff] %v474_v6  ;;  %v453_v12 = vadd.f32 %v592_v8, %v396_v7  ;;  %v561_v13 = vadd.f32 %v560_v11, %v559_v5  ;;  %v594_v14 = vpop.f32.mrf.mxu1 }
  0xf3   :  { %v562_v15 = vpop.f32.mrf.mxu0  ;;  %v595_v18 = vadd.f32 %v594_v14, %v593_v9 }
  0xf4   :  { %v475_v16 = vadd.f32 %v469_v10, %v453_v12  ;;  %v399_v17 = vadd.f32 %v561_v13, %v489_v46  ;;  %v596_v19 = vpop.f32.mrf.mxu1 }
  0xf5   :  { %v563_v21 = vpop.f32.mrf.mxu0 }
  0xf6   :  { %481 = vst [vmem:[%s852_s4 + $0x10] sm:$0xff] %v475_v16  ;;  %v456_v22 = vadd.f32 %v595_v18, %v399_v17  ;;  %v564_v23 = vadd.f32 %v563_v21, %v562_v15  ;;  %v597_v24 = vpop.f32.mrf.mxu1 }
  0xf7   :  { %v565_v25 = vpop.f32.mrf.mxu0  ;;  %v598_v28 = vadd.f32 %v597_v24, %v596_v19 }
  0xf8   :  { %v476_v26 = vadd.f32 %v470_v20, %v456_v22  ;;  %v404_v27 = vadd.f32 %v564_v23, %v489_v46  ;;  %v599_v29 = vpop.f32.mrf.mxu1 }
  0xf9   :  { %v566_v31 = vpop.f32.mrf.mxu0 }
  0xfa   :  { %482 = vst [vmem:[%s852_s4 + $0x18] sm:$0xff] %v476_v26  ;;  %v461_v32 = vadd.f32 %v598_v28, %v404_v27  ;;  %v567_v33 = vadd.f32 %v566_v31, %v565_v25  ;;  %v600_v34 = vpop.f32.mrf.mxu1 }
  0xfb   :  { %v601_v37 = vadd.f32 %v600_v34, %v599_v29 }
  0xfc   :  { %v477_v35 = vadd.f32 %v471_v30, %v461_v32  ;;  %v407_v36 = vadd.f32 %v567_v33, %v489_v46 }
  0xfe   :  { %483 = vst [vmem:[%s852_s4 + $0x20] sm:$0xff] %v477_v35  ;;  %v464_v39 = vadd.f32 %v601_v37, %v407_v36 }
 0x100   :  { %v478_v40 = vadd.f32 %v472_v38, %v464_v39 }
 0x102   :  { %484 = vst [vmem:[%s852_s4 + $0x28] sm:$0xff] %v478_v40 }

// kernel: _lambda_.25
= control target key start
LH: loop header
LB: loop body
LE: loop exit
PB: predicated region body
PF: predicated region fallthrough
CT: control target
= control target key end

     0   :  { %vm24_vm0 = vcmask 1041408   ;;  %s316_s0 = inlined_call_operand.vmem [shape: f32[2,128], index: 0, kind: input, shape index: {}]   ;;  %s317_s1 = inlined_call_operand.vmem [shape: f32[1,128], index: 1, kind: input, shape index: {}]   ;;  %s318_s2 = inlined_call_operand.vmem [shape: f32[1,128], index: 2, kind: input, shape index: {}]   ;;  %s319_s3 = inlined_call_operand.vmem [shape: bf16[128,64], index: 3, kind: input, shape index: {}]   ;;  %s320_s4 = inlined_call_operand.hbm [shape: f32[2,64], index: 4, kind: output, shape index: {}]  }
   0x1   :  { %v23_v0 = vld [vmem:[%s316_s0] sm:$0x3] }
   0x2   :  { %v25_v1 = vsel %vm24_vm0, %v23_v0, 0.0 }
   0x3   :  { %26 = vadd.xlane.f32.xlu0 %v25_v1 }
   0x4   :  { %9 = vsyncpa [#allocation4], 0  ;;  %v220_v7 = vld [vmem:[%s319_s3 + $0x38] sm:$0xff]   ;;  %v252_v8 = vmov 0.0   ;;  %v221_v9 = vld [vmem:[%s319_s3 + $0x30] sm:$0xff]   ;;  %vm253_vm1 = vmmov 0  }
   0x5   :  { %197 = vmatprep.subr.bf16.mxu0 %v252_v8  ;;  %v222_v10 = vld [vmem:[%s319_s3 + $0x28] sm:$0xff]   ;;  %v223_v11 = vld [vmem:[%s319_s3 + $0x20] sm:$0xff]   ;;  %v224_v12 = vld [vmem:[%s319_s3 + $0x18] sm:$0xff]   ;;  %213 = vmatprep.mubr.msk.bf16.mxu0 %vm253_vm1, %v252_v8  ;;  %vm162_vm2 = vcmask 517120  }
   0x6   :  { %198 = vmatpush3.bf16.msra.mxu0 %v220_v7  ;;  %v225_v13 = vld [vmem:[%s319_s3 + $0x10] sm:$0xff]   ;;  %v226_v14 = vld [vmem:[%s319_s3 + $0x8] sm:$0xff]   ;;  %v227_v15 = vld [vmem:[%s319_s3] sm:$0xff]   ;;  %s254_s3 = smov [#allocation3]  }
   0x7   :  { %199 = vmatprep.subr.bf16.mxu0 %v252_v8  ;;  %v178_v20 = vld [vmem:[%s317_s1] ss:$0 sm:$0xff]  ;;  %s170_s10 = sshll.u32 %s254_s3, 4  ;;  %s171_s10 = int_to_ptr.vmem [resolvable:$true] %s170_s10 }
   0x8   :  { %v179_v22 = vld [vmem:[%s318_s2] ss:$0 sm:$0xff]  ;;  %s230_s11 = scalar_lea.vmem %s171_s10, 32  ;;  %p235_p1 = scmp.lt.s32.totalorder %s171_s10, %s171_s10 }
   0x9   :  { %p231_p0 = scmp.ne.s32.totalorder %s171_s10, %s230_s11  ;;  %p236_p2 = scmp.lt.s32.totalorder %s230_s11, %s230_s11 }
   0xa   :  { %200 = vmatpush3.bf16.msra.mxu0 %v221_v9 }
   0xb   :  { %201 = vmatprep.subr.bf16.mxu0 %v252_v8  ;;  %p237_p3 = por %p236_p2, %p235_p1 }
   0xd   :  { %p238_p4 = pnand %p237_p3, %p231_p0 }
   0xe   :  { %202 = vmatpush3.bf16.msra.mxu0 %v222_v10 }
   0xf   :  { %203 = vmatprep.subr.bf16.mxu0 %v252_v8 }
  0x12   :  { %204 = vmatpush3.bf16.msra.mxu0 %v223_v11 }
  0x13   :  { %205 = vmatprep.subr.bf16.mxu0 %v252_v8 }
  0x16   :  { %206 = vmatpush3.bf16.msra.mxu0 %v224_v12 }
  0x17   :  { %207 = vmatprep.subr.bf16.mxu0 %v252_v8 }
  0x1a   :  { %208 = vmatpush3.bf16.msra.mxu0 %v225_v13 }
  0x1b   :  { %209 = vmatprep.subr.bf16.mxu0 %v252_v8 }
  0x1e   :  { %210 = vmatpush3.bf16.msra.mxu0 %v226_v14 }
  0x1f   :  { %211 = vmatprep.subr.bf16.mxu0 %v252_v8 }
  0x22   :  { %212 = vmatpush3.bf16.msra.mxu0 %v227_v15 }
  0x8c   :  { %v27_v2 = vpop.xlane.xlu0 %26 }
  0x8d   :  { %v29_v3 = vmul.f32 0.0078125, %v27_v2 }
  0x8f   :  { %v30_v4 = vsub.f32 %v23_v0, %v29_v3 }
  0x91   :  { %v31_v5 = vmul.f32 %v30_v4, %v30_v4 }
  0x93   :  { %v32_v6 = vsel %vm24_vm0, %v31_v5, 0.0 }
  0x94   :  { %33 = vadd.xlane.f32.xlu0 %v32_v6 }
 0x11d   :  { %v34_v16 = vpop.xlane.xlu0 %33 }
 0x11e   :  { %v35_v17 = vmul.f32 0.0078125, %v34_v16 }
 0x120   :  { %v36_v18 = vadd.f32 1e-05, %v35_v17 }
 0x122   :  { %228 = vrsqrt.f32 %v36_v18 }
 0x12f   :  { %v229_v19 = vpop.eup %228 }
 0x130   :  { %v38_v21 = vmul.f32 %v229_v19, %v30_v4 }
 0x132   :  { %v46_v23 = vmul.f32 %v178_v20, %v38_v21 }
 0x134   :  { %v54_v24 = vadd.f32 %v179_v22, %v46_v23 }
 0x136   :  { %v55_v25 = vpack.c.bf16 %v54_v24, %v54_v24 }
 0x138   :  { %56 = vst [vmem:[#allocation2] sm:$0x1] %v55_v25 }
 0x13f   :  { %v57_v26 = vld [vmem:[#allocation2] sm:$0x1] }
 0x140   :  { %214 = vmatmul.mubr.bf16.vlgmr.msra.gmra.mxu0 %v57_v26 }
 0x200   :  { %v156_v27 = vpop.f32.mrf.mxu0 }
 0x201   :  { %163 = vst.msk [vmem:[#allocation3] sm:$0x3] %vm162_vm2, %v156_v27 }
 0x202   :  { %v215_v28 = vpop.f32.mrf.mxu0 }
 0x203   :  { %241 = shalt.err (!%p238_p4)
}
 0x204   :  { %173 = dma.vmem_to_hbm [thread:$0]  %s171_s10, 32, %s320_s4, [#allocation4]   ;;  %v159_v29 = vpop.f32.mrf.mxu0 }
 0x206   :  { %v216_v30 = vpop.f32.mrf.mxu0 }
 0x207   :  { %250 = dma.done.wait [#allocation4], 32  }
 0x208   :  { %251 = vsyncadd [#allocation4], 4294967264 }
 0x209   :  { %177 = vsyncpa [#allocation4], 1 }

// kernel: _lambda_.18
= control target key start
LH: loop header
LB: loop body
LE: loop exit
PB: predicated region body
PF: predicated region fallthrough
CT: control target
= control target key end

     0   :  { %s1306_s18 = smov 0   ;;  %s1308_s19 = smov 0   ;;  %s1513_s0 = inlined_call_operand.vmem [shape: f32[48,128], index: 0, kind: input, shape index: {}]   ;;  %s1514_s1 = inlined_call_operand.vmem [shape: f32[1,128], index: 1, kind: input, shape index: {}]   ;;  %s1515_s2 = inlined_call_operand.vmem [shape: f32[1,128], index: 2, kind: input, shape index: {}]   ;;  %s1516_s3 = inlined_call_operand.vmem [shape: bf16[128,512], index: 3, kind: input, shape index: {}]   ;;  %s1517_s4 = inlined_call_operand.vmem [shape: f32[1,512], index: 4, kind: input, shape index: {}]   ;;  %s1518_s5 = inlined_call_operand.vmem [shape: bf16[48,512], index: 5, kind: output, shape index: {}]  }
   0x1   :  { %s1310_s20 = smov 0   ;;  %s1312_s21 = smov 0  }
   0x2   :  { %s1314_s22 = smov 0  }
   0x3 LB: > { %s24_s23 = sadd.s32 1, %s1269_s21  ;;  %s998_s24 = sadd.s32 4294967295, %s1273_s22   ;;  %s1273_s22 = sphi %s1314_s22, %s15_s22   ;;  %s1269_s21 = sphi %s1312_s21, %s1523_s21   ;;  %s1265_s20 = sphi %s1310_s20, %s1522_s20   ;;  %s1261_s19 = sphi %s1308_s19, %s1521_s19   ;;  %s1257_s18 = sphi %s1306_s18, %s1520_s18  }
   0x4   : > { %p25_p0 = scmp.ge.s32.totalorder %s24_s23, 2  ;;  %p109_p1 = scmp.ne.s32.totalorder %s1261_s19, %s1257_s18 }
   0x5   : > { %p110_p2 = scmp.eq.s32.totalorder %s1273_s22, 0  ;;  %p167_p4 = scmp.eq.s32.totalorder %s998_s24, 1 }
   0x6   : > { %s1525_s23 = smov (%p25_p0, %s24_s23), 0  ;;  %s102_s26 = sadd.s32 1, %s1261_s19 }
   0x7   : > { %p111_p3 = por %p110_p2, %p109_p1  ;;  %s99_s25 = ssub.s32 %s1269_s21, %s1525_s23 }
   0x8   : > { %p100_p5 = scmp.eq.s32.totalorder %s99_s25, 0  ;;  %p1341_p6 = por %p167_p4, %p109_p1 }
   0x9   : > { %p1002_p7 = scmp.ge.s32.totalorder %s1273_s22, 2 }
   0xa   : > { %s1346_s28 = scalar_select %p100_p5, %s1261_s19, %s102_s26  }
   0xb   : > { %204 = sbr.rel (%p1002_p7) target bundleno = 28 (0x1c), region = 28 }
  0x10   : > { %207 = sbr.rel (!%p111_p3) target bundleno = 28 (0x1c), region = 32  ;;  %s209_s29 = sand.u32 (%p111_p3), 1, %s1261_s19  }
  0x11   : > { %s1059_s30 = sshll.u32 (%p111_p3), %s1269_s21, 3  ;;  %s1003_s6 = sshll.u32 (%p111_p3), %s209_s29, 7 }
  0x12   : > { %s1354_s9 = scalar_lea.vmem (%p111_p3), %s1516_s3, %s1059_s30  ;;  %s211_s10 = scalar_lea.vmem (%p111_p3), [#allocation3], %s1003_s6 }
  0x13   : > { %v273_v0 = vld [vmem:[%s1354_s9] sm:$0xff] (%p111_p3)  ;;  %v275_v1 = vld [vmem:[%s1354_s9 + $0x10] sm:$0xff] (%p111_p3) }
  0x14   : > { %v277_v2 = vld [vmem:[%s1354_s9 + $0x20] sm:$0xff] (%p111_p3)  ;;  %274 = vst [vmem:[%s211_s10] sm:$0xff] (%p111_p3), %v273_v0  ;;  %276 = vst [vmem:[%s211_s10 + $0x8] sm:$0xff] (%p111_p3), %v275_v1  ;;  %v279_v3 = vld [vmem:[%s1354_s9 + $0x30] sm:$0xff] (%p111_p3) }
  0x15   : > { %278 = vst [vmem:[%s211_s10 + $0x10] sm:$0xff] %v277_v2  ;;  %v281_v4 = vld [vmem:[%s1354_s9 + $0x40] sm:$0xff]  ;;  %v283_v5 = vld [vmem:[%s1354_s9 + $0x50] sm:$0xff]  ;;  %280 = vst [vmem:[%s211_s10 + $0x18] sm:$0xff] %v279_v3 }
  0x16   : > { %282 = vst [vmem:[%s211_s10 + $0x20] sm:$0xff] %v281_v4  ;;  %284 = vst [vmem:[%s211_s10 + $0x28] sm:$0xff] %v283_v5  ;;  %v285_v6 = vld [vmem:[%s1354_s9 + $0x60] sm:$0xff]  ;;  %v287_v7 = vld [vmem:[%s1354_s9 + $0x70] sm:$0xff] }
  0x17   : > { %v289_v8 = vld [vmem:[%s1354_s9 + $0x80] sm:$0xff]  ;;  %286 = vst [vmem:[%s211_s10 + $0x30] sm:$0xff] %v285_v6  ;;  %288 = vst [vmem:[%s211_s10 + $0x38] sm:$0xff] %v287_v7  ;;  %v291_v9 = vld [vmem:[%s1354_s9 + $0x90] sm:$0xff] }
  0x18   : > { %290 = vst [vmem:[%s211_s10 + $0x40] sm:$0xff] %v289_v8  ;;  %v293_v10 = vld [vmem:[%s1354_s9 + $0xa0] sm:$0xff]  ;;  %v295_v11 = vld [vmem:[%s1354_s9 + $0xb0] sm:$0xff]  ;;  %292 = vst [vmem:[%s211_s10 + $0x48] sm:$0xff] %v291_v9 }
  0x19   : > { %294 = vst [vmem:[%s211_s10 + $0x50] sm:$0xff] %v293_v10  ;;  %296 = vst [vmem:[%s211_s10 + $0x58] sm:$0xff] %v295_v11  ;;  %v297_v12 = vld [vmem:[%s1354_s9 + $0xc0] sm:$0xff]  ;;  %v299_v13 = vld [vmem:[%s1354_s9 + $0xd0] sm:$0xff] }
  0x1a   : > { %v301_v14 = vld [vmem:[%s1354_s9 + $0xe0] sm:$0xff]  ;;  %298 = vst [vmem:[%s211_s10 + $0x60] sm:$0xff] %v297_v12  ;;  %300 = vst [vmem:[%s211_s10 + $0x68] sm:$0xff] %v299_v13  ;;  %v303_v15 = vld [vmem:[%s1354_s9 + $0xf0] sm:$0xff] }
  0x1b   : > { %302 = vst [vmem:[%s211_s10 + $0x70] sm:$0xff] %v301_v14  ;;  %304 = vst [vmem:[%s211_s10 + $0x78] sm:$0xff] %v303_v15 }
  0x1c PF: > { %p1006_p8 = scmp.ge.s32.totalorder %s1273_s22, 1  ;;  %p317_p9 = scmp.lt.s32.totalorder %s1273_s22, 3 }
  0x1e   : > { %p318_p10 = pnand %p1006_p8, %p317_p9 }
  0x1f   : > { %s324_s11 = sand.u32 (!%p318_p10), 1, %s1257_s18   ;;  %s1008_s12 = sshll.u32 (!%p318_p10), %s1265_s20, 1 }
  0x20   : > { %321 = sbr.rel (%p318_p10) target bundleno = 654 (0x28e), region = 74  ;;  %s1007_s13 = sshll.u32 (!%p318_p10), %s324_s11, 7 }
  0x21   : > { %s1106_s14 = smul.u32 (!%p318_p10), 48, %s324_s11  ;;  %p367_p11 = scmp.lt.s32.totalorder (!%p318_p10), %s1008_s12, 3 }
  0x22   : > { %s1382_s24 = scalar_lea.vmem (!%p318_p10), [#allocation3], %s1007_s13  ;;  %p1009_p12 = scmp.ne.s32.totalorder (!%p318_p10), %s1265_s20, 0 }
  0x23   : > { %s1384_s25 = scalar_lea.vmem (!%p318_p10), [#allocation4], %s1106_s14 }
  0x25   : > { %s1527_s12 = smov (!%p367_p11, %s1008_s12), 3  ;;  %377 = sbr.rel (%p1009_p12) target bundleno = 364 (0x16c), region = 82 }
  0x26   : > { %s369_s17 = scalar_lea.vmem %s1517_s4, %s1527_s12 }
  0x2a   : > { %v378_v16 = vld [vmem:[%s1513_s0] sm:$0xff]  ;;  %v380_v17 = vld [vmem:[%s1513_s0 + $0x10] sm:$0xff]  ;;  %v379_v18 = vld [vmem:[%s1513_s0 + $0x8] sm:$0xff] }
  0x2b   : > { %384 = vadd.xlane.f32.xlu0 %v378_v16  ;;  %388 = vadd.xlane.f32.xlu1 %v380_v17  ;;  %v381_v19 = vld [vmem:[%s1513_s0 + $0x18] sm:$0xff]  ;;  %v382_v20 = vld [vmem:[%s1513_s0 + $0x20] sm:$0xff]  ;;  %v383_v21 = vld [vmem:[%s1513_s0 + $0x28] sm:$0xff] }
  0x2c   : > { %v1010_v2 = vld [vmem:[%s1514_s1] ss:$0 sm:$0xff] }
  0x2d   : > { %v1011_v7 = vld [vmem:[%s1515_s2] ss:$0 sm:$0xff] }
  0x2f   : > { %386 = vadd.xlane.f32.xlu0 %v379_v18  ;;  %390 = vadd.xlane.f32.xlu1 %v381_v19 }
  0x33   : > { %392 = vadd.xlane.f32.xlu0 %v382_v20  ;;  %394 = vadd.xlane.f32.xlu1 %v383_v21 }
  0xb4   : > { %v385_v22 = vpop.xlane.xlu0 %384  ;;  %v389_v23 = vpop.xlane.xlu1 %388 }
  0xb5   : > { %v397_v24 = vmul.f32 0.0078125, %v385_v22  ;;  %v399_v25 = vmul.f32 0.0078125, %v389_v23 }
  0xb7   : > { %v403_v26 = vsub.f32 %v378_v16, %v397_v24  ;;  %v405_v27 = vsub.f32 %v380_v17, %v399_v25 }
  0xb8   : > { %v387_v28 = vpop.xlane.xlu0 %386  ;;  %v391_v29 = vpop.xlane.xlu1 %390 }
  0xb9   : > { %v398_v30 = vmul.f32 0.0078125, %v387_v28  ;;  %v409_v31 = vmul.f32 %v403_v26, %v403_v26  ;;  %v400_v32 = vmul.f32 0.0078125, %v391_v29  ;;  %v411_v35 = vmul.f32 %v405_v27, %v405_v27 }
  0xbb   : > { %v404_v33 = vsub.f32 %v379_v18, %v398_v30  ;;  %415 = vadd.xlane.f32.xlu0 %v409_v31  ;;  %v406_v34 = vsub.f32 %v381_v19, %v400_v32 }
  0xbc   : > { %v393_v36 = vpop.xlane.xlu0 %392  ;;  %v395_v37 = vpop.xlane.xlu1 %394 }
  0xbd   : > { %v401_v38 = vmul.f32 0.0078125, %v393_v36  ;;  %v410_v39 = vmul.f32 %v404_v33, %v404_v33  ;;  %v402_v40 = vmul.f32 0.0078125, %v395_v37  ;;  %v412_v43 = vmul.f32 %v406_v34, %v406_v34 }
  0xbf   : > { %v407_v41 = vsub.f32 %v382_v20, %v401_v38  ;;  %419 = vadd.xlane.f32.xlu0 %v411_v35  ;;  %417 = vadd.xlane.f32.xlu1 %v410_v39  ;;  %v408_v42 = vsub.f32 %v383_v21, %v402_v40 }
  0xc1   : > { %v413_v44 = vmul.f32 %v407_v41, %v407_v41  ;;  %v414_v45 = vmul.f32 %v408_v42, %v408_v42 }
  0xc3   : > { %421 = vadd.xlane.f32.xlu1 %v412_v43  ;;  %423 = vadd.xlane.f32.xlu0 %v413_v44 }
  0xc7   : > { %425 = vadd.xlane.f32.xlu1 %v414_v45 }
 0x144   : > { %v416_v46 = vpop.xlane.xlu0 %415 }
 0x145   : > { %v427_v47 = vmul.f32 0.0078125, %v416_v46 }
 0x147   : > { %v433_v48 = vadd.f32 1e-05, %v427_v47 }
 0x148   : > { %v418_v49 = vpop.xlane.xlu1 %417  ;;  %v420_v50 = vpop.xlane.xlu0 %419 }
 0x149   : > { %1148 = vrsqrt.f32 %v433_v48  ;;  %v428_v51 = vmul.f32 0.0078125, %v418_v49  ;;  %v429_v52 = vmul.f32 0.0078125, %v420_v50 }
 0x14b   : > { %v434_v53 = vadd.f32 1e-05, %v428_v51  ;;  %v435_v54 = vadd.f32 1e-05, %v429_v52 }
 0x14c   : > { %v422_v55 = vpop.xlane.xlu1 %421  ;;  %v424_v56 = vpop.xlane.xlu0 %423 }
 0x14d   : > { %1150 = vrsqrt.f32 %v434_v53  ;;  %v430_v57 = vmul.f32 0.0078125, %v422_v55  ;;  %v431_v58 = vmul.f32 0.0078125, %v424_v56 }
 0x14e   : > { %1152 = vrsqrt.f32 %v435_v54 }
 0x14f   : > { %v436_v59 = vadd.f32 1e-05, %v430_v57  ;;  %v437_v60 = vadd.f32 1e-05, %v431_v58 }
 0x150   : > { %v426_v61 = vpop.xlane.xlu1 %425 }
 0x151   : > { %1154 = vrsqrt.f32 %v436_v59  ;;  %v432_v62 = vmul.f32 0.0078125, %v426_v61 }
 0x152   : > { %1156 = vrsqrt.f32 %v437_v60 }
 0x153   : > { %v438_v63 = vadd.f32 1e-05, %v432_v62 }
 0x155   : > { %1158 = vrsqrt.f32 %v438_v63 }
 0x156   : > { %v1149_v0 = vpop.eup %1148 }
 0x157   : > { %v445_v1 = vmul.f32 %v1149_v0, %v403_v26 }
 0x159   : > { %v458_v5 = vmul.f32 %v1010_v2, %v445_v1 }
 0x15a   : > { %v1151_v3 = vpop.eup %1150 }
 0x15b   : > { %v1153_v4 = vpop.eup %1152  ;;  %v446_v6 = vmul.f32 %v1151_v3, %v404_v33  ;;  %v471_v12 = vadd.f32 %v1011_v7, %v458_v5 }
 0x15c   : > { %v447_v8 = vmul.f32 %v1153_v4, %v405_v27 }
 0x15d   : > { %v459_v9 = vmul.f32 %v1010_v2, %v446_v6 }
 0x15e   : > { %v1155_v10 = vpop.eup %1154  ;;  %v460_v14 = vmul.f32 %v1010_v2, %v447_v8 }
 0x15f   : > { %v1157_v11 = vpop.eup %1156  ;;  %v472_v13 = vadd.f32 %v1011_v7, %v459_v9  ;;  %v448_v15 = vmul.f32 %v1155_v10, %v406_v34 }
 0x160   : > { %v449_v16 = vmul.f32 %v1157_v11, %v407_v41  ;;  %v473_v20 = vadd.f32 %v1011_v7, %v460_v14 }
 0x161   : > { %v1076_v17 = vpack.c.bf16 %v472_v13, %v471_v12  ;;  %v461_v18 = vmul.f32 %v1010_v2, %v448_v15 }
 0x162   : > { %v1159_v19 = vpop.eup %1158  ;;  %v462_v22 = vmul.f32 %v1010_v2, %v449_v16 }
 0x163   : > { %1077 = vst [vmem:[#allocation2] sm:$0xff] %v1076_v17   ;;  %v474_v21 = vadd.f32 %v1011_v7, %v461_v18  ;;  %v450_v23 = vmul.f32 %v1159_v19, %v408_v42 }
 0x164   : > { %v475_v26 = vadd.f32 %v1011_v7, %v462_v22 }
 0x165   : > { %v1081_v24 = vpack.c.bf16 %v474_v21, %v473_v20  ;;  %v463_v25 = vmul.f32 %v1010_v2, %v450_v23 }
 0x167   : > { %1088 = vst [vmem:[#allocation2 + $0x8] sm:$0xff] %v1081_v24   ;;  %v476_v27 = vadd.f32 %v1011_v7, %v463_v25 }
 0x169   : > { %v1086_v28 = vpack.c.bf16 %v476_v27, %v475_v26 }
 0x16b   : > { %1089 = vst [vmem:[#allocation2 + $0x10] sm:$0xff] %v1086_v28  }
 0x16c PF: > { %v1160_v29 = vld [vmem:[%s1382_s24 + $0x74] ss:$8 sps:$4 sm:$0xff]   ;;  %v1162_v30 = vld [vmem:[%s1382_s24 + $0x70] ss:$8 sps:$4 sm:$0xff]   ;;  %v1275_v31 = vmov 0   ;;  %v1184_v46 = vld [vmem:[#allocation2] sm:$0xff]   ;;  %v531_v49 = vlaneseq }
 0x16d   : > { %671 = vmatprep.mubr.bf16.mxu0 %v1275_v31  ;;  %681 = vmatprep.mubr.bf16.mxu1 %v1275_v31  ;;  %v1163_v32 = vld [vmem:[%s1382_s24 + $0x64] ss:$8 sps:$4 sm:$0xff]   ;;  %v1165_v33 = vld [vmem:[%s1382_s24 + $0x60] ss:$8 sps:$4 sm:$0xff]   ;;  %v1166_v34 = vld [vmem:[%s1382_s24 + $0x54] ss:$8 sps:$4 sm:$0xff]  }
 0x16e   : > { %639 = vmatprep.subr.bf16.mxu0 %v1160_v29  ;;  %1090 = vmatprep.subr.bf16.mxu1 %v1160_v29  ;;  %v1168_v35 = vld [vmem:[%s1382_s24 + $0x50] ss:$8 sps:$4 sm:$0xff]   ;;  %v1169_v36 = vld [vmem:[%s1382_s24 + $0x44] ss:$8 sps:$4 sm:$0xff]   ;;  %v1171_v37 = vld [vmem:[%s1382_s24 + $0x40] ss:$8 sps:$4 sm:$0xff]  }
 0x16f   : > { %640 = vmatpush1.bf16.msra.mxu0 %v1162_v30  ;;  %1098 = vmatpush1.bf16.msra.mxu1 %v1162_v30  ;;  %v1172_v38 = vld [vmem:[%s1382_s24 + $0x34] ss:$8 sps:$4 sm:$0xff]   ;;  %v1174_v39 = vld [vmem:[%s1382_s24 + $0x30] ss:$8 sps:$4 sm:$0xff]   ;;  %v1175_v40 = vld [vmem:[%s1382_s24 + $0x24] ss:$8 sps:$4 sm:$0xff]  }
 0x170   : > { %641 = vmatprep.subr.bf16.mxu0 %v1163_v32  ;;  %1091 = vmatprep.subr.bf16.mxu1 %v1163_v32  ;;  %v1177_v41 = vld [vmem:[%s1382_s24 + $0x20] ss:$8 sps:$4 sm:$0xff]   ;;  %v1178_v42 = vld [vmem:[%s1382_s24 + $0x14] ss:$8 sps:$4 sm:$0xff]   ;;  %v1180_v43 = vld [vmem:[%s1382_s24 + $0x10] ss:$8 sps:$4 sm:$0xff]  }
 0x171   : > { %v1181_v44 = vld [vmem:[%s1382_s24 + $0x4] ss:$8 sps:$4 sm:$0xff]   ;;  %v1183_v45 = vld [vmem:[%s1382_s24] ss:$8 sps:$4 sm:$0xff]   ;;  %v1185_v47 = vld [vmem:[#allocation2 + $0x8] sm:$0xff]   ;;  %v532_v50 = vshrl.u32 %v531_v49, 7 }
 0x172   : > { %v1186_v48 = vld [vmem:[#allocation2 + $0x10] sm:$0xff]   ;;  %v529_v52 = vld [vmem:[%s369_s17] sm:$0x3]  ;;  %s1072_s12 = sshll.u32 (%p1341_p6), %s1265_s20, 3 }
 0x173   : > { %642 = vmatpush1.bf16.msra.mxu0 %v1165_v33  ;;  %1099 = vmatpush1.bf16.msra.mxu1 %v1165_v33  ;;  %v533_v51 = vsub.s32 0, %v532_v50  ;;  %v537_v53 = vsub.s32 1, %v532_v50  ;;  %s852_s6 = scalar_lea.vmem (%p1341_p6), %s1518_s5, %s1072_s12 }
 0x174   : > { %643 = vmatprep.subr.bf16.mxu0 %v1166_v34  ;;  %1092 = vmatprep.subr.bf16.mxu1 %v1166_v34 }
 0x175   : > { %v534_v54 = vrot.slane %v529_v52, %v533_v51  ;;  %v538_v55 = vrot.slane %v529_v52, %v537_v53 }
 0x177   : > { %644 = vmatpush1.bf16.msra.mxu0 %v1168_v35  ;;  %1100 = vmatpush1.bf16.msra.mxu1 %v1168_v35 }
 0x178   : > { %645 = vmatprep.subr.bf16.mxu0 %v1169_v36  ;;  %1093 = vmatprep.subr.bf16.mxu1 %v1169_v36 }
 0x17b   : > { %646 = vmatpush1.bf16.msra.mxu0 %v1171_v37  ;;  %1101 = vmatpush1.bf16.msra.mxu1 %v1171_v37 }
 0x17c   : > { %647 = vmatprep.subr.bf16.mxu0 %v1172_v38  ;;  %1094 = vmatprep.subr.bf16.mxu1 %v1172_v38 }
 0x17f   : > { %648 = vmatpush1.bf16.msra.mxu0 %v1174_v39  ;;  %1102 = vmatpush1.bf16.msra.mxu1 %v1174_v39 }
 0x180   : > { %649 = vmatprep.subr.bf16.mxu0 %v1175_v40  ;;  %1095 = vmatprep.subr.bf16.mxu1 %v1175_v40 }
 0x183   : > { %650 = vmatpush1.bf16.msra.mxu0 %v1177_v41  ;;  %1103 = vmatpush1.bf16.msra.mxu1 %v1177_v41 }
 0x184   : > { %651 = vmatprep.subr.bf16.mxu0 %v1178_v42  ;;  %1096 = vmatprep.subr.bf16.mxu1 %v1178_v42 }
 0x187   : > { %652 = vmatpush1.bf16.msra.mxu0 %v1180_v43  ;;  %1104 = vmatpush1.bf16.msra.mxu1 %v1180_v43 }
 0x188   : > { %653 = vmatprep.subr.bf16.mxu0 %v1181_v44  ;;  %1097 = vmatprep.subr.bf16.mxu1 %v1181_v44 }
 0x18b   : > { %654 = vmatpush1.bf16.msra.mxu0 %v1183_v45  ;;  %1105 = vmatpush1.bf16.msra.mxu1 %v1183_v45 }
 0x18e   : > { %672 = vmatmul.mubr.bf16.vlgmr.msra.gmra.mxu0 %v1184_v46  ;;  %682 = vmatmul.mubr.bf16.vlgmr.msra.gmra.mxu1 %v1185_v47 }
 0x18f   : > { %691 = vmatprep.mubr.bf16.mxu1 %v1275_v31 }
 0x196   : > { %692 = vmatmul.mubr.bf16.gmra.mxu1 %v1186_v48 }
 0x24e   : > { %v673_v56 = vpop.f32.mrf.mxu0  ;;  %v683_v57 = vpop.f32.mrf.mxu1 }
 0x24f   : > { %v1432_v58 = vadd.f32 %v673_v56, %v534_v54  ;;  %v1434_v59 = vadd.f32 %v683_v57, %v534_v54 }
 0x250   : > { %v675_v60 = vpop.f32.mrf.mxu0  ;;  %v685_v61 = vpop.f32.mrf.mxu1 }
 0x251   : > { %v1037_v62 = vmul.f32 -1.702, %v1432_v58  ;;  %v1041_v63 = vmul.f32 -1.702, %v1434_v59  ;;  %v1438_v0 = vadd.f32 %v675_v60, %v538_v55  ;;  %v1440_v1 = vadd.f32 %v685_v61, %v538_v55 }
 0x252   : > { %v677_v2 = vpop.f32.mrf.mxu0  ;;  %v687_v3 = vpop.f32.mrf.mxu1 }
 0x253   : > { %v726_v4 = vmul.f32 1.442695, %v1037_v62  ;;  %v734_v5 = vmul.f32 1.442695, %v1041_v63  ;;  %v1038_v6 = vmul.f32 -1.702, %v1438_v0  ;;  %v1443_v7 = vadd.f32 %v677_v2, %v534_v54 }
 0x254   : > { %v1042_v8 = vmul.f32 -1.702, %v1440_v1  ;;  %v1446_v9 = vadd.f32 %v687_v3, %v534_v54  ;;  %v679_v10 = vpop.f32.mrf.mxu0  ;;  %v689_v11 = vpop.f32.mrf.mxu1 }
 0x255   : > { %1187 = vpow2.f32 %v726_v4  ;;  %v728_v12 = vmul.f32 1.442695, %v1038_v6  ;;  %v1039_v13 = vmul.f32 -1.702, %v1443_v7  ;;  %v1449_v14 = vadd.f32 %v679_v10, %v538_v55 }
 0x256   : > { %1189 = vpow2.f32 %v734_v5  ;;  %v736_v15 = vmul.f32 1.442695, %v1042_v8  ;;  %v1043_v16 = vmul.f32 -1.702, %v1446_v9  ;;  %v1452_v17 = vadd.f32 %v689_v11, %v538_v55  ;;  %v693_v18 = vpop.f32.mrf.mxu1 }
 0x257   : > { %1191 = vpow2.f32 %v728_v12  ;;  %v730_v19 = vmul.f32 1.442695, %v1039_v13  ;;  %v1040_v20 = vmul.f32 -1.702, %v1449_v14  ;;  %v1455_v21 = vadd.f32 %v693_v18, %v534_v54 }
 0x258   : > { %1193 = vpow2.f32 %v736_v15  ;;  %v738_v22 = vmul.f32 1.442695, %v1043_v16  ;;  %v1044_v23 = vmul.f32 -1.702, %v1452_v17  ;;  %v695_v24 = vpop.f32.mrf.mxu1 }
 0x259   : > { %1195 = vpow2.f32 %v730_v19  ;;  %v732_v25 = vmul.f32 1.442695, %v1040_v20  ;;  %v1045_v26 = vmul.f32 -1.702, %v1455_v21  ;;  %v1459_v27 = vadd.f32 %v695_v24, %v538_v55 }
 0x25a   : > { %1197 = vpow2.f32 %v738_v22  ;;  %v740_v28 = vmul.f32 1.442695, %v1044_v23  ;;  %v697_v29 = vpop.f32.mrf.mxu1 }
 0x25b   : > { %1199 = vpow2.f32 %v732_v25  ;;  %v742_v30 = vmul.f32 1.442695, %v1045_v26  ;;  %v1046_v31 = vmul.f32 -1.702, %v1459_v27  ;;  %v1462_v32 = vadd.f32 %v697_v29, %v534_v54 }
 0x25c   : > { %1201 = vpow2.f32 %v740_v28  ;;  %v699_v33 = vpop.f32.mrf.mxu1 }
 0x25d   : > { %1203 = vpow2.f32 %v742_v30  ;;  %v744_v34 = vmul.f32 1.442695, %v1046_v31  ;;  %v1047_v35 = vmul.f32 -1.702, %v1462_v32  ;;  %v1465_v36 = vadd.f32 %v699_v33, %v538_v55 }
 0x25f   : > { %1205 = vpow2.f32 %v744_v34  ;;  %v746_v37 = vmul.f32 1.442695, %v1047_v35  ;;  %v1048_v38 = vmul.f32 -1.702, %v1465_v36 }
 0x261   : > { %1207 = vpow2.f32 %v746_v37  ;;  %v748_v39 = vmul.f32 1.442695, %v1048_v38 }
 0x262   : > { %v1188_v40 = vpop.eup %1187 }
 0x263   : > { %v1190_v41 = vpop.eup %1189  ;;  %v750_v42 = vadd.f32 1.0, %v1188_v40  ;;  %1209 = vpow2.f32 %v748_v39 }
 0x264   : > { %v1192_v43 = vpop.eup %1191  ;;  %v754_v44 = vadd.f32 1.0, %v1190_v41 }
 0x265   : > { %v1194_v45 = vpop.eup %1193  ;;  %1211 = vrcp.f32 %v750_v42  ;;  %v751_v46 = vadd.f32 1.0, %v1192_v43 }
 0x266   : > { %v1196_v47 = vpop.eup %1195  ;;  %1213 = vrcp.f32 %v754_v44  ;;  %v755_v48 = vadd.f32 1.0, %v1194_v45 }
 0x267   : > { %v1198_v49 = vpop.eup %1197  ;;  %1215 = vrcp.f32 %v751_v46  ;;  %v752_v50 = vadd.f32 1.0, %v1196_v47 }
 0x268   : > { %v1200_v51 = vpop.eup %1199  ;;  %1217 = vrcp.f32 %v755_v48  ;;  %v756_v52 = vadd.f32 1.0, %v1198_v49 }
 0x269   : > { %v1202_v53 = vpop.eup %1201  ;;  %1219 = vrcp.f32 %v752_v50  ;;  %v753_v54 = vadd.f32 1.0, %v1200_v51 }
 0x26a   : > { %v1204_v55 = vpop.eup %1203  ;;  %1221 = vrcp.f32 %v756_v52  ;;  %v757_v56 = vadd.f32 1.0, %v1202_v53 }
 0x26b   : > { %1223 = vrcp.f32 %v753_v54  ;;  %v758_v57 = vadd.f32 1.0, %v1204_v55 }
 0x26c   : > { %v1206_v60 = vpop.eup %1205  ;;  %1225 = vrcp.f32 %v757_v56 }
 0x26d   : > { %1227 = vrcp.f32 %v758_v57  ;;  %v759_v61 = vadd.f32 1.0, %v1206_v60 }
 0x26e   : > { %v1208_v62 = vpop.eup %1207 }
 0x26f   : > { %1229 = vrcp.f32 %v759_v61  ;;  %v760_v63 = vadd.f32 1.0, %v1208_v62 }
 0x270   : > { %v1210_v2 = vpop.eup %1209 }
 0x271   : > { %1231 = vrcp.f32 %v760_v63  ;;  %v761_v3 = vadd.f32 1.0, %v1210_v2 }
 0x272   : > { %v1212_v4 = vpop.eup %1211 }
 0x273   : > { %v1214_v5 = vpop.eup %1213  ;;  %1233 = vrcp.f32 %v761_v3  ;;  %v786_v10 = vmul.f32 %v1212_v4, %v1432_v58 }
 0x274   : > { %v1216_v6 = vpop.eup %1215  ;;  %v790_v13 = vmul.f32 %v1214_v5, %v1434_v59 }
 0x275   : > { %v1218_v8 = vpop.eup %1217  ;;  %v787_v11 = vmul.f32 %v1216_v6, %v1438_v0 }
 0x276   : > { %v1220_v12 = vpop.eup %1219  ;;  %v791_v15 = vmul.f32 %v1218_v8, %v1440_v1 }
 0x277   : > { %v1222_v16 = vpop.eup %1221  ;;  %v1066_v18 = vpack.c.bf16 %v787_v11, %v786_v10  ;;  %v788_v23 = vmul.f32 %v1220_v12, %v1443_v7 }
 0x278   : > { %v1224_v19 = vpop.eup %1223  ;;  %v1068_v20 = vpack.c.bf16 %v791_v15, %v790_v13  ;;  %v792_v0 = vmul.f32 %v1222_v16, %v1446_v9 }
 0x279   : > { %v1226_v22 = vpop.eup %1225  ;;  %834 = vst [vmem:[%s1384_s25] sm:$0xff] %v1066_v18  ;;  %v789_v58 = vmul.f32 %v1224_v19, %v1449_v14 }
 0x27a   : > { %v1228_v24 = vpop.eup %1227  ;;  %836 = vst [vmem:[%s1384_s25 + $0x10] sm:$0xff] %v1068_v20  ;;  %v793_v59 = vmul.f32 %v1226_v22, %v1452_v17 }
 0x27b   : > { %v1067_v1 = vpack.c.bf16 %v789_v58, %v788_v23  ;;  %v794_v28 = vmul.f32 %v1228_v24, %v1455_v21 }
 0x27c   : > { %v1230_v25 = vpop.eup %1229  ;;  %v1069_v26 = vpack.c.bf16 %v793_v59, %v792_v0 }
 0x27d   : > { %835 = vst [vmem:[%s1384_s25 + $0x8] sm:$0xff] %v1067_v1  ;;  %v795_v29 = vmul.f32 %v1230_v25, %v1459_v27 }
 0x27e   : > { %v1232_v30 = vpop.eup %1231  ;;  %837 = vst [vmem:[%s1384_s25 + $0x18] sm:$0xff] %v1069_v26 }
 0x27f   : > { %v1070_v7 = vpack.c.bf16 %v795_v29, %v794_v28  ;;  %v796_v14 = vmul.f32 %v1232_v30, %v1462_v32 }
 0x280   : > { %v1234_v31 = vpop.eup %1233  ;;  %v891_v17 = vld [vmem:[%s1384_s25] sm:$0xff] (%p1341_p6) }
 0x281   : > { %838 = vst [vmem:[%s1384_s25 + $0x20] sm:$0xff] %v1070_v7  ;;  %v797_v9 = vmul.f32 %v1234_v31, %v1465_v36  ;;  %846 = sbr.rel (!%p1341_p6) target bundleno = 654 (0x28e), region = 86  ;;  %v895_v27 = vld [vmem:[%s1384_s25 + $0x10] sm:$0xff] (%p1341_p6)  ;;  %892 = vst [vmem:[%s852_s6] sm:$0xff] (%p1341_p6), %v891_v17 }
 0x282   : > { %896 = vst [vmem:[%s852_s6 + $0x20] sm:$0xff] (%p1341_p6), %v895_v27 }
 0x283   : > { %v1071_v33 = vpack.c.bf16 %v797_v9, %v796_v14 }
 0x284   : > { %v893_v21 = vld [vmem:[%s1384_s25 + $0x8] sm:$0xff] (%p1341_p6) }
 0x285   : > { %839 = vst [vmem:[%s1384_s25 + $0x28] sm:$0xff] %v1071_v33  ;;  %v897_v32 = vld [vmem:[%s1384_s25 + $0x18] sm:$0xff] (%p1341_p6)  ;;  %894 = vst [vmem:[%s852_s6 + $0x10] sm:$0xff] (%p1341_p6), %v893_v21 }
 0x286   : > { %898 = vst [vmem:[%s852_s6 + $0x30] sm:$0xff] %v897_v32 }
 0x288   : > { %v899_v34 = vld [vmem:[%s1384_s25 + $0x20] sm:$0xff] }
 0x289   : > { %900 = vst [vmem:[%s852_s6 + $0x40] sm:$0xff] %v899_v34 }
 0x28c   : > { %v901_v35 = vld [vmem:[%s1384_s25 + $0x28] sm:$0xff] }
 0x28d   : > { %902 = vst [vmem:[%s852_s6 + $0x50] sm:$0xff] %v901_v35 }
 0x28e PF: > { %s15_s22 = sadd.s32 1, %s1273_s22   ;;  %s1520_s18 = smov %s1261_s19 }
 0x28f   : > { %p12_p13 = scmp.ge.s32.totalorder %s15_s22, 4   ;;  %s1521_s19 = smov %s1346_s28 }
 0x290   : > { %s1522_s20 = smov %s1269_s21  ;;  %s1523_s21 = smov %s1525_s23 }
 0x291   :  { %14 = sbr.rel (!%p12_p13) target bundleno = 3 (0x3), region = 161 }

</bundles_post_ra>
